<compile_context>
chip_gen: v6e
topology: v6e:2x2x1
jax: 0.10.0
libtpu: 0.0.40
codegen_flags: <defaults>
</compile_context>

<pallas_src>
import math
from functools import partial, lru_cache

import numpy as np
import jax
import jax.numpy as jnp
from jax.experimental import pallas as pl
from jax.experimental.pallas import tpu as pltpu

BN_EPS = 1e-5  # PyTorch BatchNorm2d default


# ----------------------------- Pallas kernels -----------------------------

def _matmul_affine_kernel(p_ref, w_ref, s_ref, b_ref, o_ref, *, relu):
    # (TM, K) @ (K, C) on the MXU (bf16 in, f32 acc), then per-channel affine (+ ReLU).
    acc = jnp.dot(p_ref[...], w_ref[...], preferred_element_type=jnp.float32)
    y = acc * s_ref[...] + b_ref[...]
    if relu:
        y = jnp.maximum(y, 0.0)
    o_ref[...] = y.astype(o_ref.dtype)


def fused_conv_matmul(patches, w, scale, shift, relu=True, tm_max=512):
    """patches: (M, K) f32; w: (K, C) bf16; scale/shift: (C,) f32. Returns (M, C) f32."""
    M, K = patches.shape
    C = w.shape[1]
    m_pad = ((M + 7) // 8) * 8
    tm = min(tm_max, m_pad)
    m_pad = ((m_pad + tm - 1) // tm) * tm
    if m_pad != M:
        patches = jnp.pad(patches, ((0, m_pad - M), (0, 0)))
    out = pl.pallas_call(
        partial(_matmul_affine_kernel, relu=relu),
        out_shape=jax.ShapeDtypeStruct((m_pad, C), jnp.float32),
        grid=(m_pad // tm,),
        in_specs=[
            pl.BlockSpec((tm, K), lambda i: (i, 0)),
            pl.BlockSpec((K, C), lambda i: (0, 0)),
            pl.BlockSpec((1, C), lambda i: (0, 0)),
            pl.BlockSpec((1, C), lambda i: (0, 0)),
        ],
        out_specs=pl.BlockSpec((tm, C), lambda i: (i, 0)),
        compiler_params=pltpu.CompilerParams(dimension_semantics=("parallel",)),
    )(patches.astype(jnp.bfloat16), w, scale.reshape(1, C), shift.reshape(1, C))
    return out[:M]


def _make_fire_kernel(H, W, s1, cout, has_res):
    """Fully fused FireModule: squeeze + packed (e1x1|e3x3) expand + residual, per image."""
    HW = H * W
    P = W + 1                      # halo rows for the flattened-HW shifted reads
    taps = [(kh - 1, kw - 1) for kh in range(3) for kw in range(3)]

    def kernel(*refs):
        if has_res:
            (x_ref, wsq, ssq, bsq, wexp, sexp, bexp, mask,
             wres, sres, bres, o_ref, sext) = refs
        else:
            (x_ref, wsq, ssq, bsq, wexp, sexp, bexp, mask,
             o_ref, sext) = refs

        x = x_ref[...]                                     # (HW, Cin) f32
        xb = x.astype(jnp.bfloat16)

        # squeeze 1x1 conv + folded BN + ReLU
        s = jnp.dot(xb, wsq[...], preferred_element_type=jnp.float32)
        s = jnp.maximum(s * ssq[...] + bsq[...], 0.0)      # (HW, s1) f32

        # residual path (1x1 conv+BN+ReLU, or plain identity when Cin == Cout)
        if has_res:
            idn = jnp.dot(xb, wres[...], preferred_element_type=jnp.float32)
            idn = jnp.maximum(idn * sres[...] + bres[...], 0.0)
        else:
            idn = x

        # squeeze activation in a flattened halo scratch: W+1 zero rows on each end.
        # Only the halo rows need re-zeroing; the interior is fully overwritten below.
        halo = jnp.zeros((P, s1), jnp.float32)
        sext[0:P, :] = halo
        sext[P + HW:2 * P + HW, :] = halo
        sext[P:P + HW, :] = s

        # Packed expand: 9 shifted squeeze slabs each hit one (s1, e1x1+e3x3) weight
        # tap; the 1x1 expand weight rides in the centre tap, so both branches and the
        # channel concat come out of a single f32 accumulator -- no HBM concat.
        # The centre tap is just `s` (no shift): use it directly to init the accumulator.
        acc = jnp.dot(s.astype(jnp.bfloat16), wexp[4],
                      preferred_element_type=jnp.float32)   # (HW, cout) f32
        for t, (dh, dw) in enumerate(taps):
            if dh == 0 and dw == 0:
                continue
            d = dh * W + dw
            slab = sext[P + d:P + d + HW, :]                # (HW, s1) f32
            if dw != 0:
                # Row-boundary (dh) out-of-image taps already read zeros from the halo;
                # only the left/right column wrap needs masking.
                slab = slab * mask[0 if dw < 0 else 1]
            acc = acc + jnp.dot(slab.astype(jnp.bfloat16), wexp[t],
                                preferred_element_type=jnp.float32)

        y = jnp.maximum(acc * sexp[...] + bexp[...], 0.0) + idn
        o_ref[...] = y.astype(o_ref.dtype)

    return kernel


def _make_pool_kernel(H, W, C, oh, ow):
    """MaxPool 3x3 stride 2 pad 1, per image, via one padded VMEM copy + 9 strided reads."""
    def kernel(x_ref, o_ref, xp_ref):
        xp_ref[...] = jnp.full(xp_ref.shape, -jnp.inf, dtype=xp_ref.dtype)
        xp_ref[1:H + 1, 1:W + 1, :] = x_ref[...]
        m = xp_ref[pl.ds(0, oh, 2), pl.ds(0, ow, 2), :]
        for kh in range(3):
            for kw in range(3):
                if kh == 0 and kw == 0:
                    continue
                m = jnp.maximum(m, xp_ref[pl.ds(kh, oh, 2), pl.ds(kw, ow, 2), :])
        o_ref[...] = m
    return kernel


def _head_kernel(x_ref, w_ref, b_ref, o_ref):
    # global average pool then 1x1 conv (+bias); they commute since the conv is linear.
    m = jnp.mean(x_ref[...], axis=0, keepdims=True)        # (1, C) f32
    y = jnp.dot(m.astype(jnp.bfloat16), w_ref[...],
                preferred_element_type=jnp.float32) + b_ref[...]
    o_ref[...] = y.astype(o_ref.dtype)


# ----------------------------- wrappers -----------------------------

def im2col(x, k, stride, pad):
    # host-side patch extraction (stem only); plain XLA glue, one-off tiny layer.
    N, H, W, C = x.shape
    if pad:
        x = jnp.pad(x, ((0, 0), (pad, pad), (pad, pad), (0, 0)))
    oh = (H + 2 * pad - k) // stride + 1
    ow = (W + 2 * pad - k) // stride + 1
    cols = []
    for kh in range(k):
        for kw in range(k):
            cols.append(x[:, kh:kh + stride * oh:stride, kw:kw + stride * ow:stride, :])
    patches = jnp.stack(cols, axis=3)                       # (N, oh, ow, k*k, C)
    return patches.reshape(N * oh * ow, k * k * C), oh, ow


@lru_cache(maxsize=None)
def _fire_col_masks(H, W):
    # Column-validity masks for the two horizontally shifted tap groups:
    #   mask[0]: dw = -1 taps (zero where w == 0)
    #   mask[1]: dw = +1 taps (zero where w == W-1)
    # Row (dh) boundaries are handled by the W+1-row zero halo, so no row masks needed.
    w = np.arange(H * W) % W
    m = np.stack([w >= 1, w <= W - 2], axis=0).astype(np.float32)[:, :, None]
    return jnp.asarray(m)                                   # (2, HW, 1)


def fire_apply(x, p, H, W):
    """x: (N, H*W, Cin) f32 -> (N, H*W, e1x1+e3x3) f32, one pallas_call per fire."""
    N, HW, Cin = x.shape
    s1, cout = p['s1x1'], p['cout']
    P = W + 1
    has_res = p['res'] is not None
    if not has_res:
        assert Cin == cout, 'identity residual needs matching channels'
    mask = _fire_col_masks(H, W)

    inputs = [x, p['wsq'], p['ssq'], p['bsq'], p['wexp'], p['sexp'], p['bexp'], mask]
    in_specs = [
        pl.BlockSpec((None, HW, Cin), lambda n: (n, 0, 0)),
        pl.BlockSpec((Cin, s1), lambda n: (0, 0)),
        pl.BlockSpec((1, s1), lambda n: (0, 0)),
        pl.BlockSpec((1, s1), lambda n: (0, 0)),
        pl.BlockSpec((9, s1, cout), lambda n: (0, 0, 0)),
        pl.BlockSpec((1, cout), lambda n: (0, 0)),
        pl.BlockSpec((1, cout), lambda n: (0, 0)),
        pl.BlockSpec((2, HW, 1), lambda n: (0, 0, 0)),
    ]
    if has_res:
        inputs += [p['res']['w'], p['res']['s'], p['res']['b']]
        in_specs += [
            pl.BlockSpec((Cin, cout), lambda n: (0, 0)),
            pl.BlockSpec((1, cout), lambda n: (0, 0)),
            pl.BlockSpec((1, cout), lambda n: (0, 0)),
        ]

    return pl.pallas_call(
        _make_fire_kernel(H, W, s1, cout, has_res),
        out_shape=jax.ShapeDtypeStruct((N, HW, cout), jnp.float32),
        grid=(N,),
        in_specs=in_specs,
        out_specs=pl.BlockSpec((None, HW, cout), lambda n: (n, 0, 0)),
        scratch_shapes=[pltpu.VMEM((HW + 2 * P, s1), jnp.float32)],
        compiler_params=pltpu.CompilerParams(dimension_semantics=("parallel",)),
    )(*inputs)


def max_pool_3x3_s2(x4):
    N, H, W, C = x4.shape
    oh = (H - 1) // 2 + 1
    ow = (W - 1) // 2 + 1
    out = pl.pallas_call(
        _make_pool_kernel(H, W, C, oh, ow),
        out_shape=jax.ShapeDtypeStruct((N, oh, ow, C), x4.dtype),
        grid=(N,),
        in_specs=[pl.BlockSpec((None, H, W, C), lambda n: (n, 0, 0, 0))],
        out_specs=pl.BlockSpec((None, oh, ow, C), lambda n: (n, 0, 0, 0)),
        scratch_shapes=[pltpu.VMEM((H + 2, W + 2, C), x4.dtype)],
        compiler_params=pltpu.CompilerParams(dimension_semantics=("parallel",)),
    )(x4)
    return out


def head_apply(x, p):
    """Fused (dropout-identity ->) global avg pool -> 1x1 conv -> flatten."""
    N, HW, C = x.shape
    K = p['w'].shape[1]
    out = pl.pallas_call(
        _head_kernel,
        out_shape=jax.ShapeDtypeStruct((N, 1, K), jnp.float32),
        grid=(N,),
        in_specs=[
            pl.BlockSpec((None, HW, C), lambda n: (n, 0, 0)),
            pl.BlockSpec((C, K), lambda n: (0, 0)),
            pl.BlockSpec((1, K), lambda n: (0, 0)),
        ],
        out_specs=pl.BlockSpec((None, 1, K), lambda n: (n, 0, 0)),
        compiler_params=pltpu.CompilerParams(dimension_semantics=("parallel",)),
    )(x, p['w'], p['b'])
    return out.reshape(N, K)


# ----------------------------- deterministic param init -----------------------------

def _bn_affine(key, out_c):
    kg, kb, km, kv = jax.random.split(key, 4)
    gamma = 1.0 + 0.1 * jax.random.normal(kg, (out_c,), jnp.float32)
    beta = 0.1 * jax.random.normal(kb, (out_c,), jnp.float32)
    mean = 0.1 * jax.random.normal(km, (out_c,), jnp.float32)
    var = 0.5 + jax.random.uniform(kv, (out_c,), jnp.float32)
    scale = gamma / jnp.sqrt(var + BN_EPS)       # fold inference BN into affine
    shift = beta - mean * scale
    return scale, shift


def init_conv_block(key, in_c, out_c, k):
    kw, kbn = jax.random.split(key)
    w = jax.random.normal(kw, (k, k, in_c, out_c), jnp.float32) / math.sqrt(k * k * in_c)
    scale, shift = _bn_affine(kbn, out_c)
    return {'k': k, 'w': w, 'scale': scale, 'shift': shift}


def init_last_conv(key, in_c, out_c):
    kw, kb = jax.random.split(key)
    w = jax.random.normal(kw, (in_c, out_c), jnp.float32) / math.sqrt(in_c)
    bias = 0.1 * jax.random.normal(kb, (out_c,), jnp.float32)
    return {'w': w.astype(jnp.bfloat16), 'b': bias.reshape(1, out_c)}


def init_fire(key, in_c, s1x1, e1x1, e3x3, residual_conv):
    kr, ks, k1, k3 = jax.random.split(key, 4)
    sq = init_conv_block(ks, in_c, s1x1, 1)
    c1 = init_conv_block(k1, s1x1, e1x1, 1)
    c3 = init_conv_block(k3, s1x1, e3x3, 3)
    cout = e1x1 + e3x3
    # Pack both expand branches into one 9-tap weight: columns [:e1x1] hold the 1x1
    # weight on the centre tap only, columns [e1x1:] hold the 3x3 weight per tap.
    wexp = jnp.zeros((9, s1x1, cout), jnp.float32)
    wexp = wexp.at[:, :, e1x1:].set(c3['w'].reshape(9, s1x1, e3x3))
    wexp = wexp.at[4, :, :e1x1].set(c1['w'].reshape(s1x1, e1x1))
    p = {
        's1x1': s1x1, 'e1x1': e1x1, 'e3x3': e3x3, 'cout': cout,
        'wsq': sq['w'].reshape(in_c, s1x1).astype(jnp.bfloat16),
        'ssq': sq['scale'].reshape(1, s1x1),
        'bsq': sq['shift'].reshape(1, s1x1),
        'wexp': wexp.astype(jnp.bfloat16),
        'sexp': jnp.concatenate([c1['scale'], c3['scale']]).reshape(1, cout),
        'bexp': jnp.concatenate([c1['shift'], c3['shift']]).reshape(1, cout),
        'res': None,
    }
    if residual_conv:
        rb = init_conv_block(kr, in_c, cout, 1)
        p['res'] = {'w': rb['w'].reshape(in_c, cout).astype(jnp.bfloat16),
                    's': rb['scale'].reshape(1, cout),
                    'b': rb['shift'].reshape(1, cout)}
    return p


def init_squeezenet(key, in_channels=4, num_classes=16, base_e=16, incr_e=16,
                    freq=2, pct3x3=0.5, squeeze_ratio=0.25, num_fire_modules=4):
    assert num_fire_modules % freq == 0, 'num_fire_modules must be divisible by freq'
    keys = jax.random.split(key, 2 + num_fire_modules * freq)
    fc = init_conv_block(keys[0], in_channels, 96, 7)       # stride 2, pad 3 at apply time
    first = {'w': fc['w'].reshape(7 * 7 * in_channels, 96).astype(jnp.bfloat16),
             'scale': fc['scale'], 'shift': fc['shift']}
    layers = []
    max_pooling_idx = [0, 3, 7]
    in_c = 96
    ki = 2
    out_c = in_c
    for i in range(num_fire_modules):
        if i in max_pooling_idx:
            layers.append(('pool', None))
        out_c = base_e + int(incr_e * math.floor(i / freq))
        s1x1 = int(out_c * squeeze_ratio)
        e1x1 = int(out_c * pct3x3)
        e3x3 = int(out_c * (1 - pct3x3))
        residual_conv = (i % freq == 0)
        layers.append(('fire', init_fire(keys[ki], in_c, s1x1, e1x1, e3x3, residual_conv))); ki += 1
        for _ in range(freq - 1):
            layers.append(('fire', init_fire(keys[ki], out_c, s1x1, e1x1, e3x3, residual_conv))); ki += 1
        in_c = out_c
    last = init_last_conv(keys[1], out_c, num_classes)
    return {'first': first, 'layers': layers, 'last': last}


# ----------------------------- forward -----------------------------

def squeezenet_forward(params, x_nchw):
    x = jnp.transpose(x_nchw, (0, 2, 3, 1)).astype(jnp.float32)    # NCHW -> NHWC
    N = x.shape[0]
    # stem: 7x7 s2 p3 conv + BN + ReLU as one fused matmul (host-side im2col)
    patches, H, W = im2col(x, 7, 2, 3)
    p0 = params['first']
    y = fused_conv_matmul(patches, p0['w'], p0['scale'], p0['shift'], relu=True)
    C = p0['w'].shape[1]
    x = y.reshape(N, H * W, C)
    for kind, p in params['layers']:
        if kind == 'pool':
            x4 = max_pool_3x3_s2(x.reshape(N, H, W, -1))
            _, H, W, C = x4.shape
            x = x4.reshape(N, H * W, C)
        else:
            x = fire_apply(x, p, H, W)
            C = p['cout']
    # TODO(synk): nn.Dropout reproduced as inference-mode identity (training RNG mask not modeled).
    return head_apply(x, params['last'])                            # (N, num_classes)


if __name__ == "__main__":
    key = jax.random.PRNGKey(0)
    pkey, xkey = jax.random.split(key)
    NUM_CLASSES = 16
    params = init_squeezenet(pkey, in_channels=4, num_classes=NUM_CLASSES,
                             base_e=16, incr_e=16, freq=2, pct3x3=0.5,
                             squeeze_ratio=0.25, num_fire_modules=4)
    x = jax.random.normal(xkey, (2, 4, 16, 16), jnp.float32)        # NCHW, like PyTorch

    fwd = jax.jit(partial(squeezenet_forward, params))
    out = fwd(x)
    jax.block_until_ready(out)
    assert out.shape == (2, NUM_CLASSES) and out.dtype == jnp.float32
    print("KERNEL_OK")
</pallas_src>

<mosaic_0001>
module attributes {stable_mosaic.version = 11 : i64} {
  func.func @_matmul_affine_kernel(%arg0: i32, %arg1: memref<128x196xbf16, #tpu.memory_space<vmem>>, %arg2: memref<196x96xbf16, #tpu.memory_space<vmem>>, %arg3: memref<1x96xf32, #tpu.memory_space<vmem>>, %arg4: memref<1x96xf32, #tpu.memory_space<vmem>>, %arg5: memref<128x96xf32, #tpu.memory_space<vmem>>) attributes {dimension_semantics = [#tpu.dimension_semantics<parallel>], iteration_bounds = array<i64: 1>, scalar_prefetch = 0 : i64, scratch_operands = 0 : i64, tpu.core_type = #tpu.core_type<tc>, window_params = [{transform_indices = @transform_0, window_bounds = array<i64: 128, 196>}, {pipeline_mode = #tpu.pipeline_mode<synchronous>, transform_indices = @transform_1, window_bounds = array<i64: 196, 96>}, {pipeline_mode = #tpu.pipeline_mode<synchronous>, transform_indices = @transform_2, window_bounds = array<i64: 1, 96>}, {pipeline_mode = #tpu.pipeline_mode<synchronous>, transform_indices = @transform_3, window_bounds = array<i64: 1, 96>}, {transform_indices = @transform_4, window_bounds = array<i64: 128, 96>}]} {
    %c0 = arith.constant 0 : index
    %c0_0 = arith.constant 0 : index
    %0 = vector.load %arg1[%c0, %c0_0] : memref<128x196xbf16, #tpu.memory_space<vmem>>, vector<128x196xbf16>
    %c0_1 = arith.constant 0 : index
    %c0_2 = arith.constant 0 : index
    %1 = vector.load %arg2[%c0_1, %c0_2] : memref<196x96xbf16, #tpu.memory_space<vmem>>, vector<196x96xbf16>
    %cst = arith.constant dense<0.000000e+00> : vector<128x96xf32>
    %2 = tpu.matmul %0, %1, %cst {dimension_numbers = #tpu.dot_dimension_numbers<[1], [0], [0], [1], [0, 0, 1, 1], [], []>} : vector<128x196xbf16>, vector<196x96xbf16>, vector<128x96xf32> -> vector<128x96xf32>
    %c0_3 = arith.constant 0 : index
    %c0_4 = arith.constant 0 : index
    %3 = vector.load %arg3[%c0_3, %c0_4] : memref<1x96xf32, #tpu.memory_space<vmem>>, vector<1x96xf32>
    %4 = vector.broadcast %3 : vector<1x96xf32> to vector<128x96xf32>
    %5 = arith.mulf %2, %4 : vector<128x96xf32>
    %c0_5 = arith.constant 0 : index
    %c0_6 = arith.constant 0 : index
    %6 = vector.load %arg4[%c0_5, %c0_6] : memref<1x96xf32, #tpu.memory_space<vmem>>, vector<1x96xf32>
    %7 = vector.broadcast %6 : vector<1x96xf32> to vector<128x96xf32>
    %8 = arith.addf %5, %7 : vector<128x96xf32>
    %cst_7 = arith.constant 0.000000e+00 : f32
    %9 = vector.broadcast %cst_7 : f32 to vector<128x96xf32>
    %10 = arith.maximumf %8, %9 : vector<128x96xf32>
    %c0_8 = arith.constant 0 : index
    %c0_9 = arith.constant 0 : index
    %11 = vector.load %arg5[%c0_8, %c0_9] : memref<128x96xf32, #tpu.memory_space<vmem>>, vector<128x96xf32>
    tpu.vector_store %arg5[%c0_8, %c0_9], %10 {strides = array<i32>} : memref<128x96xf32, #tpu.memory_space<vmem>>, vector<128x96xf32>,
    return
  }
  func.func @transform_0(%arg0: i32) -> (i32, i32) {
    %c0_i32 = arith.constant 0 : i32
    %c0_i32_0 = arith.constant 0 : i32
    return %arg0, %c0_i32 : i32, i32
  }
  func.func @transform_1(%arg0: i32) -> (i32, i32) {
    %c0_i32 = arith.constant 0 : i32
    %c0_i32_0 = arith.constant 0 : i32
    %c0_i32_1 = arith.constant 0 : i32
    return %c0_i32, %c0_i32_0 : i32, i32
  }
  func.func @transform_2(%arg0: i32) -> (i32, i32) {
    %c0_i32 = arith.constant 0 : i32
    %c0_i32_0 = arith.constant 0 : i32
    %c0_i32_1 = arith.constant 0 : i32
    return %c0_i32, %c0_i32_0 : i32, i32
  }
  func.func @transform_3(%arg0: i32) -> (i32, i32) {
    %c0_i32 = arith.constant 0 : i32
    %c0_i32_0 = arith.constant 0 : i32
    %c0_i32_1 = arith.constant 0 : i32
    return %c0_i32, %c0_i32_0 : i32, i32
  }
  func.func @transform_4(%arg0: i32) -> (i32, i32) {
    %c0_i32 = arith.constant 0 : i32
    %c0_i32_0 = arith.constant 0 : i32
    return %arg0, %c0_i32 : i32, i32
  }
}

module attributes {stable_mosaic.version = 11 : i64} {
  func.func @kernel(%arg0: i32, %arg1: memref<1x8x8x96xf32, #tpu.memory_space<vmem>>, %arg2: memref<1x4x4x96xf32, #tpu.memory_space<vmem>>, %arg3: memref<10x10x96xf32, #tpu.memory_space<vmem>>) attributes {dimension_semantics = [#tpu.dimension_semantics<parallel>], iteration_bounds = array<i64: 2>, scalar_prefetch = 0 : i64, scratch_operands = 1 : i64, tpu.core_type = #tpu.core_type<tc>, window_params = [{transform_indices = @transform_0, window_bounds = array<i64: 1, 8, 8, 96>}, {transform_indices = @transform_1, window_bounds = array<i64: 1, 4, 4, 96>}]} {
    %cst = arith.constant 0xFF800000 : f32
    %0 = vector.broadcast %cst : f32 to vector<10x10x96xf32>
    %c0 = arith.constant 0 : index
    %c0_0 = arith.constant 0 : index
    %c0_1 = arith.constant 0 : index
    %1 = vector.load %arg3[%c0, %c0_0, %c0_1] : memref<10x10x96xf32, #tpu.memory_space<vmem>>, vector<10x10x96xf32>
    tpu.vector_store %arg3[%c0, %c0_0, %c0_1], %0 {strides = array<i32>} : memref<10x10x96xf32, #tpu.memory_space<vmem>>, vector<10x10x96xf32>,
    %c0_2 = arith.constant 0 : index
    %c0_3 = arith.constant 0 : index
    %c0_4 = arith.constant 0 : index
    %c0_5 = arith.constant 0 : index
    %2 = vector.load %arg1[%c0_2, %c0_3, %c0_4, %c0_5] : memref<1x8x8x96xf32, #tpu.memory_space<vmem>>, vector<1x8x8x96xf32>
    %3 = vector.shape_cast %2 : vector<1x8x8x96xf32> to vector<8x8x96xf32>
    %c1 = arith.constant 1 : index
    %c1_6 = arith.constant 1 : index
    %c0_7 = arith.constant 0 : index
    %4 = vector.load %arg3[%c1, %c1_6, %c0_7] : memref<10x10x96xf32, #tpu.memory_space<vmem>>, vector<8x8x96xf32>
    tpu.vector_store %arg3[%c1, %c1_6, %c0_7], %3 {strides = array<i32>} : memref<10x10x96xf32, #tpu.memory_space<vmem>>, vector<8x8x96xf32>,
    %c0_8 = arith.constant 0 : index
    %c0_9 = arith.constant 0 : index
    %c0_10 = arith.constant 0 : index
    %5 = tpu.strided_load %arg3[%c0_8, %c0_9, %c0_10] {strides = array<i32: 2, 2, 1>} : memref<10x10x96xf32, #tpu.memory_space<vmem>>, vector<4x4x96xf32>
    %c0_11 = arith.constant 0 : index
    %c1_12 = arith.constant 1 : index
    %c0_13 = arith.constant 0 : index
    %6 = tpu.strided_load %arg3[%c0_11, %c1_12, %c0_13] {strides = array<i32: 2, 2, 1>} : memref<10x10x96xf32, #tpu.memory_space<vmem>>, vector<4x4x96xf32>
    %7 = arith.maximumf %5, %6 : vector<4x4x96xf32>
    %c0_14 = arith.constant 0 : index
    %c2 = arith.constant 2 : index
    %c0_15 = arith.constant 0 : index
    %8 = tpu.strided_load %arg3[%c0_14, %c2, %c0_15] {strides = array<i32: 2, 2, 1>} : memref<10x10x96xf32, #tpu.memory_space<vmem>>, vector<4x4x96xf32>
    %9 = arith.maximumf %7, %8 : vector<4x4x96xf32>
    %c1_16 = arith.constant 1 : index
    %c0_17 = arith.constant 0 : index
    %c0_18 = arith.constant 0 : index
    %10 = tpu.strided_load %arg3[%c1_16, %c0_17, %c0_18] {strides = array<i32: 2, 2, 1>} : memref<10x10x96xf32, #tpu.memory_space<vmem>>, vector<4x4x96xf32>
    %11 = arith.maximumf %9, %10 : vector<4x4x96xf32>
    %c1_19 = arith.constant 1 : index
    %c1_20 = arith.constant 1 : index
    %c0_21 = arith.constant 0 : index
    %12 = tpu.strided_load %arg3[%c1_19, %c1_20, %c0_21] {strides = array<i32: 2, 2, 1>} : memref<10x10x96xf32, #tpu.memory_space<vmem>>, vector<4x4x96xf32>
    %13 = arith.maximumf %11, %12 : vector<4x4x96xf32>
    %c1_22 = arith.constant 1 : index
    %c2_23 = arith.constant 2 : index
    %c0_24 = arith.constant 0 : index
    %14 = tpu.strided_load %arg3[%c1_22, %c2_23, %c0_24] {strides = array<i32: 2, 2, 1>} : memref<10x10x96xf32, #tpu.memory_space<vmem>>, vector<4x4x96xf32>
    %15 = arith.maximumf %13, %14 : vector<4x4x96xf32>
    %c2_25 = arith.constant 2 : index
    %c0_26 = arith.constant 0 : index
    %c0_27 = arith.constant 0 : index
    %16 = tpu.strided_load %arg3[%c2_25, %c0_26, %c0_27] {strides = array<i32: 2, 2, 1>} : memref<10x10x96xf32, #tpu.memory_space<vmem>>, vector<4x4x96xf32>
    %17 = arith.maximumf %15, %16 : vector<4x4x96xf32>
    %c2_28 = arith.constant 2 : index
    %c1_29 = arith.constant 1 : index
    %c0_30 = arith.constant 0 : index
    %18 = tpu.strided_load %arg3[%c2_28, %c1_29, %c0_30] {strides = array<i32: 2, 2, 1>} : memref<10x10x96xf32, #tpu.memory_space<vmem>>, vector<4x4x96xf32>
    %19 = arith.maximumf %17, %18 : vector<4x4x96xf32>
    %c2_31 = arith.constant 2 : index
    %c2_32 = arith.constant 2 : index
    %c0_33 = arith.constant 0 : index
    %20 = tpu.strided_load %arg3[%c2_31, %c2_32, %c0_33] {strides = array<i32: 2, 2, 1>} : memref<10x10x96xf32, #tpu.memory_space<vmem>>, vector<4x4x96xf32>
    %21 = arith.maximumf %19, %20 : vector<4x4x96xf32>
    %c0_34 = arith.constant 0 : index
    %c0_35 = arith.constant 0 : index
    %c0_36 = arith.constant 0 : index
    %c0_37 = arith.constant 0 : index
    %22 = vector.load %arg2[%c0_34, %c0_35, %c0_36, %c0_37] : memref<1x4x4x96xf32, #tpu.memory_space<vmem>>, vector<1x4x4x96xf32>
    %23 = vector.shape_cast %22 : vector<1x4x4x96xf32> to vector<4x4x96xf32>
    %24 = vector.shape_cast %21 : vector<4x4x96xf32> to vector<1x4x4x96xf32>
    tpu.vector_store %arg2[%c0_34, %c0_35, %c0_36, %c0_37], %24 {strides = array<i32>} : memref<1x4x4x96xf32, #tpu.memory_space<vmem>>, vector<1x4x4x96xf32>,
    return
  }
  func.func @transform_0(%arg0: i32) -> (i32, i32, i32, i32) {
    %c0_i32 = arith.constant 0 : i32
    %c0_i32_0 = arith.constant 0 : i32
    %c0_i32_1 = arith.constant 0 : i32
    %c0_i32_2 = arith.constant 0 : i32
    return %arg0, %c0_i32, %c0_i32_0, %c0_i32_1 : i32, i32, i32, i32
  }
  func.func @transform_1(%arg0: i32) -> (i32, i32, i32, i32) {
    %c0_i32 = arith.constant 0 : i32
    %c0_i32_0 = arith.constant 0 : i32
    %c0_i32_1 = arith.constant 0 : i32
    %c0_i32_2 = arith.constant 0 : i32
    return %arg0, %c0_i32, %c0_i32_0, %c0_i32_1 : i32, i32, i32, i32
  }
}

module attributes {stable_mosaic.version = 11 : i64} {
  func.func @kernel(%arg0: i32, %arg1: memref<1x16x96xf32, #tpu.memory_space<vmem>>, %arg2: memref<96x4xbf16, #tpu.memory_space<vmem>>, %arg3: memref<1x4xf32, #tpu.memory_space<vmem>>, %arg4: memref<1x4xf32, #tpu.memory_space<vmem>>, %arg5: memref<9x4x16xbf16, #tpu.memory_space<vmem>>, %arg6: memref<1x16xf32, #tpu.memory_space<vmem>>, %arg7: memref<1x16xf32, #tpu.memory_space<vmem>>, %arg8: memref<2x16x1xf32, #tpu.memory_space<vmem>>, %arg9: memref<96x16xbf16, #tpu.memory_space<vmem>>, %arg10: memref<1x16xf32, #tpu.memory_space<vmem>>, %arg11: memref<1x16xf32, #tpu.memory_space<vmem>>, %arg12: memref<1x16x16xf32, #tpu.memory_space<vmem>>, %arg13: memref<26x4xf32, #tpu.memory_space<vmem>>) attributes {dimension_semantics = [#tpu.dimension_semantics<parallel>], iteration_bounds = array<i64: 2>, scalar_prefetch = 0 : i64, scratch_operands = 1 : i64, tpu.core_type = #tpu.core_type<tc>, window_params = [{transform_indices = @transform_0, window_bounds = array<i64: 1, 16, 96>}, {pipeline_mode = #tpu.pipeline_mode<synchronous>, transform_indices = @transform_1, window_bounds = array<i64: 96, 4>}, {pipeline_mode = #tpu.pipeline_mode<synchronous>, transform_indices = @transform_2, window_bounds = array<i64: 1, 4>}, {pipeline_mode = #tpu.pipeline_mode<synchronous>, transform_indices = @transform_3, window_bounds = array<i64: 1, 4>}, {pipeline_mode = #tpu.pipeline_mode<synchronous>, transform_indices = @transform_4, window_bounds = array<i64: 9, 4, 16>}, {pipeline_mode = #tpu.pipeline_mode<synchronous>, transform_indices = @transform_5, window_bounds = array<i64: 1, 16>}, {pipeline_mode = #tpu.pipeline_mode<synchronous>, transform_indices = @transform_6, window_bounds = array<i64: 1, 16>}, {pipeline_mode = #tpu.pipeline_mode<synchronous>, transform_indices = @transform_7, window_bounds = array<i64: 2, 16, 1>}, {pipeline_mode = #tpu.pipeline_mode<synchronous>, transform_indices = @transform_8, window_bounds = array<i64: 96, 16>}, {pipeline_mode = #tpu.pipeline_mode<synchronous>, transform_indices = @transform_9, window_bounds = array<i64: 1, 16>}, {pipeline_mode = #tpu.pipeline_mode<synchronous>, transform_indices = @transform_10, window_bounds = array<i64: 1, 16>}, {transform_indices = @transform_11, window_bounds = array<i64: 1, 16, 16>}]} {
    %c0 = arith.constant 0 : index
    %c0_0 = arith.constant 0 : index
    %c0_1 = arith.constant 0 : index
    %0 = vector.load %arg1[%c0, %c0_0, %c0_1] : memref<1x16x96xf32, #tpu.memory_space<vmem>>, vector<1x16x96xf32>
    %1 = vector.shape_cast %0 : vector<1x16x96xf32> to vector<16x96xf32>
    %2 = arith.truncf %1 : vector<16x96xf32> to vector<16x96xbf16>
    %c0_2 = arith.constant 0 : index
    %c0_3 = arith.constant 0 : index
    %3 = vector.load %arg2[%c0_2, %c0_3] : memref<96x4xbf16, #tpu.memory_space<vmem>>, vector<96x4xbf16>
    %cst = arith.constant dense<0.000000e+00> : vector<16x4xf32>
    %4 = tpu.matmul %2, %3, %cst {dimension_numbers = #tpu.dot_dimension_numbers<[1], [0], [0], [1], [0, 0, 1, 1], [], []>} : vector<16x96xbf16>, vector<96x4xbf16>, vector<16x4xf32> -> vector<16x4xf32>
    %c0_4 = arith.constant 0 : index
    %c0_5 = arith.constant 0 : index
    %5 = vector.load %arg3[%c0_4, %c0_5] : memref<1x4xf32, #tpu.memory_space<vmem>>, vector<1x4xf32>
    %6 = vector.broadcast %5 : vector<1x4xf32> to vector<16x4xf32>
    %7 = arith.mulf %4, %6 : vector<16x4xf32>
    %c0_6 = arith.constant 0 : index
    %c0_7 = arith.constant 0 : index
    %8 = vector.load %arg4[%c0_6, %c0_7] : memref<1x4xf32, #tpu.memory_space<vmem>>, vector<1x4xf32>
    %9 = vector.broadcast %8 : vector<1x4xf32> to vector<16x4xf32>
    %10 = arith.addf %7, %9 : vector<16x4xf32>
    %cst_8 = arith.constant 0.000000e+00 : f32
    %11 = vector.broadcast %cst_8 : f32 to vector<16x4xf32>
    %12 = arith.maximumf %10, %11 : vector<16x4xf32>
    %c0_9 = arith.constant 0 : index
    %c0_10 = arith.constant 0 : index
    %13 = vector.load %arg9[%c0_9, %c0_10] : memref<96x16xbf16, #tpu.memory_space<vmem>>, vector<96x16xbf16>
    %cst_11 = arith.constant dense<0.000000e+00> : vector<16x16xf32>
    %14 = tpu.matmul %2, %13, %cst_11 {dimension_numbers = #tpu.dot_dimension_numbers<[1], [0], [0], [1], [0, 0, 1, 1], [], []>} : vector<16x96xbf16>, vector<96x16xbf16>, vector<16x16xf32> -> vector<16x16xf32>
    %c0_12 = arith.constant 0 : index
    %c0_13 = arith.constant 0 : index
    %15 = vector.load %arg10[%c0_12, %c0_13] : memref<1x16xf32, #tpu.memory_space<vmem>>, vector<1x16xf32>
    %16 = vector.broadcast %15 : vector<1x16xf32> to vector<16x16xf32>
    %17 = arith.mulf %14, %16 : vector<16x16xf32>
    %c0_14 = arith.constant 0 : index
    %c0_15 = arith.constant 0 : index
    %18 = vector.load %arg11[%c0_14, %c0_15] : memref<1x16xf32, #tpu.memory_space<vmem>>, vector<1x16xf32>
    %19 = vector.broadcast %18 : vector<1x16xf32> to vector<16x16xf32>
    %20 = arith.addf %17, %19 : vector<16x16xf32>
    %cst_16 = arith.constant 0.000000e+00 : f32
    %21 = vector.broadcast %cst_16 : f32 to vector<16x16xf32>
    %22 = arith.maximumf %20, %21 : vector<16x16xf32>
    %cst_17 = arith.constant 0.000000e+00 : f32
    %23 = vector.broadcast %cst_17 : f32 to vector<5x4xf32>
    %c0_18 = arith.constant 0 : index
    %c0_19 = arith.constant 0 : index
    %24 = vector.load %arg13[%c0_18, %c0_19] : memref<26x4xf32, #tpu.memory_space<vmem>>, vector<5x4xf32>
    tpu.vector_store %arg13[%c0_18, %c0_19], %23 {strides = array<i32>} : memref<26x4xf32, #tpu.memory_space<vmem>>, vector<5x4xf32>,
    %c21 = arith.constant 21 : index
    %c0_20 = arith.constant 0 : index
    %25 = vector.load %arg13[%c21, %c0_20] : memref<26x4xf32, #tpu.memory_space<vmem>>, vector<5x4xf32>
    tpu.vector_store %arg13[%c21, %c0_20], %23 {strides = array<i32>} : memref<26x4xf32, #tpu.memory_space<vmem>>, vector<5x4xf32>,
    %c5 = arith.constant 5 : index
    %c0_21 = arith.constant 0 : index
    %26 = vector.load %arg13[%c5, %c0_21] : memref<26x4xf32, #tpu.memory_space<vmem>>, vector<16x4xf32>
    tpu.vector_store %arg13[%c5, %c0_21], %12 {strides = array<i32>} : memref<26x4xf32, #tpu.memory_space<vmem>>, vector<16x4xf32>,
    %27 = arith.truncf %12 : vector<16x4xf32> to vector<16x4xbf16>
    %c4 = arith.constant 4 : index
    %c0_22 = arith.constant 0 : index
    %c0_23 = arith.constant 0 : index
    %28 = vector.load %arg5[%c4, %c0_22, %c0_23] : memref<9x4x16xbf16, #tpu.memory_space<vmem>>, vector<1x4x16xbf16>
    %29 = vector.shape_cast %28 : vector<1x4x16xbf16> to vector<4x16xbf16>
    %cst_24 = arith.constant dense<0.000000e+00> : vector<16x16xf32>
    %30 = tpu.matmul %27, %29, %cst_24 {dimension_numbers = #tpu.dot_dimension_numbers<[1], [0], [0], [1], [0, 0, 1, 1], [], []>} : vector<16x4xbf16>, vector<4x16xbf16>, vector<16x16xf32> -> vector<16x16xf32>
    %c0_25 = arith.constant 0 : index
    %c0_26 = arith.constant 0 : index
    %31 = vector.load %arg13[%c0_25, %c0_26] : memref<26x4xf32, #tpu.memory_space<vmem>>, vector<16x4xf32>
    %c0_27 = arith.constant 0 : index
    %c0_28 = arith.constant 0 : index
    %c0_29 = arith.constant 0 : index
    %32 = vector.load %arg8[%c0_27, %c0_28, %c0_29] : memref<2x16x1xf32, #tpu.memory_space<vmem>>, vector<1x16x1xf32>
    %33 = vector.shape_cast %32 : vector<1x16x1xf32> to vector<16x1xf32>
    %34 = vector.broadcast %33 : vector<16x1xf32> to vector<16x4xf32>
    %35 = arith.mulf %31, %34 : vector<16x4xf32>
    %36 = arith.truncf %35 : vector<16x4xf32> to vector<16x4xbf16>
    %c0_30 = arith.constant 0 : index
    %c0_31 = arith.constant 0 : index
    %c0_32 = arith.constant 0 : index
    %37 = vector.load %arg5[%c0_30, %c0_31, %c0_32] : memref<9x4x16xbf16, #tpu.memory_space<vmem>>, vector<1x4x16xbf16>
    %38 = vector.shape_cast %37 : vector<1x4x16xbf16> to vector<4x16xbf16>
    %cst_33 = arith.constant dense<0.000000e+00> : vector<16x16xf32>
    %39 = tpu.matmul %36, %38, %cst_33 {dimension_numbers = #tpu.dot_dimension_numbers<[1], [0], [0], [1], [0, 0, 1, 1], [], []>} : vector<16x4xbf16>, vector<4x16xbf16>, vector<16x16xf32> -> vector<16x16xf32>
    %40 = arith.addf %30, %39 : vector<16x16xf32>
    %c1 = arith.constant 1 : index
    %c0_34 = arith.constant 0 : index
    %41 = vector.load %arg13[%c1, %c0_34] : memref<26x4xf32, #tpu.memory_space<vmem>>, vector<16x4xf32>
    %42 = arith.truncf %41 : vector<16x4xf32> to vector<16x4xbf16>
    %c1_35 = arith.constant 1 : index
    %c0_36 = arith.constant 0 : index
    %c0_37 = arith.constant 0 : index
    %43 = vector.load %arg5[%c1_35, %c0_36, %c0_37] : memref<9x4x16xbf16, #tpu.memory_space<vmem>>, vector<1x4x16xbf16>
    %44 = vector.shape_cast %43 : vector<1x4x16xbf16> to vector<4x16xbf16>
    %cst_38 = arith.constant dense<0.000000e+00> : vector<16x16xf32>
    %45 = tpu.matmul %42, %44, %cst_38 {dimension_numbers = #tpu.dot_dimension_numbers<[1], [0], [0], [1], [0, 0, 1, 1], [], []>} : vector<16x4xbf16>, vector<4x16xbf16>, vector<16x16xf32> -> vector<16x16xf32>
    %46 = arith.addf %40, %45 : vector<16x16xf32>
    %c2 = arith.constant 2 : index
    %c0_39 = arith.constant 0 : index
    %47 = vector.load %arg13[%c2, %c0_39] : memref<26x4xf32, #tpu.memory_space<vmem>>, vector<16x4xf32>
    %c1_40 = arith.constant 1 : index
    %c0_41 = arith.constant 0 : index
    %c0_42 = arith.constant 0 : index
    %48 = vector.load %arg8[%c1_40, %c0_41, %c0_42] : memref<2x16x1xf32, #tpu.memory_space<vmem>>, vector<1x16x1xf32>
    %49 = vector.shape_cast %48 : vector<1x16x1xf32> to vector<16x1xf32>
    %50 = vector.broadcast %49 : vector<16x1xf32> to vector<16x4xf32>
    %51 = arith.mulf %47, %50 : vector<16x4xf32>
    %52 = arith.truncf %51 : vector<16x4xf32> to vector<16x4xbf16>
    %c2_43 = arith.constant 2 : index
    %c0_44 = arith.constant 0 : index
    %c0_45 = arith.constant 0 : index
    %53 = vector.load %arg5[%c2_43, %c0_44, %c0_45] : memref<9x4x16xbf16, #tpu.memory_space<vmem>>, vector<1x4x16xbf16>
    %54 = vector.shape_cast %53 : vector<1x4x16xbf16> to vector<4x16xbf16>
    %cst_46 = arith.constant dense<0.000000e+00> : vector<16x16xf32>
    %55 = tpu.matmul %52, %54, %cst_46 {dimension_numbers = #tpu.dot_dimension_numbers<[1], [0], [0], [1], [0, 0, 1, 1], [], []>} : vector<16x4xbf16>, vector<4x16xbf16>, vector<16x16xf32> -> vector<16x16xf32>
    %56 = arith.addf %46, %55 : vector<16x16xf32>
    %c4_47 = arith.constant 4 : index
    %c0_48 = arith.constant 0 : index
    %57 = vector.load %arg13[%c4_47, %c0_48] : memref<26x4xf32, #tpu.memory_space<vmem>>, vector<16x4xf32>
    %c0_49 = arith.constant 0 : index
    %c0_50 = arith.constant 0 : index
    %c0_51 = arith.constant 0 : index
    %58 = vector.load %arg8[%c0_49, %c0_50, %c0_51] : memref<2x16x1xf32, #tpu.memory_space<vmem>>, vector<1x16x1xf32>
    %59 = vector.shape_cast %58 : vector<1x16x1xf32> to vector<16x1xf32>
    %60 = vector.broadcast %59 : vector<16x1xf32> to vector<16x4xf32>
    %61 = arith.mulf %57, %60 : vector<16x4xf32>
    %62 = arith.truncf %61 : vector<16x4xf32> to vector<16x4xbf16>
    %c3 = arith.constant 3 : index
    %c0_52 = arith.constant 0 : index
    %c0_53 = arith.constant 0 : index
    %63 = vector.load %arg5[%c3, %c0_52, %c0_53] : memref<9x4x16xbf16, #tpu.memory_space<vmem>>, vector<1x4x16xbf16>
    %64 = vector.shape_cast %63 : vector<1x4x16xbf16> to vector<4x16xbf16>
    %cst_54 = arith.constant dense<0.000000e+00> : vector<16x16xf32>
    %65 = tpu.matmul %62, %64, %cst_54 {dimension_numbers = #tpu.dot_dimension_numbers<[1], [0], [0], [1], [0, 0, 1, 1], [], []>} : vector<16x4xbf16>, vector<4x16xbf16>, vector<16x16xf32> -> vector<16x16xf32>
    %66 = arith.addf %56, %65 : vector<16x16xf32>
    %c6 = arith.constant 6 : index
    %c0_55 = arith.constant 0 : index
    %67 = vector.load %arg13[%c6, %c0_55] : memref<26x4xf32, #tpu.memory_space<vmem>>, vector<16x4xf32>
    %c1_56 = arith.constant 1 : index
    %c0_57 = arith.constant 0 : index
    %c0_58 = arith.constant 0 : index
    %68 = vector.load %arg8[%c1_56, %c0_57, %c0_58] : memref<2x16x1xf32, #tpu.memory_space<vmem>>, vector<1x16x1xf32>
    %69 = vector.shape_cast %68 : vector<1x16x1xf32> to vector<16x1xf32>
    %70 = vector.broadcast %69 : vector<16x1xf32> to vector<16x4xf32>
    %71 = arith.mulf %67, %70 : vector<16x4xf32>
    %72 = arith.truncf %71 : vector<16x4xf32> to vector<16x4xbf16>
    %c5_59 = arith.constant 5 : index
    %c0_60 = arith.constant 0 : index
    %c0_61 = arith.constant 0 : index
    %73 = vector.load %arg5[%c5_59, %c0_60, %c0_61] : memref<9x4x16xbf16, #tpu.memory_space<vmem>>, vector<1x4x16xbf16>
    %74 = vector.shape_cast %73 : vector<1x4x16xbf16> to vector<4x16xbf16>
    %cst_62 = arith.constant dense<0.000000e+00> : vector<16x16xf32>
    %75 = tpu.matmul %72, %74, %cst_62 {dimension_numbers = #tpu.dot_dimension_numbers<[1], [0], [0], [1], [0, 0, 1, 1], [], []>} : vector<16x4xbf16>, vector<4x16xbf16>, vector<16x16xf32> -> vector<16x16xf32>
    %76 = arith.addf %66, %75 : vector<16x16xf32>
    %c8 = arith.constant 8 : index
    %c0_63 = arith.constant 0 : index
    %77 = vector.load %arg13[%c8, %c0_63] : memref<26x4xf32, #tpu.memory_space<vmem>>, vector<16x4xf32>
    %c0_64 = arith.constant 0 : index
    %c0_65 = arith.constant 0 : index
    %c0_66 = arith.constant 0 : index
    %78 = vector.load %arg8[%c0_64, %c0_65, %c0_66] : memref<2x16x1xf32, #tpu.memory_space<vmem>>, vector<1x16x1xf32>
    %79 = vector.shape_cast %78 : vector<1x16x1xf32> to vector<16x1xf32>
    %80 = vector.broadcast %79 : vector<16x1xf32> to vector<16x4xf32>
    %81 = arith.mulf %77, %80 : vector<16x4xf32>
    %82 = arith.truncf %81 : vector<16x4xf32> to vector<16x4xbf16>
    %c6_67 = arith.constant 6 : index
    %c0_68 = arith.constant 0 : index
    %c0_69 = arith.constant 0 : index
    %83 = vector.load %arg5[%c6_67, %c0_68, %c0_69] : memref<9x4x16xbf16, #tpu.memory_space<vmem>>, vector<1x4x16xbf16>
    %84 = vector.shape_cast %83 : vector<1x4x16xbf16> to vector<4x16xbf16>
    %cst_70 = arith.constant dense<0.000000e+00> : vector<16x16xf32>
    %85 = tpu.matmul %82, %84, %cst_70 {dimension_numbers = #tpu.dot_dimension_numbers<[1], [0], [0], [1], [0, 0, 1, 1], [], []>} : vector<16x4xbf16>, vector<4x16xbf16>, vector<16x16xf32> -> vector<16x16xf32>
    %86 = arith.addf %76, %85 : vector<16x16xf32>
    %c9 = arith.constant 9 : index
    %c0_71 = arith.constant 0 : index
    %87 = vector.load %arg13[%c9, %c0_71] : memref<26x4xf32, #tpu.memory_space<vmem>>, vector<16x4xf32>
    %88 = arith.truncf %87 : vector<16x4xf32> to vector<16x4xbf16>
    %c7 = arith.constant 7 : index
    %c0_72 = arith.constant 0 : index
    %c0_73 = arith.constant 0 : index
    %89 = vector.load %arg5[%c7, %c0_72, %c0_73] : memref<9x4x16xbf16, #tpu.memory_space<vmem>>, vector<1x4x16xbf16>
    %90 = vector.shape_cast %89 : vector<1x4x16xbf16> to vector<4x16xbf16>
    %cst_74 = arith.constant dense<0.000000e+00> : vector<16x16xf32>
    %91 = tpu.matmul %88, %90, %cst_74 {dimension_numbers = #tpu.dot_dimension_numbers<[1], [0], [0], [1], [0, 0, 1, 1], [], []>} : vector<16x4xbf16>, vector<4x16xbf16>, vector<16x16xf32> -> vector<16x16xf32>
    %92 = arith.addf %86, %91 : vector<16x16xf32>
    %c10 = arith.constant 10 : index
    %c0_75 = arith.constant 0 : index
    %93 = vector.load %arg13[%c10, %c0_75] : memref<26x4xf32, #tpu.memory_space<vmem>>, vector<16x4xf32>
    %c1_76 = arith.constant 1 : index
    %c0_77 = arith.constant 0 : index
    %c0_78 = arith.constant 0 : index
    %94 = vector.load %arg8[%c1_76, %c0_77, %c0_78] : memref<2x16x1xf32, #tpu.memory_space<vmem>>, vector<1x16x1xf32>
    %95 = vector.shape_cast %94 : vector<1x16x1xf32> to vector<16x1xf32>
    %96 = vector.broadcast %95 : vector<16x1xf32> to vector<16x4xf32>
    %97 = arith.mulf %93, %96 : vector<16x4xf32>
    %98 = arith.truncf %97 : vector<16x4xf32> to vector<16x4xbf16>
    %c8_79 = arith.constant 8 : index
    %c0_80 = arith.constant 0 : index
    %c0_81 = arith.constant 0 : index
    %99 = vector.load %arg5[%c8_79, %c0_80, %c0_81] : memref<9x4x16xbf16, #tpu.memory_space<vmem>>, vector<1x4x16xbf16>
    %100 = vector.shape_cast %99 : vector<1x4x16xbf16> to vector<4x16xbf16>
    %cst_82 = arith.constant dense<0.000000e+00> : vector<16x16xf32>
    %101 = tpu.matmul %98, %100, %cst_82 {dimension_numbers = #tpu.dot_dimension_numbers<[1], [0], [0], [1], [0, 0, 1, 1], [], []>} : vector<16x4xbf16>, vector<4x16xbf16>, vector<16x16xf32> -> vector<16x16xf32>
    %102 = arith.addf %92, %101 : vector<16x16xf32>
    %c0_83 = arith.constant 0 : index
    %c0_84 = arith.constant 0 : index
    %103 = vector.load %arg6[%c0_83, %c0_84] : memref<1x16xf32, #tpu.memory_space<vmem>>, vector<1x16xf32>
    %104 = vector.broadcast %103 : vector<1x16xf32> to vector<16x16xf32>
    %105 = arith.mulf %102, %104 : vector<16x16xf32>
    %c0_85 = arith.constant 0 : index
    %c0_86 = arith.constant 0 : index
    %106 = vector.load %arg7[%c0_85, %c0_86] : memref<1x16xf32, #tpu.memory_space<vmem>>, vector<1x16xf32>
    %107 = vector.broadcast %106 : vector<1x16xf32> to vector<16x16xf32>
    %108 = arith.addf %105, %107 : vector<16x16xf32>
    %cst_87 = arith.constant 0.000000e+00 : f32
    %109 = vector.broadcast %cst_87 : f32 to vector<16x16xf32>
    %110 = arith.maximumf %108, %109 : vector<16x16xf32>
    %111 = arith.addf %110, %22 : vector<16x16xf32>
    %c0_88 = arith.constant 0 : index
    %c0_89 = arith.constant 0 : index
    %c0_90 = arith.constant 0 : index
    %112 = vector.load %arg12[%c0_88, %c0_89, %c0_90] : memref<1x16x16xf32, #tpu.memory_space<vmem>>, vector<1x16x16xf32>
    %113 = vector.shape_cast %112 : vector<1x16x16xf32> to vector<16x16xf32>
    %114 = vector.shape_cast %111 : vector<16x16xf32> to vector<1x16x16xf32>
    tpu.vector_store %arg12[%c0_88, %c0_89, %c0_90], %114 {strides = array<i32>} : memref<1x16x16xf32, #tpu.memory_space<vmem>>, vector<1x16x16xf32>,
    return
  }
  func.func @transform_0(%arg0: i32) -> (i32, i32, i32) {
    %c0_i32 = arith.constant 0 : i32
    %c0_i32_0 = arith.constant 0 : i32
    %c0_i32_1 = arith.constant 0 : i32
    return %arg0, %c0_i32, %c0_i32_0 : i32, i32, i32
  }
  func.func @transform_1(%arg0: i32) -> (i32, i32) {
    %c0_i32 = arith.constant 0 : i32
    %c0_i32_0 = arith.constant 0 : i32
    %c0_i32_1 = arith.constant 0 : i32
    return %c0_i32, %c0_i32_0 : i32, i32
  }
  func.func @transform_2(%arg0: i32) -> (i32, i32) {
    %c0_i32 = arith.constant 0 : i32
    %c0_i32_0 = arith.constant 0 : i32
    %c0_i32_1 = arith.constant 0 : i32
    return %c0_i32, %c0_i32_0 : i32, i32
  }
  func.func @transform_3(%arg0: i32) -> (i32, i32) {
    %c0_i32 = arith.constant 0 : i32
    %c0_i32_0 = arith.constant 0 : i32
    %c0_i32_1 = arith.constant 0 : i32
    return %c0_i32, %c0_i32_0 : i32, i32
  }
  func.func @transform_4(%arg0: i32) -> (i32, i32, i32) {
    %c0_i32 = arith.constant 0 : i32
    %c0_i32_0 = arith.constant 0 : i32
    %c0_i32_1 = arith.constant 0 : i32
    %c0_i32_2 = arith.constant 0 : i32
    return %c0_i32, %c0_i32_0, %c0_i32_1 : i32, i32, i32
  }
  func.func @transform_5(%arg0: i32) -> (i32, i32) {
    %c0_i32 = arith.constant 0 : i32
    %c0_i32_0 = arith.constant 0 : i32
    %c0_i32_1 = arith.constant 0 : i32
    return %c0_i32, %c0_i32_0 : i32, i32
  }
  func.func @transform_6(%arg0: i32) -> (i32, i32) {
    %c0_i32 = arith.constant 0 : i32
    %c0_i32_0 = arith.constant 0 : i32
    %c0_i32_1 = arith.constant 0 : i32
    return %c0_i32, %c0_i32_0 : i32, i32
  }
  func.func @transform_7(%arg0: i32) -> (i32, i32, i32) {
    %c0_i32 = arith.constant 0 : i32
    %c0_i32_0 = arith.constant 0 : i32
    %c0_i32_1 = arith.constant 0 : i32
    %c0_i32_2 = arith.constant 0 : i32
    return %c0_i32, %c0_i32_0, %c0_i32_1 : i32, i32, i32
  }
  func.func @transform_8(%arg0: i32) -> (i32, i32) {
    %c0_i32 = arith.constant 0 : i32
    %c0_i32_0 = arith.constant 0 : i32
    %c0_i32_1 = arith.constant 0 : i32
    return %c0_i32, %c0_i32_0 : i32, i32
  }
  func.func @transform_9(%arg0: i32) -> (i32, i32) {
    %c0_i32 = arith.constant 0 : i32
    %c0_i32_0 = arith.constant 0 : i32
    %c0_i32_1 = arith.constant 0 : i32
    return %c0_i32, %c0_i32_0 : i32, i32
  }
  func.func @transform_10(%arg0: i32) -> (i32, i32) {
    %c0_i32 = arith.constant 0 : i32
    %c0_i32_0 = arith.constant 0 : i32
    %c0_i32_1 = arith.constant 0 : i32
    return %c0_i32, %c0_i32_0 : i32, i32
  }
  func.func @transform_11(%arg0: i32) -> (i32, i32, i32) {
    %c0_i32 = arith.constant 0 : i32
    %c0_i32_0 = arith.constant 0 : i32
    %c0_i32_1 = arith.constant 0 : i32
    return %arg0, %c0_i32, %c0_i32_0 : i32, i32, i32
  }
}

module attributes {stable_mosaic.version = 11 : i64} {
  func.func @kernel(%arg0: i32, %arg1: memref<1x16x16xf32, #tpu.memory_space<vmem>>, %arg2: memref<16x4xbf16, #tpu.memory_space<vmem>>, %arg3: memref<1x4xf32, #tpu.memory_space<vmem>>, %arg4: memref<1x4xf32, #tpu.memory_space<vmem>>, %arg5: memref<9x4x16xbf16, #tpu.memory_space<vmem>>, %arg6: memref<1x16xf32, #tpu.memory_space<vmem>>, %arg7: memref<1x16xf32, #tpu.memory_space<vmem>>, %arg8: memref<2x16x1xf32, #tpu.memory_space<vmem>>, %arg9: memref<1x16x16xf32, #tpu.memory_space<vmem>>, %arg10: memref<26x4xf32, #tpu.memory_space<vmem>>) attributes {dimension_semantics = [#tpu.dimension_semantics<parallel>], iteration_bounds = array<i64: 2>, scalar_prefetch = 0 : i64, scratch_operands = 1 : i64, tpu.core_type = #tpu.core_type<tc>, window_params = [{transform_indices = @transform_0, window_bounds = array<i64: 1, 16, 16>}, {pipeline_mode = #tpu.pipeline_mode<synchronous>, transform_indices = @transform_1, window_bounds = array<i64: 16, 4>}, {pipeline_mode = #tpu.pipeline_mode<synchronous>, transform_indices = @transform_2, window_bounds = array<i64: 1, 4>}, {pipeline_mode = #tpu.pipeline_mode<synchronous>, transform_indices = @transform_3, window_bounds = array<i64: 1, 4>}, {pipeline_mode = #tpu.pipeline_mode<synchronous>, transform_indices = @transform_4, window_bounds = array<i64: 9, 4, 16>}, {pipeline_mode = #tpu.pipeline_mode<synchronous>, transform_indices = @transform_5, window_bounds = array<i64: 1, 16>}, {pipeline_mode = #tpu.pipeline_mode<synchronous>, transform_indices = @transform_6, window_bounds = array<i64: 1, 16>}, {pipeline_mode = #tpu.pipeline_mode<synchronous>, transform_indices = @transform_7, window_bounds = array<i64: 2, 16, 1>}, {transform_indices = @transform_8, window_bounds = array<i64: 1, 16, 16>}]} {
    %c0 = arith.constant 0 : index
    %c0_0 = arith.constant 0 : index
    %c0_1 = arith.constant 0 : index
    %0 = vector.load %arg1[%c0, %c0_0, %c0_1] : memref<1x16x16xf32, #tpu.memory_space<vmem>>, vector<1x16x16xf32>
    %1 = vector.shape_cast %0 : vector<1x16x16xf32> to vector<16x16xf32>
    %2 = arith.truncf %1 : vector<16x16xf32> to vector<16x16xbf16>
    %c0_2 = arith.constant 0 : index
    %c0_3 = arith.constant 0 : index
    %3 = vector.load %arg2[%c0_2, %c0_3] : memref<16x4xbf16, #tpu.memory_space<vmem>>, vector<16x4xbf16>
    %cst = arith.constant dense<0.000000e+00> : vector<16x4xf32>
    %4 = tpu.matmul %2, %3, %cst {dimension_numbers = #tpu.dot_dimension_numbers<[1], [0], [0], [1], [0, 0, 1, 1], [], []>} : vector<16x16xbf16>, vector<16x4xbf16>, vector<16x4xf32> -> vector<16x4xf32>
    %c0_4 = arith.constant 0 : index
    %c0_5 = arith.constant 0 : index
    %5 = vector.load %arg3[%c0_4, %c0_5] : memref<1x4xf32, #tpu.memory_space<vmem>>, vector<1x4xf32>
    %6 = vector.broadcast %5 : vector<1x4xf32> to vector<16x4xf32>
    %7 = arith.mulf %4, %6 : vector<16x4xf32>
    %c0_6 = arith.constant 0 : index
    %c0_7 = arith.constant 0 : index
    %8 = vector.load %arg4[%c0_6, %c0_7] : memref<1x4xf32, #tpu.memory_space<vmem>>, vector<1x4xf32>
    %9 = vector.broadcast %8 : vector<1x4xf32> to vector<16x4xf32>
    %10 = arith.addf %7, %9 : vector<16x4xf32>
    %cst_8 = arith.constant 0.000000e+00 : f32
    %11 = vector.broadcast %cst_8 : f32 to vector<16x4xf32>
    %12 = arith.maximumf %10, %11 : vector<16x4xf32>
    %cst_9 = arith.constant 0.000000e+00 : f32
    %13 = vector.broadcast %cst_9 : f32 to vector<5x4xf32>
    %c0_10 = arith.constant 0 : index
    %c0_11 = arith.constant 0 : index
    %14 = vector.load %arg10[%c0_10, %c0_11] : memref<26x4xf32, #tpu.memory_space<vmem>>, vector<5x4xf32>
    tpu.vector_store %arg10[%c0_10, %c0_11], %13 {strides = array<i32>} : memref<26x4xf32, #tpu.memory_space<vmem>>, vector<5x4xf32>,
    %c21 = arith.constant 21 : index
    %c0_12 = arith.constant 0 : index
    %15 = vector.load %arg10[%c21, %c0_12] : memref<26x4xf32, #tpu.memory_space<vmem>>, vector<5x4xf32>
    tpu.vector_store %arg10[%c21, %c0_12], %13 {strides = array<i32>} : memref<26x4xf32, #tpu.memory_space<vmem>>, vector<5x4xf32>,
    %c5 = arith.constant 5 : index
    %c0_13 = arith.constant 0 : index
    %16 = vector.load %arg10[%c5, %c0_13] : memref<26x4xf32, #tpu.memory_space<vmem>>, vector<16x4xf32>
    tpu.vector_store %arg10[%c5, %c0_13], %12 {strides = array<i32>} : memref<26x4xf32, #tpu.memory_space<vmem>>, vector<16x4xf32>,
    %17 = arith.truncf %12 : vector<16x4xf32> to vector<16x4xbf16>
    %c4 = arith.constant 4 : index
    %c0_14 = arith.constant 0 : index
    %c0_15 = arith.constant 0 : index
    %18 = vector.load %arg5[%c4, %c0_14, %c0_15] : memref<9x4x16xbf16, #tpu.memory_space<vmem>>, vector<1x4x16xbf16>
    %19 = vector.shape_cast %18 : vector<1x4x16xbf16> to vector<4x16xbf16>
    %cst_16 = arith.constant dense<0.000000e+00> : vector<16x16xf32>
    %20 = tpu.matmul %17, %19, %cst_16 {dimension_numbers = #tpu.dot_dimension_numbers<[1], [0], [0], [1], [0, 0, 1, 1], [], []>} : vector<16x4xbf16>, vector<4x16xbf16>, vector<16x16xf32> -> vector<16x16xf32>
    %c0_17 = arith.constant 0 : index
    %c0_18 = arith.constant 0 : index
    %21 = vector.load %arg10[%c0_17, %c0_18] : memref<26x4xf32, #tpu.memory_space<vmem>>, vector<16x4xf32>
    %c0_19 = arith.constant 0 : index
    %c0_20 = arith.constant 0 : index
    %c0_21 = arith.constant 0 : index
    %22 = vector.load %arg8[%c0_19, %c0_20, %c0_21] : memref<2x16x1xf32, #tpu.memory_space<vmem>>, vector<1x16x1xf32>
    %23 = vector.shape_cast %22 : vector<1x16x1xf32> to vector<16x1xf32>
    %24 = vector.broadcast %23 : vector<16x1xf32> to vector<16x4xf32>
    %25 = arith.mulf %21, %24 : vector<16x4xf32>
    %26 = arith.truncf %25 : vector<16x4xf32> to vector<16x4xbf16>
    %c0_22 = arith.constant 0 : index
    %c0_23 = arith.constant 0 : index
    %c0_24 = arith.constant 0 : index
    %27 = vector.load %arg5[%c0_22, %c0_23, %c0_24] : memref<9x4x16xbf16, #tpu.memory_space<vmem>>, vector<1x4x16xbf16>
    %28 = vector.shape_cast %27 : vector<1x4x16xbf16> to vector<4x16xbf16>
    %cst_25 = arith.constant dense<0.000000e+00> : vector<16x16xf32>
    %29 = tpu.matmul %26, %28, %cst_25 {dimension_numbers = #tpu.dot_dimension_numbers<[1], [0], [0], [1], [0, 0, 1, 1], [], []>} : vector<16x4xbf16>, vector<4x16xbf16>, vector<16x16xf32> -> vector<16x16xf32>
    %30 = arith.addf %20, %29 : vector<16x16xf32>
    %c1 = arith.constant 1 : index
    %c0_26 = arith.constant 0 : index
    %31 = vector.load %arg10[%c1, %c0_26] : memref<26x4xf32, #tpu.memory_space<vmem>>, vector<16x4xf32>
    %32 = arith.truncf %31 : vector<16x4xf32> to vector<16x4xbf16>
    %c1_27 = arith.constant 1 : index
    %c0_28 = arith.constant 0 : index
    %c0_29 = arith.constant 0 : index
    %33 = vector.load %arg5[%c1_27, %c0_28, %c0_29] : memref<9x4x16xbf16, #tpu.memory_space<vmem>>, vector<1x4x16xbf16>
    %34 = vector.shape_cast %33 : vector<1x4x16xbf16> to vector<4x16xbf16>
    %cst_30 = arith.constant dense<0.000000e+00> : vector<16x16xf32>
    %35 = tpu.matmul %32, %34, %cst_30 {dimension_numbers = #tpu.dot_dimension_numbers<[1], [0], [0], [1], [0, 0, 1, 1], [], []>} : vector<16x4xbf16>, vector<4x16xbf16>, vector<16x16xf32> -> vector<16x16xf32>
    %36 = arith.addf %30, %35 : vector<16x16xf32>
    %c2 = arith.constant 2 : index
    %c0_31 = arith.constant 0 : index
    %37 = vector.load %arg10[%c2, %c0_31] : memref<26x4xf32, #tpu.memory_space<vmem>>, vector<16x4xf32>
    %c1_32 = arith.constant 1 : index
    %c0_33 = arith.constant 0 : index
    %c0_34 = arith.constant 0 : index
    %38 = vector.load %arg8[%c1_32, %c0_33, %c0_34] : memref<2x16x1xf32, #tpu.memory_space<vmem>>, vector<1x16x1xf32>
    %39 = vector.shape_cast %38 : vector<1x16x1xf32> to vector<16x1xf32>
    %40 = vector.broadcast %39 : vector<16x1xf32> to vector<16x4xf32>
    %41 = arith.mulf %37, %40 : vector<16x4xf32>
    %42 = arith.truncf %41 : vector<16x4xf32> to vector<16x4xbf16>
    %c2_35 = arith.constant 2 : index
    %c0_36 = arith.constant 0 : index
    %c0_37 = arith.constant 0 : index
    %43 = vector.load %arg5[%c2_35, %c0_36, %c0_37] : memref<9x4x16xbf16, #tpu.memory_space<vmem>>, vector<1x4x16xbf16>
    %44 = vector.shape_cast %43 : vector<1x4x16xbf16> to vector<4x16xbf16>
    %cst_38 = arith.constant dense<0.000000e+00> : vector<16x16xf32>
    %45 = tpu.matmul %42, %44, %cst_38 {dimension_numbers = #tpu.dot_dimension_numbers<[1], [0], [0], [1], [0, 0, 1, 1], [], []>} : vector<16x4xbf16>, vector<4x16xbf16>, vector<16x16xf32> -> vector<16x16xf32>
    %46 = arith.addf %36, %45 : vector<16x16xf32>
    %c4_39 = arith.constant 4 : index
    %c0_40 = arith.constant 0 : index
    %47 = vector.load %arg10[%c4_39, %c0_40] : memref<26x4xf32, #tpu.memory_space<vmem>>, vector<16x4xf32>
    %c0_41 = arith.constant 0 : index
    %c0_42 = arith.constant 0 : index
    %c0_43 = arith.constant 0 : index
    %48 = vector.load %arg8[%c0_41, %c0_42, %c0_43] : memref<2x16x1xf32, #tpu.memory_space<vmem>>, vector<1x16x1xf32>
    %49 = vector.shape_cast %48 : vector<1x16x1xf32> to vector<16x1xf32>
    %50 = vector.broadcast %49 : vector<16x1xf32> to vector<16x4xf32>
    %51 = arith.mulf %47, %50 : vector<16x4xf32>
    %52 = arith.truncf %51 : vector<16x4xf32> to vector<16x4xbf16>
    %c3 = arith.constant 3 : index
    %c0_44 = arith.constant 0 : index
    %c0_45 = arith.constant 0 : index
    %53 = vector.load %arg5[%c3, %c0_44, %c0_45] : memref<9x4x16xbf16, #tpu.memory_space<vmem>>, vector<1x4x16xbf16>
    %54 = vector.shape_cast %53 : vector<1x4x16xbf16> to vector<4x16xbf16>
    %cst_46 = arith.constant dense<0.000000e+00> : vector<16x16xf32>
    %55 = tpu.matmul %52, %54, %cst_46 {dimension_numbers = #tpu.dot_dimension_numbers<[1], [0], [0], [1], [0, 0, 1, 1], [], []>} : vector<16x4xbf16>, vector<4x16xbf16>, vector<16x16xf32> -> vector<16x16xf32>
    %56 = arith.addf %46, %55 : vector<16x16xf32>
    %c6 = arith.constant 6 : index
    %c0_47 = arith.constant 0 : index
    %57 = vector.load %arg10[%c6, %c0_47] : memref<26x4xf32, #tpu.memory_space<vmem>>, vector<16x4xf32>
    %c1_48 = arith.constant 1 : index
    %c0_49 = arith.constant 0 : index
    %c0_50 = arith.constant 0 : index
    %58 = vector.load %arg8[%c1_48, %c0_49, %c0_50] : memref<2x16x1xf32, #tpu.memory_space<vmem>>, vector<1x16x1xf32>
    %59 = vector.shape_cast %58 : vector<1x16x1xf32> to vector<16x1xf32>
    %60 = vector.broadcast %59 : vector<16x1xf32> to vector<16x4xf32>
    %61 = arith.mulf %57, %60 : vector<16x4xf32>
    %62 = arith.truncf %61 : vector<16x4xf32> to vector<16x4xbf16>
    %c5_51 = arith.constant 5 : index
    %c0_52 = arith.constant 0 : index
    %c0_53 = arith.constant 0 : index
    %63 = vector.load %arg5[%c5_51, %c0_52, %c0_53] : memref<9x4x16xbf16, #tpu.memory_space<vmem>>, vector<1x4x16xbf16>
    %64 = vector.shape_cast %63 : vector<1x4x16xbf16> to vector<4x16xbf16>
    %cst_54 = arith.constant dense<0.000000e+00> : vector<16x16xf32>
    %65 = tpu.matmul %62, %64, %cst_54 {dimension_numbers = #tpu.dot_dimension_numbers<[1], [0], [0], [1], [0, 0, 1, 1], [], []>} : vector<16x4xbf16>, vector<4x16xbf16>, vector<16x16xf32> -> vector<16x16xf32>
    %66 = arith.addf %56, %65 : vector<16x16xf32>
    %c8 = arith.constant 8 : index
    %c0_55 = arith.constant 0 : index
    %67 = vector.load %arg10[%c8, %c0_55] : memref<26x4xf32, #tpu.memory_space<vmem>>, vector<16x4xf32>
    %c0_56 = arith.constant 0 : index
    %c0_57 = arith.constant 0 : index
    %c0_58 = arith.constant 0 : index
    %68 = vector.load %arg8[%c0_56, %c0_57, %c0_58] : memref<2x16x1xf32, #tpu.memory_space<vmem>>, vector<1x16x1xf32>
    %69 = vector.shape_cast %68 : vector<1x16x1xf32> to vector<16x1xf32>
    %70 = vector.broadcast %69 : vector<16x1xf32> to vector<16x4xf32>
    %71 = arith.mulf %67, %70 : vector<16x4xf32>
    %72 = arith.truncf %71 : vector<16x4xf32> to vector<16x4xbf16>
    %c6_59 = arith.constant 6 : index
    %c0_60 = arith.constant 0 : index
    %c0_61 = arith.constant 0 : index
    %73 = vector.load %arg5[%c6_59, %c0_60, %c0_61] : memref<9x4x16xbf16, #tpu.memory_space<vmem>>, vector<1x4x16xbf16>
    %74 = vector.shape_cast %73 : vector<1x4x16xbf16> to vector<4x16xbf16>
    %cst_62 = arith.constant dense<0.000000e+00> : vector<16x16xf32>
    %75 = tpu.matmul %72, %74, %cst_62 {dimension_numbers = #tpu.dot_dimension_numbers<[1], [0], [0], [1], [0, 0, 1, 1], [], []>} : vector<16x4xbf16>, vector<4x16xbf16>, vector<16x16xf32> -> vector<16x16xf32>
    %76 = arith.addf %66, %75 : vector<16x16xf32>
    %c9 = arith.constant 9 : index
    %c0_63 = arith.constant 0 : index
    %77 = vector.load %arg10[%c9, %c0_63] : memref<26x4xf32, #tpu.memory_space<vmem>>, vector<16x4xf32>
    %78 = arith.truncf %77 : vector<16x4xf32> to vector<16x4xbf16>
    %c7 = arith.constant 7 : index
    %c0_64 = arith.constant 0 : index
    %c0_65 = arith.constant 0 : index
    %79 = vector.load %arg5[%c7, %c0_64, %c0_65] : memref<9x4x16xbf16, #tpu.memory_space<vmem>>, vector<1x4x16xbf16>
    %80 = vector.shape_cast %79 : vector<1x4x16xbf16> to vector<4x16xbf16>
    %cst_66 = arith.constant dense<0.000000e+00> : vector<16x16xf32>
    %81 = tpu.matmul %78, %80, %cst_66 {dimension_numbers = #tpu.dot_dimension_numbers<[1], [0], [0], [1], [0, 0, 1, 1], [], []>} : vector<16x4xbf16>, vector<4x16xbf16>, vector<16x16xf32> -> vector<16x16xf32>
    %82 = arith.addf %76, %81 : vector<16x16xf32>
    %c10 = arith.constant 10 : index
    %c0_67 = arith.constant 0 : index
    %83 = vector.load %arg10[%c10, %c0_67] : memref<26x4xf32, #tpu.memory_space<vmem>>, vector<16x4xf32>
    %c1_68 = arith.constant 1 : index
    %c0_69 = arith.constant 0 : index
    %c0_70 = arith.constant 0 : index
    %84 = vector.load %arg8[%c1_68, %c0_69, %c0_70] : memref<2x16x1xf32, #tpu.memory_space<vmem>>, vector<1x16x1xf32>
    %85 = vector.shape_cast %84 : vector<1x16x1xf32> to vector<16x1xf32>
    %86 = vector.broadcast %85 : vector<16x1xf32> to vector<16x4xf32>
    %87 = arith.mulf %83, %86 : vector<16x4xf32>
    %88 = arith.truncf %87 : vector<16x4xf32> to vector<16x4xbf16>
    %c8_71 = arith.constant 8 : index
    %c0_72 = arith.constant 0 : index
    %c0_73 = arith.constant 0 : index
    %89 = vector.load %arg5[%c8_71, %c0_72, %c0_73] : memref<9x4x16xbf16, #tpu.memory_space<vmem>>, vector<1x4x16xbf16>
    %90 = vector.shape_cast %89 : vector<1x4x16xbf16> to vector<4x16xbf16>
    %cst_74 = arith.constant dense<0.000000e+00> : vector<16x16xf32>
    %91 = tpu.matmul %88, %90, %cst_74 {dimension_numbers = #tpu.dot_dimension_numbers<[1], [0], [0], [1], [0, 0, 1, 1], [], []>} : vector<16x4xbf16>, vector<4x16xbf16>, vector<16x16xf32> -> vector<16x16xf32>
    %92 = arith.addf %82, %91 : vector<16x16xf32>
    %c0_75 = arith.constant 0 : index
    %c0_76 = arith.constant 0 : index
    %93 = vector.load %arg6[%c0_75, %c0_76] : memref<1x16xf32, #tpu.memory_space<vmem>>, vector<1x16xf32>
    %94 = vector.broadcast %93 : vector<1x16xf32> to vector<16x16xf32>
    %95 = arith.mulf %92, %94 : vector<16x16xf32>
    %c0_77 = arith.constant 0 : index
    %c0_78 = arith.constant 0 : index
    %96 = vector.load %arg7[%c0_77, %c0_78] : memref<1x16xf32, #tpu.memory_space<vmem>>, vector<1x16xf32>
    %97 = vector.broadcast %96 : vector<1x16xf32> to vector<16x16xf32>
    %98 = arith.addf %95, %97 : vector<16x16xf32>
    %cst_79 = arith.constant 0.000000e+00 : f32
    %99 = vector.broadcast %cst_79 : f32 to vector<16x16xf32>
    %100 = arith.maximumf %98, %99 : vector<16x16xf32>
    %101 = arith.addf %100, %1 : vector<16x16xf32>
    %c0_80 = arith.constant 0 : index
    %c0_81 = arith.constant 0 : index
    %c0_82 = arith.constant 0 : index
    %102 = vector.load %arg9[%c0_80, %c0_81, %c0_82] : memref<1x16x16xf32, #tpu.memory_space<vmem>>, vector<1x16x16xf32>
    %103 = vector.shape_cast %102 : vector<1x16x16xf32> to vector<16x16xf32>
    %104 = vector.shape_cast %101 : vector<16x16xf32> to vector<1x16x16xf32>
    tpu.vector_store %arg9[%c0_80, %c0_81, %c0_82], %104 {strides = array<i32>} : memref<1x16x16xf32, #tpu.memory_space<vmem>>, vector<1x16x16xf32>,
    return
  }
  func.func @transform_0(%arg0: i32) -> (i32, i32, i32) {
    %c0_i32 = arith.constant 0 : i32
    %c0_i32_0 = arith.constant 0 : i32
    %c0_i32_1 = arith.constant 0 : i32
    return %arg0, %c0_i32, %c0_i32_0 : i32, i32, i32
  }
  func.func @transform_1(%arg0: i32) -> (i32, i32) {
    %c0_i32 = arith.constant 0 : i32
    %c0_i32_0 = arith.constant 0 : i32
    %c0_i32_1 = arith.constant 0 : i32
    return %c0_i32, %c0_i32_0 : i32, i32
  }
  func.func @transform_2(%arg0: i32) -> (i32, i32) {
    %c0_i32 = arith.constant 0 : i32
    %c0_i32_0 = arith.constant 0 : i32
    %c0_i32_1 = arith.constant 0 : i32
    return %c0_i32, %c0_i32_0 : i32, i32
  }
  func.func @transform_3(%arg0: i32) -> (i32, i32) {
    %c0_i32 = arith.constant 0 : i32
    %c0_i32_0 = arith.constant 0 : i32
    %c0_i32_1 = arith.constant 0 : i32
    return %c0_i32, %c0_i32_0 : i32, i32
  }
  func.func @transform_4(%arg0: i32) -> (i32, i32, i32) {
    %c0_i32 = arith.constant 0 : i32
    %c0_i32_0 = arith.constant 0 : i32
    %c0_i32_1 = arith.constant 0 : i32
    %c0_i32_2 = arith.constant 0 : i32
    return %c0_i32, %c0_i32_0, %c0_i32_1 : i32, i32, i32
  }
  func.func @transform_5(%arg0: i32) -> (i32, i32) {
    %c0_i32 = arith.constant 0 : i32
    %c0_i32_0 = arith.constant 0 : i32
    %c0_i32_1 = arith.constant 0 : i32
    return %c0_i32, %c0_i32_0 : i32, i32
  }
  func.func @transform_6(%arg0: i32) -> (i32, i32) {
    %c0_i32 = arith.constant 0 : i32
    %c0_i32_0 = arith.constant 0 : i32
    %c0_i32_1 = arith.constant 0 : i32
    return %c0_i32, %c0_i32_0 : i32, i32
  }
  func.func @transform_7(%arg0: i32) -> (i32, i32, i32) {
    %c0_i32 = arith.constant 0 : i32
    %c0_i32_0 = arith.constant 0 : i32
    %c0_i32_1 = arith.constant 0 : i32
    %c0_i32_2 = arith.constant 0 : i32
    return %c0_i32, %c0_i32_0, %c0_i32_1 : i32, i32, i32
  }
  func.func @transform_8(%arg0: i32) -> (i32, i32, i32) {
    %c0_i32 = arith.constant 0 : i32
    %c0_i32_0 = arith.constant 0 : i32
    %c0_i32_1 = arith.constant 0 : i32
    return %arg0, %c0_i32, %c0_i32_0 : i32, i32, i32
  }
}

module attributes {stable_mosaic.version = 11 : i64} {
  func.func @kernel(%arg0: i32, %arg1: memref<1x16x16xf32, #tpu.memory_space<vmem>>, %arg2: memref<16x4xbf16, #tpu.memory_space<vmem>>, %arg3: memref<1x4xf32, #tpu.memory_space<vmem>>, %arg4: memref<1x4xf32, #tpu.memory_space<vmem>>, %arg5: memref<9x4x16xbf16, #tpu.memory_space<vmem>>, %arg6: memref<1x16xf32, #tpu.memory_space<vmem>>, %arg7: memref<1x16xf32, #tpu.memory_space<vmem>>, %arg8: memref<2x16x1xf32, #tpu.memory_space<vmem>>, %arg9: memref<16x16xbf16, #tpu.memory_space<vmem>>, %arg10: memref<1x16xf32, #tpu.memory_space<vmem>>, %arg11: memref<1x16xf32, #tpu.memory_space<vmem>>, %arg12: memref<1x16x16xf32, #tpu.memory_space<vmem>>, %arg13: memref<26x4xf32, #tpu.memory_space<vmem>>) attributes {dimension_semantics = [#tpu.dimension_semantics<parallel>], iteration_bounds = array<i64: 2>, scalar_prefetch = 0 : i64, scratch_operands = 1 : i64, tpu.core_type = #tpu.core_type<tc>, window_params = [{transform_indices = @transform_0, window_bounds = array<i64: 1, 16, 16>}, {pipeline_mode = #tpu.pipeline_mode<synchronous>, transform_indices = @transform_1, window_bounds = array<i64: 16, 4>}, {pipeline_mode = #tpu.pipeline_mode<synchronous>, transform_indices = @transform_2, window_bounds = array<i64: 1, 4>}, {pipeline_mode = #tpu.pipeline_mode<synchronous>, transform_indices = @transform_3, window_bounds = array<i64: 1, 4>}, {pipeline_mode = #tpu.pipeline_mode<synchronous>, transform_indices = @transform_4, window_bounds = array<i64: 9, 4, 16>}, {pipeline_mode = #tpu.pipeline_mode<synchronous>, transform_indices = @transform_5, window_bounds = array<i64: 1, 16>}, {pipeline_mode = #tpu.pipeline_mode<synchronous>, transform_indices = @transform_6, window_bounds = array<i64: 1, 16>}, {pipeline_mode = #tpu.pipeline_mode<synchronous>, transform_indices = @transform_7, window_bounds = array<i64: 2, 16, 1>}, {pipeline_mode = #tpu.pipeline_mode<synchronous>, transform_indices = @transform_8, window_bounds = array<i64: 16, 16>}, {pipeline_mode = #tpu.pipeline_mode<synchronous>, transform_indices = @transform_9, window_bounds = array<i64: 1, 16>}, {pipeline_mode = #tpu.pipeline_mode<synchronous>, transform_indices = @transform_10, window_bounds = array<i64: 1, 16>}, {transform_indices = @transform_11, window_bounds = array<i64: 1, 16, 16>}]} {
    %c0 = arith.constant 0 : index
    %c0_0 = arith.constant 0 : index
    %c0_1 = arith.constant 0 : index
    %0 = vector.load %arg1[%c0, %c0_0, %c0_1] : memref<1x16x16xf32, #tpu.memory_space<vmem>>, vector<1x16x16xf32>
    %1 = vector.shape_cast %0 : vector<1x16x16xf32> to vector<16x16xf32>
    %2 = arith.truncf %1 : vector<16x16xf32> to vector<16x16xbf16>
    %c0_2 = arith.constant 0 : index
    %c0_3 = arith.constant 0 : index
    %3 = vector.load %arg2[%c0_2, %c0_3] : memref<16x4xbf16, #tpu.memory_space<vmem>>, vector<16x4xbf16>
    %cst = arith.constant dense<0.000000e+00> : vector<16x4xf32>
    %4 = tpu.matmul %2, %3, %cst {dimension_numbers = #tpu.dot_dimension_numbers<[1], [0], [0], [1], [0, 0, 1, 1], [], []>} : vector<16x16xbf16>, vector<16x4xbf16>, vector<16x4xf32> -> vector<16x4xf32>
    %c0_4 = arith.constant 0 : index
    %c0_5 = arith.constant 0 : index
    %5 = vector.load %arg3[%c0_4, %c0_5] : memref<1x4xf32, #tpu.memory_space<vmem>>, vector<1x4xf32>
    %6 = vector.broadcast %5 : vector<1x4xf32> to vector<16x4xf32>
    %7 = arith.mulf %4, %6 : vector<16x4xf32>
    %c0_6 = arith.constant 0 : index
    %c0_7 = arith.constant 0 : index
    %8 = vector.load %arg4[%c0_6, %c0_7] : memref<1x4xf32, #tpu.memory_space<vmem>>, vector<1x4xf32>
    %9 = vector.broadcast %8 : vector<1x4xf32> to vector<16x4xf32>
    %10 = arith.addf %7, %9 : vector<16x4xf32>
    %cst_8 = arith.constant 0.000000e+00 : f32
    %11 = vector.broadcast %cst_8 : f32 to vector<16x4xf32>
    %12 = arith.maximumf %10, %11 : vector<16x4xf32>
    %c0_9 = arith.constant 0 : index
    %c0_10 = arith.constant 0 : index
    %13 = vector.load %arg9[%c0_9, %c0_10] : memref<16x16xbf16, #tpu.memory_space<vmem>>, vector<16x16xbf16>
    %cst_11 = arith.constant dense<0.000000e+00> : vector<16x16xf32>
    %14 = tpu.matmul %2, %13, %cst_11 {dimension_numbers = #tpu.dot_dimension_numbers<[1], [0], [0], [1], [0, 0, 1, 1], [], []>} : vector<16x16xbf16>, vector<16x16xbf16>, vector<16x16xf32> -> vector<16x16xf32>
    %c0_12 = arith.constant 0 : index
    %c0_13 = arith.constant 0 : index
    %15 = vector.load %arg10[%c0_12, %c0_13] : memref<1x16xf32, #tpu.memory_space<vmem>>, vector<1x16xf32>
    %16 = vector.broadcast %15 : vector<1x16xf32> to vector<16x16xf32>
    %17 = arith.mulf %14, %16 : vector<16x16xf32>
    %c0_14 = arith.constant 0 : index
    %c0_15 = arith.constant 0 : index
    %18 = vector.load %arg11[%c0_14, %c0_15] : memref<1x16xf32, #tpu.memory_space<vmem>>, vector<1x16xf32>
    %19 = vector.broadcast %18 : vector<1x16xf32> to vector<16x16xf32>
    %20 = arith.addf %17, %19 : vector<16x16xf32>
    %cst_16 = arith.constant 0.000000e+00 : f32
    %21 = vector.broadcast %cst_16 : f32 to vector<16x16xf32>
    %22 = arith.maximumf %20, %21 : vector<16x16xf32>
    %cst_17 = arith.constant 0.000000e+00 : f32
    %23 = vector.broadcast %cst_17 : f32 to vector<5x4xf32>
    %c0_18 = arith.constant 0 : index
    %c0_19 = arith.constant 0 : index
    %24 = vector.load %arg13[%c0_18, %c0_19] : memref<26x4xf32, #tpu.memory_space<vmem>>, vector<5x4xf32>
    tpu.vector_store %arg13[%c0_18, %c0_19], %23 {strides = array<i32>} : memref<26x4xf32, #tpu.memory_space<vmem>>, vector<5x4xf32>,
    %c21 = arith.constant 21 : index
    %c0_20 = arith.constant 0 : index
    %25 = vector.load %arg13[%c21, %c0_20] : memref<26x4xf32, #tpu.memory_space<vmem>>, vector<5x4xf32>
    tpu.vector_store %arg13[%c21, %c0_20], %23 {strides = array<i32>} : memref<26x4xf32, #tpu.memory_space<vmem>>, vector<5x4xf32>,
    %c5 = arith.constant 5 : index
    %c0_21 = arith.constant 0 : index
    %26 = vector.load %arg13[%c5, %c0_21] : memref<26x4xf32, #tpu.memory_space<vmem>>, vector<16x4xf32>
    tpu.vector_store %arg13[%c5, %c0_21], %12 {strides = array<i32>} : memref<26x4xf32, #tpu.memory_space<vmem>>, vector<16x4xf32>,
    %27 = arith.truncf %12 : vector<16x4xf32> to vector<16x4xbf16>
    %c4 = arith.constant 4 : index
    %c0_22 = arith.constant 0 : index
    %c0_23 = arith.constant 0 : index
    %28 = vector.load %arg5[%c4, %c0_22, %c0_23] : memref<9x4x16xbf16, #tpu.memory_space<vmem>>, vector<1x4x16xbf16>
    %29 = vector.shape_cast %28 : vector<1x4x16xbf16> to vector<4x16xbf16>
    %cst_24 = arith.constant dense<0.000000e+00> : vector<16x16xf32>
    %30 = tpu.matmul %27, %29, %cst_24 {dimension_numbers = #tpu.dot_dimension_numbers<[1], [0], [0], [1], [0, 0, 1, 1], [], []>} : vector<16x4xbf16>, vector<4x16xbf16>, vector<16x16xf32> -> vector<16x16xf32>
    %c0_25 = arith.constant 0 : index
    %c0_26 = arith.constant 0 : index
    %31 = vector.load %arg13[%c0_25, %c0_26] : memref<26x4xf32, #tpu.memory_space<vmem>>, vector<16x4xf32>
    %c0_27 = arith.constant 0 : index
    %c0_28 = arith.constant 0 : index
    %c0_29 = arith.constant 0 : index
    %32 = vector.load %arg8[%c0_27, %c0_28, %c0_29] : memref<2x16x1xf32, #tpu.memory_space<vmem>>, vector<1x16x1xf32>
    %33 = vector.shape_cast %32 : vector<1x16x1xf32> to vector<16x1xf32>
    %34 = vector.broadcast %33 : vector<16x1xf32> to vector<16x4xf32>
    %35 = arith.mulf %31, %34 : vector<16x4xf32>
    %36 = arith.truncf %35 : vector<16x4xf32> to vector<16x4xbf16>
    %c0_30 = arith.constant 0 : index
    %c0_31 = arith.constant 0 : index
    %c0_32 = arith.constant 0 : index
    %37 = vector.load %arg5[%c0_30, %c0_31, %c0_32] : memref<9x4x16xbf16, #tpu.memory_space<vmem>>, vector<1x4x16xbf16>
    %38 = vector.shape_cast %37 : vector<1x4x16xbf16> to vector<4x16xbf16>
    %cst_33 = arith.constant dense<0.000000e+00> : vector<16x16xf32>
    %39 = tpu.matmul %36, %38, %cst_33 {dimension_numbers = #tpu.dot_dimension_numbers<[1], [0], [0], [1], [0, 0, 1, 1], [], []>} : vector<16x4xbf16>, vector<4x16xbf16>, vector<16x16xf32> -> vector<16x16xf32>
    %40 = arith.addf %30, %39 : vector<16x16xf32>
    %c1 = arith.constant 1 : index
    %c0_34 = arith.constant 0 : index
    %41 = vector.load %arg13[%c1, %c0_34] : memref<26x4xf32, #tpu.memory_space<vmem>>, vector<16x4xf32>
    %42 = arith.truncf %41 : vector<16x4xf32> to vector<16x4xbf16>
    %c1_35 = arith.constant 1 : index
    %c0_36 = arith.constant 0 : index
    %c0_37 = arith.constant 0 : index
    %43 = vector.load %arg5[%c1_35, %c0_36, %c0_37] : memref<9x4x16xbf16, #tpu.memory_space<vmem>>, vector<1x4x16xbf16>
    %44 = vector.shape_cast %43 : vector<1x4x16xbf16> to vector<4x16xbf16>
    %cst_38 = arith.constant dense<0.000000e+00> : vector<16x16xf32>
    %45 = tpu.matmul %42, %44, %cst_38 {dimension_numbers = #tpu.dot_dimension_numbers<[1], [0], [0], [1], [0, 0, 1, 1], [], []>} : vector<16x4xbf16>, vector<4x16xbf16>, vector<16x16xf32> -> vector<16x16xf32>
    %46 = arith.addf %40, %45 : vector<16x16xf32>
    %c2 = arith.constant 2 : index
    %c0_39 = arith.constant 0 : index
    %47 = vector.load %arg13[%c2, %c0_39] : memref<26x4xf32, #tpu.memory_space<vmem>>, vector<16x4xf32>
    %c1_40 = arith.constant 1 : index
    %c0_41 = arith.constant 0 : index
    %c0_42 = arith.constant 0 : index
    %48 = vector.load %arg8[%c1_40, %c0_41, %c0_42] : memref<2x16x1xf32, #tpu.memory_space<vmem>>, vector<1x16x1xf32>
    %49 = vector.shape_cast %48 : vector<1x16x1xf32> to vector<16x1xf32>
    %50 = vector.broadcast %49 : vector<16x1xf32> to vector<16x4xf32>
    %51 = arith.mulf %47, %50 : vector<16x4xf32>
    %52 = arith.truncf %51 : vector<16x4xf32> to vector<16x4xbf16>
    %c2_43 = arith.constant 2 : index
    %c0_44 = arith.constant 0 : index
    %c0_45 = arith.constant 0 : index
    %53 = vector.load %arg5[%c2_43, %c0_44, %c0_45] : memref<9x4x16xbf16, #tpu.memory_space<vmem>>, vector<1x4x16xbf16>
    %54 = vector.shape_cast %53 : vector<1x4x16xbf16> to vector<4x16xbf16>
    %cst_46 = arith.constant dense<0.000000e+00> : vector<16x16xf32>
    %55 = tpu.matmul %52, %54, %cst_46 {dimension_numbers = #tpu.dot_dimension_numbers<[1], [0], [0], [1], [0, 0, 1, 1], [], []>} : vector<16x4xbf16>, vector<4x16xbf16>, vector<16x16xf32> -> vector<16x16xf32>
    %56 = arith.addf %46, %55 : vector<16x16xf32>
    %c4_47 = arith.constant 4 : index
    %c0_48 = arith.constant 0 : index
    %57 = vector.load %arg13[%c4_47, %c0_48] : memref<26x4xf32, #tpu.memory_space<vmem>>, vector<16x4xf32>
    %c0_49 = arith.constant 0 : index
    %c0_50 = arith.constant 0 : index
    %c0_51 = arith.constant 0 : index
    %58 = vector.load %arg8[%c0_49, %c0_50, %c0_51] : memref<2x16x1xf32, #tpu.memory_space<vmem>>, vector<1x16x1xf32>
    %59 = vector.shape_cast %58 : vector<1x16x1xf32> to vector<16x1xf32>
    %60 = vector.broadcast %59 : vector<16x1xf32> to vector<16x4xf32>
    %61 = arith.mulf %57, %60 : vector<16x4xf32>
    %62 = arith.truncf %61 : vector<16x4xf32> to vector<16x4xbf16>
    %c3 = arith.constant 3 : index
    %c0_52 = arith.constant 0 : index
    %c0_53 = arith.constant 0 : index
    %63 = vector.load %arg5[%c3, %c0_52, %c0_53] : memref<9x4x16xbf16, #tpu.memory_space<vmem>>, vector<1x4x16xbf16>
    %64 = vector.shape_cast %63 : vector<1x4x16xbf16> to vector<4x16xbf16>
    %cst_54 = arith.constant dense<0.000000e+00> : vector<16x16xf32>
    %65 = tpu.matmul %62, %64, %cst_54 {dimension_numbers = #tpu.dot_dimension_numbers<[1], [0], [0], [1], [0, 0, 1, 1], [], []>} : vector<16x4xbf16>, vector<4x16xbf16>, vector<16x16xf32> -> vector<16x16xf32>
    %66 = arith.addf %56, %65 : vector<16x16xf32>
    %c6 = arith.constant 6 : index
    %c0_55 = arith.constant 0 : index
    %67 = vector.load %arg13[%c6, %c0_55] : memref<26x4xf32, #tpu.memory_space<vmem>>, vector<16x4xf32>
    %c1_56 = arith.constant 1 : index
    %c0_57 = arith.constant 0 : index
    %c0_58 = arith.constant 0 : index
    %68 = vector.load %arg8[%c1_56, %c0_57, %c0_58] : memref<2x16x1xf32, #tpu.memory_space<vmem>>, vector<1x16x1xf32>
    %69 = vector.shape_cast %68 : vector<1x16x1xf32> to vector<16x1xf32>
    %70 = vector.broadcast %69 : vector<16x1xf32> to vector<16x4xf32>
    %71 = arith.mulf %67, %70 : vector<16x4xf32>
    %72 = arith.truncf %71 : vector<16x4xf32> to vector<16x4xbf16>
    %c5_59 = arith.constant 5 : index
    %c0_60 = arith.constant 0 : index
    %c0_61 = arith.constant 0 : index
    %73 = vector.load %arg5[%c5_59, %c0_60, %c0_61] : memref<9x4x16xbf16, #tpu.memory_space<vmem>>, vector<1x4x16xbf16>
    %74 = vector.shape_cast %73 : vector<1x4x16xbf16> to vector<4x16xbf16>
    %cst_62 = arith.constant dense<0.000000e+00> : vector<16x16xf32>
    %75 = tpu.matmul %72, %74, %cst_62 {dimension_numbers = #tpu.dot_dimension_numbers<[1], [0], [0], [1], [0, 0, 1, 1], [], []>} : vector<16x4xbf16>, vector<4x16xbf16>, vector<16x16xf32> -> vector<16x16xf32>
    %76 = arith.addf %66, %75 : vector<16x16xf32>
    %c8 = arith.constant 8 : index
    %c0_63 = arith.constant 0 : index
    %77 = vector.load %arg13[%c8, %c0_63] : memref<26x4xf32, #tpu.memory_space<vmem>>, vector<16x4xf32>
    %c0_64 = arith.constant 0 : index
    %c0_65 = arith.constant 0 : index
    %c0_66 = arith.constant 0 : index
    %78 = vector.load %arg8[%c0_64, %c0_65, %c0_66] : memref<2x16x1xf32, #tpu.memory_space<vmem>>, vector<1x16x1xf32>
    %79 = vector.shape_cast %78 : vector<1x16x1xf32> to vector<16x1xf32>
    %80 = vector.broadcast %79 : vector<16x1xf32> to vector<16x4xf32>
    %81 = arith.mulf %77, %80 : vector<16x4xf32>
    %82 = arith.truncf %81 : vector<16x4xf32> to vector<16x4xbf16>
    %c6_67 = arith.constant 6 : index
    %c0_68 = arith.constant 0 : index
    %c0_69 = arith.constant 0 : index
    %83 = vector.load %arg5[%c6_67, %c0_68, %c0_69] : memref<9x4x16xbf16, #tpu.memory_space<vmem>>, vector<1x4x16xbf16>
    %84 = vector.shape_cast %83 : vector<1x4x16xbf16> to vector<4x16xbf16>
    %cst_70 = arith.constant dense<0.000000e+00> : vector<16x16xf32>
    %85 = tpu.matmul %82, %84, %cst_70 {dimension_numbers = #tpu.dot_dimension_numbers<[1], [0], [0], [1], [0, 0, 1, 1], [], []>} : vector<16x4xbf16>, vector<4x16xbf16>, vector<16x16xf32> -> vector<16x16xf32>
    %86 = arith.addf %76, %85 : vector<16x16xf32>
    %c9 = arith.constant 9 : index
    %c0_71 = arith.constant 0 : index
    %87 = vector.load %arg13[%c9, %c0_71] : memref<26x4xf32, #tpu.memory_space<vmem>>, vector<16x4xf32>
    %88 = arith.truncf %87 : vector<16x4xf32> to vector<16x4xbf16>
    %c7 = arith.constant 7 : index
    %c0_72 = arith.constant 0 : index
    %c0_73 = arith.constant 0 : index
    %89 = vector.load %arg5[%c7, %c0_72, %c0_73] : memref<9x4x16xbf16, #tpu.memory_space<vmem>>, vector<1x4x16xbf16>
    %90 = vector.shape_cast %89 : vector<1x4x16xbf16> to vector<4x16xbf16>
    %cst_74 = arith.constant dense<0.000000e+00> : vector<16x16xf32>
    %91 = tpu.matmul %88, %90, %cst_74 {dimension_numbers = #tpu.dot_dimension_numbers<[1], [0], [0], [1], [0, 0, 1, 1], [], []>} : vector<16x4xbf16>, vector<4x16xbf16>, vector<16x16xf32> -> vector<16x16xf32>
    %92 = arith.addf %86, %91 : vector<16x16xf32>
    %c10 = arith.constant 10 : index
    %c0_75 = arith.constant 0 : index
    %93 = vector.load %arg13[%c10, %c0_75] : memref<26x4xf32, #tpu.memory_space<vmem>>, vector<16x4xf32>
    %c1_76 = arith.constant 1 : index
    %c0_77 = arith.constant 0 : index
    %c0_78 = arith.constant 0 : index
    %94 = vector.load %arg8[%c1_76, %c0_77, %c0_78] : memref<2x16x1xf32, #tpu.memory_space<vmem>>, vector<1x16x1xf32>
    %95 = vector.shape_cast %94 : vector<1x16x1xf32> to vector<16x1xf32>
    %96 = vector.broadcast %95 : vector<16x1xf32> to vector<16x4xf32>
    %97 = arith.mulf %93, %96 : vector<16x4xf32>
    %98 = arith.truncf %97 : vector<16x4xf32> to vector<16x4xbf16>
    %c8_79 = arith.constant 8 : index
    %c0_80 = arith.constant 0 : index
    %c0_81 = arith.constant 0 : index
    %99 = vector.load %arg5[%c8_79, %c0_80, %c0_81] : memref<9x4x16xbf16, #tpu.memory_space<vmem>>, vector<1x4x16xbf16>
    %100 = vector.shape_cast %99 : vector<1x4x16xbf16> to vector<4x16xbf16>
    %cst_82 = arith.constant dense<0.000000e+00> : vector<16x16xf32>
    %101 = tpu.matmul %98, %100, %cst_82 {dimension_numbers = #tpu.dot_dimension_numbers<[1], [0], [0], [1], [0, 0, 1, 1], [], []>} : vector<16x4xbf16>, vector<4x16xbf16>, vector<16x16xf32> -> vector<16x16xf32>
    %102 = arith.addf %92, %101 : vector<16x16xf32>
    %c0_83 = arith.constant 0 : index
    %c0_84 = arith.constant 0 : index
    %103 = vector.load %arg6[%c0_83, %c0_84] : memref<1x16xf32, #tpu.memory_space<vmem>>, vector<1x16xf32>
    %104 = vector.broadcast %103 : vector<1x16xf32> to vector<16x16xf32>
    %105 = arith.mulf %102, %104 : vector<16x16xf32>
    %c0_85 = arith.constant 0 : index
    %c0_86 = arith.constant 0 : index
    %106 = vector.load %arg7[%c0_85, %c0_86] : memref<1x16xf32, #tpu.memory_space<vmem>>, vector<1x16xf32>
    %107 = vector.broadcast %106 : vector<1x16xf32> to vector<16x16xf32>
    %108 = arith.addf %105, %107 : vector<16x16xf32>
    %cst_87 = arith.constant 0.000000e+00 : f32
    %109 = vector.broadcast %cst_87 : f32 to vector<16x16xf32>
    %110 = arith.maximumf %108, %109 : vector<16x16xf32>
    %111 = arith.addf %110, %22 : vector<16x16xf32>
    %c0_88 = arith.constant 0 : index
    %c0_89 = arith.constant 0 : index
    %c0_90 = arith.constant 0 : index
    %112 = vector.load %arg12[%c0_88, %c0_89, %c0_90] : memref<1x16x16xf32, #tpu.memory_space<vmem>>, vector<1x16x16xf32>
    %113 = vector.shape_cast %112 : vector<1x16x16xf32> to vector<16x16xf32>
    %114 = vector.shape_cast %111 : vector<16x16xf32> to vector<1x16x16xf32>
    tpu.vector_store %arg12[%c0_88, %c0_89, %c0_90], %114 {strides = array<i32>} : memref<1x16x16xf32, #tpu.memory_space<vmem>>, vector<1x16x16xf32>,
    return
  }
  func.func @transform_0(%arg0: i32) -> (i32, i32, i32) {
    %c0_i32 = arith.constant 0 : i32
    %c0_i32_0 = arith.constant 0 : i32
    %c0_i32_1 = arith.constant 0 : i32
    return %arg0, %c0_i32, %c0_i32_0 : i32, i32, i32
  }
  func.func @transform_1(%arg0: i32) -> (i32, i32) {
    %c0_i32 = arith.constant 0 : i32
    %c0_i32_0 = arith.constant 0 : i32
    %c0_i32_1 = arith.constant 0 : i32
    return %c0_i32, %c0_i32_0 : i32, i32
  }
  func.func @transform_2(%arg0: i32) -> (i32, i32) {
    %c0_i32 = arith.constant 0 : i32
    %c0_i32_0 = arith.constant 0 : i32
    %c0_i32_1 = arith.constant 0 : i32
    return %c0_i32, %c0_i32_0 : i32, i32
  }
  func.func @transform_3(%arg0: i32) -> (i32, i32) {
    %c0_i32 = arith.constant 0 : i32
    %c0_i32_0 = arith.constant 0 : i32
    %c0_i32_1 = arith.constant 0 : i32
    return %c0_i32, %c0_i32_0 : i32, i32
  }
  func.func @transform_4(%arg0: i32) -> (i32, i32, i32) {
    %c0_i32 = arith.constant 0 : i32
    %c0_i32_0 = arith.constant 0 : i32
    %c0_i32_1 = arith.constant 0 : i32
    %c0_i32_2 = arith.constant 0 : i32
    return %c0_i32, %c0_i32_0, %c0_i32_1 : i32, i32, i32
  }
  func.func @transform_5(%arg0: i32) -> (i32, i32) {
    %c0_i32 = arith.constant 0 : i32
    %c0_i32_0 = arith.constant 0 : i32
    %c0_i32_1 = arith.constant 0 : i32
    return %c0_i32, %c0_i32_0 : i32, i32
  }
  func.func @transform_6(%arg0: i32) -> (i32, i32) {
    %c0_i32 = arith.constant 0 : i32
    %c0_i32_0 = arith.constant 0 : i32
    %c0_i32_1 = arith.constant 0 : i32
    return %c0_i32, %c0_i32_0 : i32, i32
  }
  func.func @transform_7(%arg0: i32) -> (i32, i32, i32) {
    %c0_i32 = arith.constant 0 : i32
    %c0_i32_0 = arith.constant 0 : i32
    %c0_i32_1 = arith.constant 0 : i32
    %c0_i32_2 = arith.constant 0 : i32
    return %c0_i32, %c0_i32_0, %c0_i32_1 : i32, i32, i32
  }
  func.func @transform_8(%arg0: i32) -> (i32, i32) {
    %c0_i32 = arith.constant 0 : i32
    %c0_i32_0 = arith.constant 0 : i32
    %c0_i32_1 = arith.constant 0 : i32
    return %c0_i32, %c0_i32_0 : i32, i32
  }
  func.func @transform_9(%arg0: i32) -> (i32, i32) {
    %c0_i32 = arith.constant 0 : i32
    %c0_i32_0 = arith.constant 0 : i32
    %c0_i32_1 = arith.constant 0 : i32
    return %c0_i32, %c0_i32_0 : i32, i32
  }
  func.func @transform_10(%arg0: i32) -> (i32, i32) {
    %c0_i32 = arith.constant 0 : i32
    %c0_i32_0 = arith.constant 0 : i32
    %c0_i32_1 = arith.constant 0 : i32
    return %c0_i32, %c0_i32_0 : i32, i32
  }
  func.func @transform_11(%arg0: i32) -> (i32, i32, i32) {
    %c0_i32 = arith.constant 0 : i32
    %c0_i32_0 = arith.constant 0 : i32
    %c0_i32_1 = arith.constant 0 : i32
    return %arg0, %c0_i32, %c0_i32_0 : i32, i32, i32
  }
}

module attributes {stable_mosaic.version = 11 : i64} {
  func.func @kernel(%arg0: i32, %arg1: memref<1x16x16xf32, #tpu.memory_space<vmem>>, %arg2: memref<16x8xbf16, #tpu.memory_space<vmem>>, %arg3: memref<1x8xf32, #tpu.memory_space<vmem>>, %arg4: memref<1x8xf32, #tpu.memory_space<vmem>>, %arg5: memref<9x8x32xbf16, #tpu.memory_space<vmem>>, %arg6: memref<1x32xf32, #tpu.memory_space<vmem>>, %arg7: memref<1x32xf32, #tpu.memory_space<vmem>>, %arg8: memref<2x16x1xf32, #tpu.memory_space<vmem>>, %arg9: memref<16x32xbf16, #tpu.memory_space<vmem>>, %arg10: memref<1x32xf32, #tpu.memory_space<vmem>>, %arg11: memref<1x32xf32, #tpu.memory_space<vmem>>, %arg12: memref<1x16x32xf32, #tpu.memory_space<vmem>>, %arg13: memref<26x8xf32, #tpu.memory_space<vmem>>) attributes {dimension_semantics = [#tpu.dimension_semantics<parallel>], iteration_bounds = array<i64: 2>, scalar_prefetch = 0 : i64, scratch_operands = 1 : i64, tpu.core_type = #tpu.core_type<tc>, window_params = [{transform_indices = @transform_0, window_bounds = array<i64: 1, 16, 16>}, {pipeline_mode = #tpu.pipeline_mode<synchronous>, transform_indices = @transform_1, window_bounds = array<i64: 16, 8>}, {pipeline_mode = #tpu.pipeline_mode<synchronous>, transform_indices = @transform_2, window_bounds = array<i64: 1, 8>}, {pipeline_mode = #tpu.pipeline_mode<synchronous>, transform_indices = @transform_3, window_bounds = array<i64: 1, 8>}, {pipeline_mode = #tpu.pipeline_mode<synchronous>, transform_indices = @transform_4, window_bounds = array<i64: 9, 8, 32>}, {pipeline_mode = #tpu.pipeline_mode<synchronous>, transform_indices = @transform_5, window_bounds = array<i64: 1, 32>}, {pipeline_mode = #tpu.pipeline_mode<synchronous>, transform_indices = @transform_6, window_bounds = array<i64: 1, 32>}, {pipeline_mode = #tpu.pipeline_mode<synchronous>, transform_indices = @transform_7, window_bounds = array<i64: 2, 16, 1>}, {pipeline_mode = #tpu.pipeline_mode<synchronous>, transform_indices = @transform_8, window_bounds = array<i64: 16, 32>}, {pipeline_mode = #tpu.pipeline_mode<synchronous>, transform_indices = @transform_9, window_bounds = array<i64: 1, 32>}, {pipeline_mode = #tpu.pipeline_mode<synchronous>, transform_indices = @transform_10, window_bounds = array<i64: 1, 32>}, {transform_indices = @transform_11, window_bounds = array<i64: 1, 16, 32>}]} {
    %c0 = arith.constant 0 : index
    %c0_0 = arith.constant 0 : index
    %c0_1 = arith.constant 0 : index
    %0 = vector.load %arg1[%c0, %c0_0, %c0_1] : memref<1x16x16xf32, #tpu.memory_space<vmem>>, vector<1x16x16xf32>
    %1 = vector.shape_cast %0 : vector<1x16x16xf32> to vector<16x16xf32>
    %2 = arith.truncf %1 : vector<16x16xf32> to vector<16x16xbf16>
    %c0_2 = arith.constant 0 : index
    %c0_3 = arith.constant 0 : index
    %3 = vector.load %arg2[%c0_2, %c0_3] : memref<16x8xbf16, #tpu.memory_space<vmem>>, vector<16x8xbf16>
    %cst = arith.constant dense<0.000000e+00> : vector<16x8xf32>
    %4 = tpu.matmul %2, %3, %cst {dimension_numbers = #tpu.dot_dimension_numbers<[1], [0], [0], [1], [0, 0, 1, 1], [], []>} : vector<16x16xbf16>, vector<16x8xbf16>, vector<16x8xf32> -> vector<16x8xf32>
    %c0_4 = arith.constant 0 : index
    %c0_5 = arith.constant 0 : index
    %5 = vector.load %arg3[%c0_4, %c0_5] : memref<1x8xf32, #tpu.memory_space<vmem>>, vector<1x8xf32>
    %6 = vector.broadcast %5 : vector<1x8xf32> to vector<16x8xf32>
    %7 = arith.mulf %4, %6 : vector<16x8xf32>
    %c0_6 = arith.constant 0 : index
    %c0_7 = arith.constant 0 : index
    %8 = vector.load %arg4[%c0_6, %c0_7] : memref<1x8xf32, #tpu.memory_space<vmem>>, vector<1x8xf32>
    %9 = vector.broadcast %8 : vector<1x8xf32> to vector<16x8xf32>
    %10 = arith.addf %7, %9 : vector<16x8xf32>
    %cst_8 = arith.constant 0.000000e+00 : f32
    %11 = vector.broadcast %cst_8 : f32 to vector<16x8xf32>
    %12 = arith.maximumf %10, %11 : vector<16x8xf32>
    %c0_9 = arith.constant 0 : index
    %c0_10 = arith.constant 0 : index
    %13 = vector.load %arg9[%c0_9, %c0_10] : memref<16x32xbf16, #tpu.memory_space<vmem>>, vector<16x32xbf16>
    %cst_11 = arith.constant dense<0.000000e+00> : vector<16x32xf32>
    %14 = tpu.matmul %2, %13, %cst_11 {dimension_numbers = #tpu.dot_dimension_numbers<[1], [0], [0], [1], [0, 0, 1, 1], [], []>} : vector<16x16xbf16>, vector<16x32xbf16>, vector<16x32xf32> -> vector<16x32xf32>
    %c0_12 = arith.constant 0 : index
    %c0_13 = arith.constant 0 : index
    %15 = vector.load %arg10[%c0_12, %c0_13] : memref<1x32xf32, #tpu.memory_space<vmem>>, vector<1x32xf32>
    %16 = vector.broadcast %15 : vector<1x32xf32> to vector<16x32xf32>
    %17 = arith.mulf %14, %16 : vector<16x32xf32>
    %c0_14 = arith.constant 0 : index
    %c0_15 = arith.constant 0 : index
    %18 = vector.load %arg11[%c0_14, %c0_15] : memref<1x32xf32, #tpu.memory_space<vmem>>, vector<1x32xf32>
    %19 = vector.broadcast %18 : vector<1x32xf32> to vector<16x32xf32>
    %20 = arith.addf %17, %19 : vector<16x32xf32>
    %cst_16 = arith.constant 0.000000e+00 : f32
    %21 = vector.broadcast %cst_16 : f32 to vector<16x32xf32>
    %22 = arith.maximumf %20, %21 : vector<16x32xf32>
    %cst_17 = arith.constant 0.000000e+00 : f32
    %23 = vector.broadcast %cst_17 : f32 to vector<5x8xf32>
    %c0_18 = arith.constant 0 : index
    %c0_19 = arith.constant 0 : index
    %24 = vector.load %arg13[%c0_18, %c0_19] : memref<26x8xf32, #tpu.memory_space<vmem>>, vector<5x8xf32>
    tpu.vector_store %arg13[%c0_18, %c0_19], %23 {strides = array<i32>} : memref<26x8xf32, #tpu.memory_space<vmem>>, vector<5x8xf32>,
    %c21 = arith.constant 21 : index
    %c0_20 = arith.constant 0 : index
    %25 = vector.load %arg13[%c21, %c0_20] : memref<26x8xf32, #tpu.memory_space<vmem>>, vector<5x8xf32>
    tpu.vector_store %arg13[%c21, %c0_20], %23 {strides = array<i32>} : memref<26x8xf32, #tpu.memory_space<vmem>>, vector<5x8xf32>,
    %c5 = arith.constant 5 : index
    %c0_21 = arith.constant 0 : index
    %26 = vector.load %arg13[%c5, %c0_21] : memref<26x8xf32, #tpu.memory_space<vmem>>, vector<16x8xf32>
    tpu.vector_store %arg13[%c5, %c0_21], %12 {strides = array<i32>} : memref<26x8xf32, #tpu.memory_space<vmem>>, vector<16x8xf32>,
    %27 = arith.truncf %12 : vector<16x8xf32> to vector<16x8xbf16>
    %c4 = arith.constant 4 : index
    %c0_22 = arith.constant 0 : index
    %c0_23 = arith.constant 0 : index
    %28 = vector.load %arg5[%c4, %c0_22, %c0_23] : memref<9x8x32xbf16, #tpu.memory_space<vmem>>, vector<1x8x32xbf16>
    %29 = vector.shape_cast %28 : vector<1x8x32xbf16> to vector<8x32xbf16>
    %cst_24 = arith.constant dense<0.000000e+00> : vector<16x32xf32>
    %30 = tpu.matmul %27, %29, %cst_24 {dimension_numbers = #tpu.dot_dimension_numbers<[1], [0], [0], [1], [0, 0, 1, 1], [], []>} : vector<16x8xbf16>, vector<8x32xbf16>, vector<16x32xf32> -> vector<16x32xf32>
    %c0_25 = arith.constant 0 : index
    %c0_26 = arith.constant 0 : index
    %31 = vector.load %arg13[%c0_25, %c0_26] : memref<26x8xf32, #tpu.memory_space<vmem>>, vector<16x8xf32>
    %c0_27 = arith.constant 0 : index
    %c0_28 = arith.constant 0 : index
    %c0_29 = arith.constant 0 : index
    %32 = vector.load %arg8[%c0_27, %c0_28, %c0_29] : memref<2x16x1xf32, #tpu.memory_space<vmem>>, vector<1x16x1xf32>
    %33 = vector.shape_cast %32 : vector<1x16x1xf32> to vector<16x1xf32>
    %34 = vector.broadcast %33 : vector<16x1xf32> to vector<16x8xf32>
    %35 = arith.mulf %31, %34 : vector<16x8xf32>
    %36 = arith.truncf %35 : vector<16x8xf32> to vector<16x8xbf16>
    %c0_30 = arith.constant 0 : index
    %c0_31 = arith.constant 0 : index
    %c0_32 = arith.constant 0 : index
    %37 = vector.load %arg5[%c0_30, %c0_31, %c0_32] : memref<9x8x32xbf16, #tpu.memory_space<vmem>>, vector<1x8x32xbf16>
    %38 = vector.shape_cast %37 : vector<1x8x32xbf16> to vector<8x32xbf16>
    %cst_33 = arith.constant dense<0.000000e+00> : vector<16x32xf32>
    %39 = tpu.matmul %36, %38, %cst_33 {dimension_numbers = #tpu.dot_dimension_numbers<[1], [0], [0], [1], [0, 0, 1, 1], [], []>} : vector<16x8xbf16>, vector<8x32xbf16>, vector<16x32xf32> -> vector<16x32xf32>
    %40 = arith.addf %30, %39 : vector<16x32xf32>
    %c1 = arith.constant 1 : index
    %c0_34 = arith.constant 0 : index
    %41 = vector.load %arg13[%c1, %c0_34] : memref<26x8xf32, #tpu.memory_space<vmem>>, vector<16x8xf32>
    %42 = arith.truncf %41 : vector<16x8xf32> to vector<16x8xbf16>
    %c1_35 = arith.constant 1 : index
    %c0_36 = arith.constant 0 : index
    %c0_37 = arith.constant 0 : index
    %43 = vector.load %arg5[%c1_35, %c0_36, %c0_37] : memref<9x8x32xbf16, #tpu.memory_space<vmem>>, vector<1x8x32xbf16>
    %44 = vector.shape_cast %43 : vector<1x8x32xbf16> to vector<8x32xbf16>
    %cst_38 = arith.constant dense<0.000000e+00> : vector<16x32xf32>
    %45 = tpu.matmul %42, %44, %cst_38 {dimension_numbers = #tpu.dot_dimension_numbers<[1], [0], [0], [1], [0, 0, 1, 1], [], []>} : vector<16x8xbf16>, vector<8x32xbf16>, vector<16x32xf32> -> vector<16x32xf32>
    %46 = arith.addf %40, %45 : vector<16x32xf32>
    %c2 = arith.constant 2 : index
    %c0_39 = arith.constant 0 : index
    %47 = vector.load %arg13[%c2, %c0_39] : memref<26x8xf32, #tpu.memory_space<vmem>>, vector<16x8xf32>
    %c1_40 = arith.constant 1 : index
    %c0_41 = arith.constant 0 : index
    %c0_42 = arith.constant 0 : index
    %48 = vector.load %arg8[%c1_40, %c0_41, %c0_42] : memref<2x16x1xf32, #tpu.memory_space<vmem>>, vector<1x16x1xf32>
    %49 = vector.shape_cast %48 : vector<1x16x1xf32> to vector<16x1xf32>
    %50 = vector.broadcast %49 : vector<16x1xf32> to vector<16x8xf32>
    %51 = arith.mulf %47, %50 : vector<16x8xf32>
    %52 = arith.truncf %51 : vector<16x8xf32> to vector<16x8xbf16>
    %c2_43 = arith.constant 2 : index
    %c0_44 = arith.constant 0 : index
    %c0_45 = arith.constant 0 : index
    %53 = vector.load %arg5[%c2_43, %c0_44, %c0_45] : memref<9x8x32xbf16, #tpu.memory_space<vmem>>, vector<1x8x32xbf16>
    %54 = vector.shape_cast %53 : vector<1x8x32xbf16> to vector<8x32xbf16>
    %cst_46 = arith.constant dense<0.000000e+00> : vector<16x32xf32>
    %55 = tpu.matmul %52, %54, %cst_46 {dimension_numbers = #tpu.dot_dimension_numbers<[1], [0], [0], [1], [0, 0, 1, 1], [], []>} : vector<16x8xbf16>, vector<8x32xbf16>, vector<16x32xf32> -> vector<16x32xf32>
    %56 = arith.addf %46, %55 : vector<16x32xf32>
    %c4_47 = arith.constant 4 : index
    %c0_48 = arith.constant 0 : index
    %57 = vector.load %arg13[%c4_47, %c0_48] : memref<26x8xf32, #tpu.memory_space<vmem>>, vector<16x8xf32>
    %c0_49 = arith.constant 0 : index
    %c0_50 = arith.constant 0 : index
    %c0_51 = arith.constant 0 : index
    %58 = vector.load %arg8[%c0_49, %c0_50, %c0_51] : memref<2x16x1xf32, #tpu.memory_space<vmem>>, vector<1x16x1xf32>
    %59 = vector.shape_cast %58 : vector<1x16x1xf32> to vector<16x1xf32>
    %60 = vector.broadcast %59 : vector<16x1xf32> to vector<16x8xf32>
    %61 = arith.mulf %57, %60 : vector<16x8xf32>
    %62 = arith.truncf %61 : vector<16x8xf32> to vector<16x8xbf16>
    %c3 = arith.constant 3 : index
    %c0_52 = arith.constant 0 : index
    %c0_53 = arith.constant 0 : index
    %63 = vector.load %arg5[%c3, %c0_52, %c0_53] : memref<9x8x32xbf16, #tpu.memory_space<vmem>>, vector<1x8x32xbf16>
    %64 = vector.shape_cast %63 : vector<1x8x32xbf16> to vector<8x32xbf16>
    %cst_54 = arith.constant dense<0.000000e+00> : vector<16x32xf32>
    %65 = tpu.matmul %62, %64, %cst_54 {dimension_numbers = #tpu.dot_dimension_numbers<[1], [0], [0], [1], [0, 0, 1, 1], [], []>} : vector<16x8xbf16>, vector<8x32xbf16>, vector<16x32xf32> -> vector<16x32xf32>
    %66 = arith.addf %56, %65 : vector<16x32xf32>
    %c6 = arith.constant 6 : index
    %c0_55 = arith.constant 0 : index
    %67 = vector.load %arg13[%c6, %c0_55] : memref<26x8xf32, #tpu.memory_space<vmem>>, vector<16x8xf32>
    %c1_56 = arith.constant 1 : index
    %c0_57 = arith.constant 0 : index
    %c0_58 = arith.constant 0 : index
    %68 = vector.load %arg8[%c1_56, %c0_57, %c0_58] : memref<2x16x1xf32, #tpu.memory_space<vmem>>, vector<1x16x1xf32>
    %69 = vector.shape_cast %68 : vector<1x16x1xf32> to vector<16x1xf32>
    %70 = vector.broadcast %69 : vector<16x1xf32> to vector<16x8xf32>
    %71 = arith.mulf %67, %70 : vector<16x8xf32>
    %72 = arith.truncf %71 : vector<16x8xf32> to vector<16x8xbf16>
    %c5_59 = arith.constant 5 : index
    %c0_60 = arith.constant 0 : index
    %c0_61 = arith.constant 0 : index
    %73 = vector.load %arg5[%c5_59, %c0_60, %c0_61] : memref<9x8x32xbf16, #tpu.memory_space<vmem>>, vector<1x8x32xbf16>
    %74 = vector.shape_cast %73 : vector<1x8x32xbf16> to vector<8x32xbf16>
    %cst_62 = arith.constant dense<0.000000e+00> : vector<16x32xf32>
    %75 = tpu.matmul %72, %74, %cst_62 {dimension_numbers = #tpu.dot_dimension_numbers<[1], [0], [0], [1], [0, 0, 1, 1], [], []>} : vector<16x8xbf16>, vector<8x32xbf16>, vector<16x32xf32> -> vector<16x32xf32>
    %76 = arith.addf %66, %75 : vector<16x32xf32>
    %c8 = arith.constant 8 : index
    %c0_63 = arith.constant 0 : index
    %77 = vector.load %arg13[%c8, %c0_63] : memref<26x8xf32, #tpu.memory_space<vmem>>, vector<16x8xf32>
    %c0_64 = arith.constant 0 : index
    %c0_65 = arith.constant 0 : index
    %c0_66 = arith.constant 0 : index
    %78 = vector.load %arg8[%c0_64, %c0_65, %c0_66] : memref<2x16x1xf32, #tpu.memory_space<vmem>>, vector<1x16x1xf32>
    %79 = vector.shape_cast %78 : vector<1x16x1xf32> to vector<16x1xf32>
    %80 = vector.broadcast %79 : vector<16x1xf32> to vector<16x8xf32>
    %81 = arith.mulf %77, %80 : vector<16x8xf32>
    %82 = arith.truncf %81 : vector<16x8xf32> to vector<16x8xbf16>
    %c6_67 = arith.constant 6 : index
    %c0_68 = arith.constant 0 : index
    %c0_69 = arith.constant 0 : index
    %83 = vector.load %arg5[%c6_67, %c0_68, %c0_69] : memref<9x8x32xbf16, #tpu.memory_space<vmem>>, vector<1x8x32xbf16>
    %84 = vector.shape_cast %83 : vector<1x8x32xbf16> to vector<8x32xbf16>
    %cst_70 = arith.constant dense<0.000000e+00> : vector<16x32xf32>
    %85 = tpu.matmul %82, %84, %cst_70 {dimension_numbers = #tpu.dot_dimension_numbers<[1], [0], [0], [1], [0, 0, 1, 1], [], []>} : vector<16x8xbf16>, vector<8x32xbf16>, vector<16x32xf32> -> vector<16x32xf32>
    %86 = arith.addf %76, %85 : vector<16x32xf32>
    %c9 = arith.constant 9 : index
    %c0_71 = arith.constant 0 : index
    %87 = vector.load %arg13[%c9, %c0_71] : memref<26x8xf32, #tpu.memory_space<vmem>>, vector<16x8xf32>
    %88 = arith.truncf %87 : vector<16x8xf32> to vector<16x8xbf16>
    %c7 = arith.constant 7 : index
    %c0_72 = arith.constant 0 : index
    %c0_73 = arith.constant 0 : index
    %89 = vector.load %arg5[%c7, %c0_72, %c0_73] : memref<9x8x32xbf16, #tpu.memory_space<vmem>>, vector<1x8x32xbf16>
    %90 = vector.shape_cast %89 : vector<1x8x32xbf16> to vector<8x32xbf16>
    %cst_74 = arith.constant dense<0.000000e+00> : vector<16x32xf32>
    %91 = tpu.matmul %88, %90, %cst_74 {dimension_numbers = #tpu.dot_dimension_numbers<[1], [0], [0], [1], [0, 0, 1, 1], [], []>} : vector<16x8xbf16>, vector<8x32xbf16>, vector<16x32xf32> -> vector<16x32xf32>
    %92 = arith.addf %86, %91 : vector<16x32xf32>
    %c10 = arith.constant 10 : index
    %c0_75 = arith.constant 0 : index
    %93 = vector.load %arg13[%c10, %c0_75] : memref<26x8xf32, #tpu.memory_space<vmem>>, vector<16x8xf32>
    %c1_76 = arith.constant 1 : index
    %c0_77 = arith.constant 0 : index
    %c0_78 = arith.constant 0 : index
    %94 = vector.load %arg8[%c1_76, %c0_77, %c0_78] : memref<2x16x1xf32, #tpu.memory_space<vmem>>, vector<1x16x1xf32>
    %95 = vector.shape_cast %94 : vector<1x16x1xf32> to vector<16x1xf32>
    %96 = vector.broadcast %95 : vector<16x1xf32> to vector<16x8xf32>
    %97 = arith.mulf %93, %96 : vector<16x8xf32>
    %98 = arith.truncf %97 : vector<16x8xf32> to vector<16x8xbf16>
    %c8_79 = arith.constant 8 : index
    %c0_80 = arith.constant 0 : index
    %c0_81 = arith.constant 0 : index
    %99 = vector.load %arg5[%c8_79, %c0_80, %c0_81] : memref<9x8x32xbf16, #tpu.memory_space<vmem>>, vector<1x8x32xbf16>
    %100 = vector.shape_cast %99 : vector<1x8x32xbf16> to vector<8x32xbf16>
    %cst_82 = arith.constant dense<0.000000e+00> : vector<16x32xf32>
    %101 = tpu.matmul %98, %100, %cst_82 {dimension_numbers = #tpu.dot_dimension_numbers<[1], [0], [0], [1], [0, 0, 1, 1], [], []>} : vector<16x8xbf16>, vector<8x32xbf16>, vector<16x32xf32> -> vector<16x32xf32>
    %102 = arith.addf %92, %101 : vector<16x32xf32>
    %c0_83 = arith.constant 0 : index
    %c0_84 = arith.constant 0 : index
    %103 = vector.load %arg6[%c0_83, %c0_84] : memref<1x32xf32, #tpu.memory_space<vmem>>, vector<1x32xf32>
    %104 = vector.broadcast %103 : vector<1x32xf32> to vector<16x32xf32>
    %105 = arith.mulf %102, %104 : vector<16x32xf32>
    %c0_85 = arith.constant 0 : index
    %c0_86 = arith.constant 0 : index
    %106 = vector.load %arg7[%c0_85, %c0_86] : memref<1x32xf32, #tpu.memory_space<vmem>>, vector<1x32xf32>
    %107 = vector.broadcast %106 : vector<1x32xf32> to vector<16x32xf32>
    %108 = arith.addf %105, %107 : vector<16x32xf32>
    %cst_87 = arith.constant 0.000000e+00 : f32
    %109 = vector.broadcast %cst_87 : f32 to vector<16x32xf32>
    %110 = arith.maximumf %108, %109 : vector<16x32xf32>
    %111 = arith.addf %110, %22 : vector<16x32xf32>
    %c0_88 = arith.constant 0 : index
    %c0_89 = arith.constant 0 : index
    %c0_90 = arith.constant 0 : index
    %112 = vector.load %arg12[%c0_88, %c0_89, %c0_90] : memref<1x16x32xf32, #tpu.memory_space<vmem>>, vector<1x16x32xf32>
    %113 = vector.shape_cast %112 : vector<1x16x32xf32> to vector<16x32xf32>
    %114 = vector.shape_cast %111 : vector<16x32xf32> to vector<1x16x32xf32>
    tpu.vector_store %arg12[%c0_88, %c0_89, %c0_90], %114 {strides = array<i32>} : memref<1x16x32xf32, #tpu.memory_space<vmem>>, vector<1x16x32xf32>,
    return
  }
  func.func @transform_0(%arg0: i32) -> (i32, i32, i32) {
    %c0_i32 = arith.constant 0 : i32
    %c0_i32_0 = arith.constant 0 : i32
    %c0_i32_1 = arith.constant 0 : i32
    return %arg0, %c0_i32, %c0_i32_0 : i32, i32, i32
  }
  func.func @transform_1(%arg0: i32) -> (i32, i32) {
    %c0_i32 = arith.constant 0 : i32
    %c0_i32_0 = arith.constant 0 : i32
    %c0_i32_1 = arith.constant 0 : i32
    return %c0_i32, %c0_i32_0 : i32, i32
  }
  func.func @transform_2(%arg0: i32) -> (i32, i32) {
    %c0_i32 = arith.constant 0 : i32
    %c0_i32_0 = arith.constant 0 : i32
    %c0_i32_1 = arith.constant 0 : i32
    return %c0_i32, %c0_i32_0 : i32, i32
  }
  func.func @transform_3(%arg0: i32) -> (i32, i32) {
    %c0_i32 = arith.constant 0 : i32
    %c0_i32_0 = arith.constant 0 : i32
    %c0_i32_1 = arith.constant 0 : i32
    return %c0_i32, %c0_i32_0 : i32, i32
  }
  func.func @transform_4(%arg0: i32) -> (i32, i32, i32) {
    %c0_i32 = arith.constant 0 : i32
    %c0_i32_0 = arith.constant 0 : i32
    %c0_i32_1 = arith.constant 0 : i32
    %c0_i32_2 = arith.constant 0 : i32
    return %c0_i32, %c0_i32_0, %c0_i32_1 : i32, i32, i32
  }
  func.func @transform_5(%arg0: i32) -> (i32, i32) {
    %c0_i32 = arith.constant 0 : i32
    %c0_i32_0 = arith.constant 0 : i32
    %c0_i32_1 = arith.constant 0 : i32
    return %c0_i32, %c0_i32_0 : i32, i32
  }
  func.func @transform_6(%arg0: i32) -> (i32, i32) {
    %c0_i32 = arith.constant 0 : i32
    %c0_i32_0 = arith.constant 0 : i32
    %c0_i32_1 = arith.constant 0 : i32
    return %c0_i32, %c0_i32_0 : i32, i32
  }
  func.func @transform_7(%arg0: i32) -> (i32, i32, i32) {
    %c0_i32 = arith.constant 0 : i32
    %c0_i32_0 = arith.constant 0 : i32
    %c0_i32_1 = arith.constant 0 : i32
    %c0_i32_2 = arith.constant 0 : i32
    return %c0_i32, %c0_i32_0, %c0_i32_1 : i32, i32, i32
  }
  func.func @transform_8(%arg0: i32) -> (i32, i32) {
    %c0_i32 = arith.constant 0 : i32
    %c0_i32_0 = arith.constant 0 : i32
    %c0_i32_1 = arith.constant 0 : i32
    return %c0_i32, %c0_i32_0 : i32, i32
  }
  func.func @transform_9(%arg0: i32) -> (i32, i32) {
    %c0_i32 = arith.constant 0 : i32
    %c0_i32_0 = arith.constant 0 : i32
    %c0_i32_1 = arith.constant 0 : i32
    return %c0_i32, %c0_i32_0 : i32, i32
  }
  func.func @transform_10(%arg0: i32) -> (i32, i32) {
    %c0_i32 = arith.constant 0 : i32
    %c0_i32_0 = arith.constant 0 : i32
    %c0_i32_1 = arith.constant 0 : i32
    return %c0_i32, %c0_i32_0 : i32, i32
  }
  func.func @transform_11(%arg0: i32) -> (i32, i32, i32) {
    %c0_i32 = arith.constant 0 : i32
    %c0_i32_0 = arith.constant 0 : i32
    %c0_i32_1 = arith.constant 0 : i32
    return %arg0, %c0_i32, %c0_i32_0 : i32, i32, i32
  }
}

module attributes {stable_mosaic.version = 11 : i64} {
  func.func @kernel(%arg0: i32, %arg1: memref<1x16x32xf32, #tpu.memory_space<vmem>>, %arg2: memref<32x8xbf16, #tpu.memory_space<vmem>>, %arg3: memref<1x8xf32, #tpu.memory_space<vmem>>, %arg4: memref<1x8xf32, #tpu.memory_space<vmem>>, %arg5: memref<9x8x32xbf16, #tpu.memory_space<vmem>>, %arg6: memref<1x32xf32, #tpu.memory_space<vmem>>, %arg7: memref<1x32xf32, #tpu.memory_space<vmem>>, %arg8: memref<2x16x1xf32, #tpu.memory_space<vmem>>, %arg9: memref<32x32xbf16, #tpu.memory_space<vmem>>, %arg10: memref<1x32xf32, #tpu.memory_space<vmem>>, %arg11: memref<1x32xf32, #tpu.memory_space<vmem>>, %arg12: memref<1x16x32xf32, #tpu.memory_space<vmem>>, %arg13: memref<26x8xf32, #tpu.memory_space<vmem>>) attributes {dimension_semantics = [#tpu.dimension_semantics<parallel>], iteration_bounds = array<i64: 2>, scalar_prefetch = 0 : i64, scratch_operands = 1 : i64, tpu.core_type = #tpu.core_type<tc>, window_params = [{transform_indices = @transform_0, window_bounds = array<i64: 1, 16, 32>}, {pipeline_mode = #tpu.pipeline_mode<synchronous>, transform_indices = @transform_1, window_bounds = array<i64: 32, 8>}, {pipeline_mode = #tpu.pipeline_mode<synchronous>, transform_indices = @transform_2, window_bounds = array<i64: 1, 8>}, {pipeline_mode = #tpu.pipeline_mode<synchronous>, transform_indices = @transform_3, window_bounds = array<i64: 1, 8>}, {pipeline_mode = #tpu.pipeline_mode<synchronous>, transform_indices = @transform_4, window_bounds = array<i64: 9, 8, 32>}, {pipeline_mode = #tpu.pipeline_mode<synchronous>, transform_indices = @transform_5, window_bounds = array<i64: 1, 32>}, {pipeline_mode = #tpu.pipeline_mode<synchronous>, transform_indices = @transform_6, window_bounds = array<i64: 1, 32>}, {pipeline_mode = #tpu.pipeline_mode<synchronous>, transform_indices = @transform_7, window_bounds = array<i64: 2, 16, 1>}, {pipeline_mode = #tpu.pipeline_mode<synchronous>, transform_indices = @transform_8, window_bounds = array<i64: 32, 32>}, {pipeline_mode = #tpu.pipeline_mode<synchronous>, transform_indices = @transform_9, window_bounds = array<i64: 1, 32>}, {pipeline_mode = #tpu.pipeline_mode<synchronous>, transform_indices = @transform_10, window_bounds = array<i64: 1, 32>}, {transform_indices = @transform_11, window_bounds = array<i64: 1, 16, 32>}]} {
    %c0 = arith.constant 0 : index
    %c0_0 = arith.constant 0 : index
    %c0_1 = arith.constant 0 : index
    %0 = vector.load %arg1[%c0, %c0_0, %c0_1] : memref<1x16x32xf32, #tpu.memory_space<vmem>>, vector<1x16x32xf32>
    %1 = vector.shape_cast %0 : vector<1x16x32xf32> to vector<16x32xf32>
    %2 = arith.truncf %1 : vector<16x32xf32> to vector<16x32xbf16>
    %c0_2 = arith.constant 0 : index
    %c0_3 = arith.constant 0 : index
    %3 = vector.load %arg2[%c0_2, %c0_3] : memref<32x8xbf16, #tpu.memory_space<vmem>>, vector<32x8xbf16>
    %cst = arith.constant dense<0.000000e+00> : vector<16x8xf32>
    %4 = tpu.matmul %2, %3, %cst {dimension_numbers = #tpu.dot_dimension_numbers<[1], [0], [0], [1], [0, 0, 1, 1], [], []>} : vector<16x32xbf16>, vector<32x8xbf16>, vector<16x8xf32> -> vector<16x8xf32>
    %c0_4 = arith.constant 0 : index
    %c0_5 = arith.constant 0 : index
    %5 = vector.load %arg3[%c0_4, %c0_5] : memref<1x8xf32, #tpu.memory_space<vmem>>, vector<1x8xf32>
    %6 = vector.broadcast %5 : vector<1x8xf32> to vector<16x8xf32>
    %7 = arith.mulf %4, %6 : vector<16x8xf32>
    %c0_6 = arith.constant 0 : index
    %c0_7 = arith.constant 0 : index
    %8 = vector.load %arg4[%c0_6, %c0_7] : memref<1x8xf32, #tpu.memory_space<vmem>>, vector<1x8xf32>
    %9 = vector.broadcast %8 : vector<1x8xf32> to vector<16x8xf32>
    %10 = arith.addf %7, %9 : vector<16x8xf32>
    %cst_8 = arith.constant 0.000000e+00 : f32
    %11 = vector.broadcast %cst_8 : f32 to vector<16x8xf32>
    %12 = arith.maximumf %10, %11 : vector<16x8xf32>
    %c0_9 = arith.constant 0 : index
    %c0_10 = arith.constant 0 : index
    %13 = vector.load %arg9[%c0_9, %c0_10] : memref<32x32xbf16, #tpu.memory_space<vmem>>, vector<32x32xbf16>
    %cst_11 = arith.constant dense<0.000000e+00> : vector<16x32xf32>
    %14 = tpu.matmul %2, %13, %cst_11 {dimension_numbers = #tpu.dot_dimension_numbers<[1], [0], [0], [1], [0, 0, 1, 1], [], []>} : vector<16x32xbf16>, vector<32x32xbf16>, vector<16x32xf32> -> vector<16x32xf32>
    %c0_12 = arith.constant 0 : index
    %c0_13 = arith.constant 0 : index
    %15 = vector.load %arg10[%c0_12, %c0_13] : memref<1x32xf32, #tpu.memory_space<vmem>>, vector<1x32xf32>
    %16 = vector.broadcast %15 : vector<1x32xf32> to vector<16x32xf32>
    %17 = arith.mulf %14, %16 : vector<16x32xf32>
    %c0_14 = arith.constant 0 : index
    %c0_15 = arith.constant 0 : index
    %18 = vector.load %arg11[%c0_14, %c0_15] : memref<1x32xf32, #tpu.memory_space<vmem>>, vector<1x32xf32>
    %19 = vector.broadcast %18 : vector<1x32xf32> to vector<16x32xf32>
    %20 = arith.addf %17, %19 : vector<16x32xf32>
    %cst_16 = arith.constant 0.000000e+00 : f32
    %21 = vector.broadcast %cst_16 : f32 to vector<16x32xf32>
    %22 = arith.maximumf %20, %21 : vector<16x32xf32>
    %cst_17 = arith.constant 0.000000e+00 : f32
    %23 = vector.broadcast %cst_17 : f32 to vector<5x8xf32>
    %c0_18 = arith.constant 0 : index
    %c0_19 = arith.constant 0 : index
    %24 = vector.load %arg13[%c0_18, %c0_19] : memref<26x8xf32, #tpu.memory_space<vmem>>, vector<5x8xf32>
    tpu.vector_store %arg13[%c0_18, %c0_19], %23 {strides = array<i32>} : memref<26x8xf32, #tpu.memory_space<vmem>>, vector<5x8xf32>,
    %c21 = arith.constant 21 : index
    %c0_20 = arith.constant 0 : index
    %25 = vector.load %arg13[%c21, %c0_20] : memref<26x8xf32, #tpu.memory_space<vmem>>, vector<5x8xf32>
    tpu.vector_store %arg13[%c21, %c0_20], %23 {strides = array<i32>} : memref<26x8xf32, #tpu.memory_space<vmem>>, vector<5x8xf32>,
    %c5 = arith.constant 5 : index
    %c0_21 = arith.constant 0 : index
    %26 = vector.load %arg13[%c5, %c0_21] : memref<26x8xf32, #tpu.memory_space<vmem>>, vector<16x8xf32>
    tpu.vector_store %arg13[%c5, %c0_21], %12 {strides = array<i32>} : memref<26x8xf32, #tpu.memory_space<vmem>>, vector<16x8xf32>,
    %27 = arith.truncf %12 : vector<16x8xf32> to vector<16x8xbf16>
    %c4 = arith.constant 4 : index
    %c0_22 = arith.constant 0 : index
    %c0_23 = arith.constant 0 : index
    %28 = vector.load %arg5[%c4, %c0_22, %c0_23] : memref<9x8x32xbf16, #tpu.memory_space<vmem>>, vector<1x8x32xbf16>
    %29 = vector.shape_cast %28 : vector<1x8x32xbf16> to vector<8x32xbf16>
    %cst_24 = arith.constant dense<0.000000e+00> : vector<16x32xf32>
    %30 = tpu.matmul %27, %29, %cst_24 {dimension_numbers = #tpu.dot_dimension_numbers<[1], [0], [0], [1], [0, 0, 1, 1], [], []>} : vector<16x8xbf16>, vector<8x32xbf16>, vector<16x32xf32> -> vector<16x32xf32>
    %c0_25 = arith.constant 0 : index
    %c0_26 = arith.constant 0 : index
    %31 = vector.load %arg13[%c0_25, %c0_26] : memref<26x8xf32, #tpu.memory_space<vmem>>, vector<16x8xf32>
    %c0_27 = arith.constant 0 : index
    %c0_28 = arith.constant 0 : index
    %c0_29 = arith.constant 0 : index
    %32 = vector.load %arg8[%c0_27, %c0_28, %c0_29] : memref<2x16x1xf32, #tpu.memory_space<vmem>>, vector<1x16x1xf32>
    %33 = vector.shape_cast %32 : vector<1x16x1xf32> to vector<16x1xf32>
    %34 = vector.broadcast %33 : vector<16x1xf32> to vector<16x8xf32>
    %35 = arith.mulf %31, %34 : vector<16x8xf32>
    %36 = arith.truncf %35 : vector<16x8xf32> to vector<16x8xbf16>
    %c0_30 = arith.constant 0 : index
    %c0_31 = arith.constant 0 : index
    %c0_32 = arith.constant 0 : index
    %37 = vector.load %arg5[%c0_30, %c0_31, %c0_32] : memref<9x8x32xbf16, #tpu.memory_space<vmem>>, vector<1x8x32xbf16>
    %38 = vector.shape_cast %37 : vector<1x8x32xbf16> to vector<8x32xbf16>
    %cst_33 = arith.constant dense<0.000000e+00> : vector<16x32xf32>
    %39 = tpu.matmul %36, %38, %cst_33 {dimension_numbers = #tpu.dot_dimension_numbers<[1], [0], [0], [1], [0, 0, 1, 1], [], []>} : vector<16x8xbf16>, vector<8x32xbf16>, vector<16x32xf32> -> vector<16x32xf32>
    %40 = arith.addf %30, %39 : vector<16x32xf32>
    %c1 = arith.constant 1 : index
    %c0_34 = arith.constant 0 : index
    %41 = vector.load %arg13[%c1, %c0_34] : memref<26x8xf32, #tpu.memory_space<vmem>>, vector<16x8xf32>
    %42 = arith.truncf %41 : vector<16x8xf32> to vector<16x8xbf16>
    %c1_35 = arith.constant 1 : index
    %c0_36 = arith.constant 0 : index
    %c0_37 = arith.constant 0 : index
    %43 = vector.load %arg5[%c1_35, %c0_36, %c0_37] : memref<9x8x32xbf16, #tpu.memory_space<vmem>>, vector<1x8x32xbf16>
    %44 = vector.shape_cast %43 : vector<1x8x32xbf16> to vector<8x32xbf16>
    %cst_38 = arith.constant dense<0.000000e+00> : vector<16x32xf32>
    %45 = tpu.matmul %42, %44, %cst_38 {dimension_numbers = #tpu.dot_dimension_numbers<[1], [0], [0], [1], [0, 0, 1, 1], [], []>} : vector<16x8xbf16>, vector<8x32xbf16>, vector<16x32xf32> -> vector<16x32xf32>
    %46 = arith.addf %40, %45 : vector<16x32xf32>
    %c2 = arith.constant 2 : index
    %c0_39 = arith.constant 0 : index
    %47 = vector.load %arg13[%c2, %c0_39] : memref<26x8xf32, #tpu.memory_space<vmem>>, vector<16x8xf32>
    %c1_40 = arith.constant 1 : index
    %c0_41 = arith.constant 0 : index
    %c0_42 = arith.constant 0 : index
    %48 = vector.load %arg8[%c1_40, %c0_41, %c0_42] : memref<2x16x1xf32, #tpu.memory_space<vmem>>, vector<1x16x1xf32>
    %49 = vector.shape_cast %48 : vector<1x16x1xf32> to vector<16x1xf32>
    %50 = vector.broadcast %49 : vector<16x1xf32> to vector<16x8xf32>
    %51 = arith.mulf %47, %50 : vector<16x8xf32>
    %52 = arith.truncf %51 : vector<16x8xf32> to vector<16x8xbf16>
    %c2_43 = arith.constant 2 : index
    %c0_44 = arith.constant 0 : index
    %c0_45 = arith.constant 0 : index
    %53 = vector.load %arg5[%c2_43, %c0_44, %c0_45] : memref<9x8x32xbf16, #tpu.memory_space<vmem>>, vector<1x8x32xbf16>
    %54 = vector.shape_cast %53 : vector<1x8x32xbf16> to vector<8x32xbf16>
    %cst_46 = arith.constant dense<0.000000e+00> : vector<16x32xf32>
    %55 = tpu.matmul %52, %54, %cst_46 {dimension_numbers = #tpu.dot_dimension_numbers<[1], [0], [0], [1], [0, 0, 1, 1], [], []>} : vector<16x8xbf16>, vector<8x32xbf16>, vector<16x32xf32> -> vector<16x32xf32>
    %56 = arith.addf %46, %55 : vector<16x32xf32>
    %c4_47 = arith.constant 4 : index
    %c0_48 = arith.constant 0 : index
    %57 = vector.load %arg13[%c4_47, %c0_48] : memref<26x8xf32, #tpu.memory_space<vmem>>, vector<16x8xf32>
    %c0_49 = arith.constant 0 : index
    %c0_50 = arith.constant 0 : index
    %c0_51 = arith.constant 0 : index
    %58 = vector.load %arg8[%c0_49, %c0_50, %c0_51] : memref<2x16x1xf32, #tpu.memory_space<vmem>>, vector<1x16x1xf32>
    %59 = vector.shape_cast %58 : vector<1x16x1xf32> to vector<16x1xf32>
    %60 = vector.broadcast %59 : vector<16x1xf32> to vector<16x8xf32>
    %61 = arith.mulf %57, %60 : vector<16x8xf32>
    %62 = arith.truncf %61 : vector<16x8xf32> to vector<16x8xbf16>
    %c3 = arith.constant 3 : index
    %c0_52 = arith.constant 0 : index
    %c0_53 = arith.constant 0 : index
    %63 = vector.load %arg5[%c3, %c0_52, %c0_53] : memref<9x8x32xbf16, #tpu.memory_space<vmem>>, vector<1x8x32xbf16>
    %64 = vector.shape_cast %63 : vector<1x8x32xbf16> to vector<8x32xbf16>
    %cst_54 = arith.constant dense<0.000000e+00> : vector<16x32xf32>
    %65 = tpu.matmul %62, %64, %cst_54 {dimension_numbers = #tpu.dot_dimension_numbers<[1], [0], [0], [1], [0, 0, 1, 1], [], []>} : vector<16x8xbf16>, vector<8x32xbf16>, vector<16x32xf32> -> vector<16x32xf32>
    %66 = arith.addf %56, %65 : vector<16x32xf32>
    %c6 = arith.constant 6 : index
    %c0_55 = arith.constant 0 : index
    %67 = vector.load %arg13[%c6, %c0_55] : memref<26x8xf32, #tpu.memory_space<vmem>>, vector<16x8xf32>
    %c1_56 = arith.constant 1 : index
    %c0_57 = arith.constant 0 : index
    %c0_58 = arith.constant 0 : index
    %68 = vector.load %arg8[%c1_56, %c0_57, %c0_58] : memref<2x16x1xf32, #tpu.memory_space<vmem>>, vector<1x16x1xf32>
    %69 = vector.shape_cast %68 : vector<1x16x1xf32> to vector<16x1xf32>
    %70 = vector.broadcast %69 : vector<16x1xf32> to vector<16x8xf32>
    %71 = arith.mulf %67, %70 : vector<16x8xf32>
    %72 = arith.truncf %71 : vector<16x8xf32> to vector<16x8xbf16>
    %c5_59 = arith.constant 5 : index
    %c0_60 = arith.constant 0 : index
    %c0_61 = arith.constant 0 : index
    %73 = vector.load %arg5[%c5_59, %c0_60, %c0_61] : memref<9x8x32xbf16, #tpu.memory_space<vmem>>, vector<1x8x32xbf16>
    %74 = vector.shape_cast %73 : vector<1x8x32xbf16> to vector<8x32xbf16>
    %cst_62 = arith.constant dense<0.000000e+00> : vector<16x32xf32>
    %75 = tpu.matmul %72, %74, %cst_62 {dimension_numbers = #tpu.dot_dimension_numbers<[1], [0], [0], [1], [0, 0, 1, 1], [], []>} : vector<16x8xbf16>, vector<8x32xbf16>, vector<16x32xf32> -> vector<16x32xf32>
    %76 = arith.addf %66, %75 : vector<16x32xf32>
    %c8 = arith.constant 8 : index
    %c0_63 = arith.constant 0 : index
    %77 = vector.load %arg13[%c8, %c0_63] : memref<26x8xf32, #tpu.memory_space<vmem>>, vector<16x8xf32>
    %c0_64 = arith.constant 0 : index
    %c0_65 = arith.constant 0 : index
    %c0_66 = arith.constant 0 : index
    %78 = vector.load %arg8[%c0_64, %c0_65, %c0_66] : memref<2x16x1xf32, #tpu.memory_space<vmem>>, vector<1x16x1xf32>
    %79 = vector.shape_cast %78 : vector<1x16x1xf32> to vector<16x1xf32>
    %80 = vector.broadcast %79 : vector<16x1xf32> to vector<16x8xf32>
    %81 = arith.mulf %77, %80 : vector<16x8xf32>
    %82 = arith.truncf %81 : vector<16x8xf32> to vector<16x8xbf16>
    %c6_67 = arith.constant 6 : index
    %c0_68 = arith.constant 0 : index
    %c0_69 = arith.constant 0 : index
    %83 = vector.load %arg5[%c6_67, %c0_68, %c0_69] : memref<9x8x32xbf16, #tpu.memory_space<vmem>>, vector<1x8x32xbf16>
    %84 = vector.shape_cast %83 : vector<1x8x32xbf16> to vector<8x32xbf16>
    %cst_70 = arith.constant dense<0.000000e+00> : vector<16x32xf32>
    %85 = tpu.matmul %82, %84, %cst_70 {dimension_numbers = #tpu.dot_dimension_numbers<[1], [0], [0], [1], [0, 0, 1, 1], [], []>} : vector<16x8xbf16>, vector<8x32xbf16>, vector<16x32xf32> -> vector<16x32xf32>
    %86 = arith.addf %76, %85 : vector<16x32xf32>
    %c9 = arith.constant 9 : index
    %c0_71 = arith.constant 0 : index
    %87 = vector.load %arg13[%c9, %c0_71] : memref<26x8xf32, #tpu.memory_space<vmem>>, vector<16x8xf32>
    %88 = arith.truncf %87 : vector<16x8xf32> to vector<16x8xbf16>
    %c7 = arith.constant 7 : index
    %c0_72 = arith.constant 0 : index
    %c0_73 = arith.constant 0 : index
    %89 = vector.load %arg5[%c7, %c0_72, %c0_73] : memref<9x8x32xbf16, #tpu.memory_space<vmem>>, vector<1x8x32xbf16>
    %90 = vector.shape_cast %89 : vector<1x8x32xbf16> to vector<8x32xbf16>
    %cst_74 = arith.constant dense<0.000000e+00> : vector<16x32xf32>
    %91 = tpu.matmul %88, %90, %cst_74 {dimension_numbers = #tpu.dot_dimension_numbers<[1], [0], [0], [1], [0, 0, 1, 1], [], []>} : vector<16x8xbf16>, vector<8x32xbf16>, vector<16x32xf32> -> vector<16x32xf32>
    %92 = arith.addf %86, %91 : vector<16x32xf32>
    %c10 = arith.constant 10 : index
    %c0_75 = arith.constant 0 : index
    %93 = vector.load %arg13[%c10, %c0_75] : memref<26x8xf32, #tpu.memory_space<vmem>>, vector<16x8xf32>
    %c1_76 = arith.constant 1 : index
    %c0_77 = arith.constant 0 : index
    %c0_78 = arith.constant 0 : index
    %94 = vector.load %arg8[%c1_76, %c0_77, %c0_78] : memref<2x16x1xf32, #tpu.memory_space<vmem>>, vector<1x16x1xf32>
    %95 = vector.shape_cast %94 : vector<1x16x1xf32> to vector<16x1xf32>
    %96 = vector.broadcast %95 : vector<16x1xf32> to vector<16x8xf32>
    %97 = arith.mulf %93, %96 : vector<16x8xf32>
    %98 = arith.truncf %97 : vector<16x8xf32> to vector<16x8xbf16>
    %c8_79 = arith.constant 8 : index
    %c0_80 = arith.constant 0 : index
    %c0_81 = arith.constant 0 : index
    %99 = vector.load %arg5[%c8_79, %c0_80, %c0_81] : memref<9x8x32xbf16, #tpu.memory_space<vmem>>, vector<1x8x32xbf16>
    %100 = vector.shape_cast %99 : vector<1x8x32xbf16> to vector<8x32xbf16>
    %cst_82 = arith.constant dense<0.000000e+00> : vector<16x32xf32>
    %101 = tpu.matmul %98, %100, %cst_82 {dimension_numbers = #tpu.dot_dimension_numbers<[1], [0], [0], [1], [0, 0, 1, 1], [], []>} : vector<16x8xbf16>, vector<8x32xbf16>, vector<16x32xf32> -> vector<16x32xf32>
    %102 = arith.addf %92, %101 : vector<16x32xf32>
    %c0_83 = arith.constant 0 : index
    %c0_84 = arith.constant 0 : index
    %103 = vector.load %arg6[%c0_83, %c0_84] : memref<1x32xf32, #tpu.memory_space<vmem>>, vector<1x32xf32>
    %104 = vector.broadcast %103 : vector<1x32xf32> to vector<16x32xf32>
    %105 = arith.mulf %102, %104 : vector<16x32xf32>
    %c0_85 = arith.constant 0 : index
    %c0_86 = arith.constant 0 : index
    %106 = vector.load %arg7[%c0_85, %c0_86] : memref<1x32xf32, #tpu.memory_space<vmem>>, vector<1x32xf32>
    %107 = vector.broadcast %106 : vector<1x32xf32> to vector<16x32xf32>
    %108 = arith.addf %105, %107 : vector<16x32xf32>
    %cst_87 = arith.constant 0.000000e+00 : f32
    %109 = vector.broadcast %cst_87 : f32 to vector<16x32xf32>
    %110 = arith.maximumf %108, %109 : vector<16x32xf32>
    %111 = arith.addf %110, %22 : vector<16x32xf32>
    %c0_88 = arith.constant 0 : index
    %c0_89 = arith.constant 0 : index
    %c0_90 = arith.constant 0 : index
    %112 = vector.load %arg12[%c0_88, %c0_89, %c0_90] : memref<1x16x32xf32, #tpu.memory_space<vmem>>, vector<1x16x32xf32>
    %113 = vector.shape_cast %112 : vector<1x16x32xf32> to vector<16x32xf32>
    %114 = vector.shape_cast %111 : vector<16x32xf32> to vector<1x16x32xf32>
    tpu.vector_store %arg12[%c0_88, %c0_89, %c0_90], %114 {strides = array<i32>} : memref<1x16x32xf32, #tpu.memory_space<vmem>>, vector<1x16x32xf32>,
    return
  }
  func.func @transform_0(%arg0: i32) -> (i32, i32, i32) {
    %c0_i32 = arith.constant 0 : i32
    %c0_i32_0 = arith.constant 0 : i32
    %c0_i32_1 = arith.constant 0 : i32
    return %arg0, %c0_i32, %c0_i32_0 : i32, i32, i32
  }
  func.func @transform_1(%arg0: i32) -> (i32, i32) {
    %c0_i32 = arith.constant 0 : i32
    %c0_i32_0 = arith.constant 0 : i32
    %c0_i32_1 = arith.constant 0 : i32
    return %c0_i32, %c0_i32_0 : i32, i32
  }
  func.func @transform_2(%arg0: i32) -> (i32, i32) {
    %c0_i32 = arith.constant 0 : i32
    %c0_i32_0 = arith.constant 0 : i32
    %c0_i32_1 = arith.constant 0 : i32
    return %c0_i32, %c0_i32_0 : i32, i32
  }
  func.func @transform_3(%arg0: i32) -> (i32, i32) {
    %c0_i32 = arith.constant 0 : i32
    %c0_i32_0 = arith.constant 0 : i32
    %c0_i32_1 = arith.constant 0 : i32
    return %c0_i32, %c0_i32_0 : i32, i32
  }
  func.func @transform_4(%arg0: i32) -> (i32, i32, i32) {
    %c0_i32 = arith.constant 0 : i32
    %c0_i32_0 = arith.constant 0 : i32
    %c0_i32_1 = arith.constant 0 : i32
    %c0_i32_2 = arith.constant 0 : i32
    return %c0_i32, %c0_i32_0, %c0_i32_1 : i32, i32, i32
  }
  func.func @transform_5(%arg0: i32) -> (i32, i32) {
    %c0_i32 = arith.constant 0 : i32
    %c0_i32_0 = arith.constant 0 : i32
    %c0_i32_1 = arith.constant 0 : i32
    return %c0_i32, %c0_i32_0 : i32, i32
  }
  func.func @transform_6(%arg0: i32) -> (i32, i32) {
    %c0_i32 = arith.constant 0 : i32
    %c0_i32_0 = arith.constant 0 : i32
    %c0_i32_1 = arith.constant 0 : i32
    return %c0_i32, %c0_i32_0 : i32, i32
  }
  func.func @transform_7(%arg0: i32) -> (i32, i32, i32) {
    %c0_i32 = arith.constant 0 : i32
    %c0_i32_0 = arith.constant 0 : i32
    %c0_i32_1 = arith.constant 0 : i32
    %c0_i32_2 = arith.constant 0 : i32
    return %c0_i32, %c0_i32_0, %c0_i32_1 : i32, i32, i32
  }
  func.func @transform_8(%arg0: i32) -> (i32, i32) {
    %c0_i32 = arith.constant 0 : i32
    %c0_i32_0 = arith.constant 0 : i32
    %c0_i32_1 = arith.constant 0 : i32
    return %c0_i32, %c0_i32_0 : i32, i32
  }
  func.func @transform_9(%arg0: i32) -> (i32, i32) {
    %c0_i32 = arith.constant 0 : i32
    %c0_i32_0 = arith.constant 0 : i32
    %c0_i32_1 = arith.constant 0 : i32
    return %c0_i32, %c0_i32_0 : i32, i32
  }
  func.func @transform_10(%arg0: i32) -> (i32, i32) {
    %c0_i32 = arith.constant 0 : i32
    %c0_i32_0 = arith.constant 0 : i32
    %c0_i32_1 = arith.constant 0 : i32
    return %c0_i32, %c0_i32_0 : i32, i32
  }
  func.func @transform_11(%arg0: i32) -> (i32, i32, i32) {
    %c0_i32 = arith.constant 0 : i32
    %c0_i32_0 = arith.constant 0 : i32
    %c0_i32_1 = arith.constant 0 : i32
    return %arg0, %c0_i32, %c0_i32_0 : i32, i32, i32
  }
}

module attributes {stable_mosaic.version = 11 : i64} {
  func.func @kernel(%arg0: i32, %arg1: memref<1x4x4x32xf32, #tpu.memory_space<vmem>>, %arg2: memref<1x2x2x32xf32, #tpu.memory_space<vmem>>, %arg3: memref<6x6x32xf32, #tpu.memory_space<vmem>>) attributes {dimension_semantics = [#tpu.dimension_semantics<parallel>], iteration_bounds = array<i64: 2>, scalar_prefetch = 0 : i64, scratch_operands = 1 : i64, tpu.core_type = #tpu.core_type<tc>, window_params = [{transform_indices = @transform_0, window_bounds = array<i64: 1, 4, 4, 32>}, {transform_indices = @transform_1, window_bounds = array<i64: 1, 2, 2, 32>}]} {
    %cst = arith.constant 0xFF800000 : f32
    %0 = vector.broadcast %cst : f32 to vector<6x6x32xf32>
    %c0 = arith.constant 0 : index
    %c0_0 = arith.constant 0 : index
    %c0_1 = arith.constant 0 : index
    %1 = vector.load %arg3[%c0, %c0_0, %c0_1] : memref<6x6x32xf32, #tpu.memory_space<vmem>>, vector<6x6x32xf32>
    tpu.vector_store %arg3[%c0, %c0_0, %c0_1], %0 {strides = array<i32>} : memref<6x6x32xf32, #tpu.memory_space<vmem>>, vector<6x6x32xf32>,
    %c0_2 = arith.constant 0 : index
    %c0_3 = arith.constant 0 : index
    %c0_4 = arith.constant 0 : index
    %c0_5 = arith.constant 0 : index
    %2 = vector.load %arg1[%c0_2, %c0_3, %c0_4, %c0_5] : memref<1x4x4x32xf32, #tpu.memory_space<vmem>>, vector<1x4x4x32xf32>
    %3 = vector.shape_cast %2 : vector<1x4x4x32xf32> to vector<4x4x32xf32>
    %c1 = arith.constant 1 : index
    %c1_6 = arith.constant 1 : index
    %c0_7 = arith.constant 0 : index
    %4 = vector.load %arg3[%c1, %c1_6, %c0_7] : memref<6x6x32xf32, #tpu.memory_space<vmem>>, vector<4x4x32xf32>
    tpu.vector_store %arg3[%c1, %c1_6, %c0_7], %3 {strides = array<i32>} : memref<6x6x32xf32, #tpu.memory_space<vmem>>, vector<4x4x32xf32>,
    %c0_8 = arith.constant 0 : index
    %c0_9 = arith.constant 0 : index
    %c0_10 = arith.constant 0 : index
    %5 = tpu.strided_load %arg3[%c0_8, %c0_9, %c0_10] {strides = array<i32: 2, 2, 1>} : memref<6x6x32xf32, #tpu.memory_space<vmem>>, vector<2x2x32xf32>
    %c0_11 = arith.constant 0 : index
    %c1_12 = arith.constant 1 : index
    %c0_13 = arith.constant 0 : index
    %6 = tpu.strided_load %arg3[%c0_11, %c1_12, %c0_13] {strides = array<i32: 2, 2, 1>} : memref<6x6x32xf32, #tpu.memory_space<vmem>>, vector<2x2x32xf32>
    %7 = arith.maximumf %5, %6 : vector<2x2x32xf32>
    %c0_14 = arith.constant 0 : index
    %c2 = arith.constant 2 : index
    %c0_15 = arith.constant 0 : index
    %8 = tpu.strided_load %arg3[%c0_14, %c2, %c0_15] {strides = array<i32: 2, 2, 1>} : memref<6x6x32xf32, #tpu.memory_space<vmem>>, vector<2x2x32xf32>
    %9 = arith.maximumf %7, %8 : vector<2x2x32xf32>
    %c1_16 = arith.constant 1 : index
    %c0_17 = arith.constant 0 : index
    %c0_18 = arith.constant 0 : index
    %10 = tpu.strided_load %arg3[%c1_16, %c0_17, %c0_18] {strides = array<i32: 2, 2, 1>} : memref<6x6x32xf32, #tpu.memory_space<vmem>>, vector<2x2x32xf32>
    %11 = arith.maximumf %9, %10 : vector<2x2x32xf32>
    %c1_19 = arith.constant 1 : index
    %c1_20 = arith.constant 1 : index
    %c0_21 = arith.constant 0 : index
    %12 = tpu.strided_load %arg3[%c1_19, %c1_20, %c0_21] {strides = array<i32: 2, 2, 1>} : memref<6x6x32xf32, #tpu.memory_space<vmem>>, vector<2x2x32xf32>
    %13 = arith.maximumf %11, %12 : vector<2x2x32xf32>
    %c1_22 = arith.constant 1 : index
    %c2_23 = arith.constant 2 : index
    %c0_24 = arith.constant 0 : index
    %14 = tpu.strided_load %arg3[%c1_22, %c2_23, %c0_24] {strides = array<i32: 2, 2, 1>} : memref<6x6x32xf32, #tpu.memory_space<vmem>>, vector<2x2x32xf32>
    %15 = arith.maximumf %13, %14 : vector<2x2x32xf32>
    %c2_25 = arith.constant 2 : index
    %c0_26 = arith.constant 0 : index
    %c0_27 = arith.constant 0 : index
    %16 = tpu.strided_load %arg3[%c2_25, %c0_26, %c0_27] {strides = array<i32: 2, 2, 1>} : memref<6x6x32xf32, #tpu.memory_space<vmem>>, vector<2x2x32xf32>
    %17 = arith.maximumf %15, %16 : vector<2x2x32xf32>
    %c2_28 = arith.constant 2 : index
    %c1_29 = arith.constant 1 : index
    %c0_30 = arith.constant 0 : index
    %18 = tpu.strided_load %arg3[%c2_28, %c1_29, %c0_30] {strides = array<i32: 2, 2, 1>} : memref<6x6x32xf32, #tpu.memory_space<vmem>>, vector<2x2x32xf32>
    %19 = arith.maximumf %17, %18 : vector<2x2x32xf32>
    %c2_31 = arith.constant 2 : index
    %c2_32 = arith.constant 2 : index
    %c0_33 = arith.constant 0 : index
    %20 = tpu.strided_load %arg3[%c2_31, %c2_32, %c0_33] {strides = array<i32: 2, 2, 1>} : memref<6x6x32xf32, #tpu.memory_space<vmem>>, vector<2x2x32xf32>
    %21 = arith.maximumf %19, %20 : vector<2x2x32xf32>
    %c0_34 = arith.constant 0 : index
    %c0_35 = arith.constant 0 : index
    %c0_36 = arith.constant 0 : index
    %c0_37 = arith.constant 0 : index
    %22 = vector.load %arg2[%c0_34, %c0_35, %c0_36, %c0_37] : memref<1x2x2x32xf32, #tpu.memory_space<vmem>>, vector<1x2x2x32xf32>
    %23 = vector.shape_cast %22 : vector<1x2x2x32xf32> to vector<2x2x32xf32>
    %24 = vector.shape_cast %21 : vector<2x2x32xf32> to vector<1x2x2x32xf32>
    tpu.vector_store %arg2[%c0_34, %c0_35, %c0_36, %c0_37], %24 {strides = array<i32>} : memref<1x2x2x32xf32, #tpu.memory_space<vmem>>, vector<1x2x2x32xf32>,
    return
  }
  func.func @transform_0(%arg0: i32) -> (i32, i32, i32, i32) {
    %c0_i32 = arith.constant 0 : i32
    %c0_i32_0 = arith.constant 0 : i32
    %c0_i32_1 = arith.constant 0 : i32
    %c0_i32_2 = arith.constant 0 : i32
    return %arg0, %c0_i32, %c0_i32_0, %c0_i32_1 : i32, i32, i32, i32
  }
  func.func @transform_1(%arg0: i32) -> (i32, i32, i32, i32) {
    %c0_i32 = arith.constant 0 : i32
    %c0_i32_0 = arith.constant 0 : i32
    %c0_i32_1 = arith.constant 0 : i32
    %c0_i32_2 = arith.constant 0 : i32
    return %arg0, %c0_i32, %c0_i32_0, %c0_i32_1 : i32, i32, i32, i32
  }
}

module attributes {stable_mosaic.version = 11 : i64} {
  func.func @kernel(%arg0: i32, %arg1: memref<1x4x32xf32, #tpu.memory_space<vmem>>, %arg2: memref<32x8xbf16, #tpu.memory_space<vmem>>, %arg3: memref<1x8xf32, #tpu.memory_space<vmem>>, %arg4: memref<1x8xf32, #tpu.memory_space<vmem>>, %arg5: memref<9x8x32xbf16, #tpu.memory_space<vmem>>, %arg6: memref<1x32xf32, #tpu.memory_space<vmem>>, %arg7: memref<1x32xf32, #tpu.memory_space<vmem>>, %arg8: memref<2x4x1xf32, #tpu.memory_space<vmem>>, %arg9: memref<1x4x32xf32, #tpu.memory_space<vmem>>, %arg10: memref<10x8xf32, #tpu.memory_space<vmem>>) attributes {dimension_semantics = [#tpu.dimension_semantics<parallel>], iteration_bounds = array<i64: 2>, scalar_prefetch = 0 : i64, scratch_operands = 1 : i64, tpu.core_type = #tpu.core_type<tc>, window_params = [{transform_indices = @transform_0, window_bounds = array<i64: 1, 4, 32>}, {pipeline_mode = #tpu.pipeline_mode<synchronous>, transform_indices = @transform_1, window_bounds = array<i64: 32, 8>}, {pipeline_mode = #tpu.pipeline_mode<synchronous>, transform_indices = @transform_2, window_bounds = array<i64: 1, 8>}, {pipeline_mode = #tpu.pipeline_mode<synchronous>, transform_indices = @transform_3, window_bounds = array<i64: 1, 8>}, {pipeline_mode = #tpu.pipeline_mode<synchronous>, transform_indices = @transform_4, window_bounds = array<i64: 9, 8, 32>}, {pipeline_mode = #tpu.pipeline_mode<synchronous>, transform_indices = @transform_5, window_bounds = array<i64: 1, 32>}, {pipeline_mode = #tpu.pipeline_mode<synchronous>, transform_indices = @transform_6, window_bounds = array<i64: 1, 32>}, {pipeline_mode = #tpu.pipeline_mode<synchronous>, transform_indices = @transform_7, window_bounds = array<i64: 2, 4, 1>}, {transform_indices = @transform_8, window_bounds = array<i64: 1, 4, 32>}]} {
    %c0 = arith.constant 0 : index
    %c0_0 = arith.constant 0 : index
    %c0_1 = arith.constant 0 : index
    %0 = vector.load %arg1[%c0, %c0_0, %c0_1] : memref<1x4x32xf32, #tpu.memory_space<vmem>>, vector<1x4x32xf32>
    %1 = vector.shape_cast %0 : vector<1x4x32xf32> to vector<4x32xf32>
    %2 = arith.truncf %1 : vector<4x32xf32> to vector<4x32xbf16>
    %c0_2 = arith.constant 0 : index
    %c0_3 = arith.constant 0 : index
    %3 = vector.load %arg2[%c0_2, %c0_3] : memref<32x8xbf16, #tpu.memory_space<vmem>>, vector<32x8xbf16>
    %cst = arith.constant dense<0.000000e+00> : vector<4x8xf32>
    %4 = tpu.matmul %2, %3, %cst {dimension_numbers = #tpu.dot_dimension_numbers<[1], [0], [0], [1], [0, 0, 1, 1], [], []>} : vector<4x32xbf16>, vector<32x8xbf16>, vector<4x8xf32> -> vector<4x8xf32>
    %c0_4 = arith.constant 0 : index
    %c0_5 = arith.constant 0 : index
    %5 = vector.load %arg3[%c0_4, %c0_5] : memref<1x8xf32, #tpu.memory_space<vmem>>, vector<1x8xf32>
    %6 = vector.broadcast %5 : vector<1x8xf32> to vector<4x8xf32>
    %7 = arith.mulf %4, %6 : vector<4x8xf32>
    %c0_6 = arith.constant 0 : index
    %c0_7 = arith.constant 0 : index
    %8 = vector.load %arg4[%c0_6, %c0_7] : memref<1x8xf32, #tpu.memory_space<vmem>>, vector<1x8xf32>
    %9 = vector.broadcast %8 : vector<1x8xf32> to vector<4x8xf32>
    %10 = arith.addf %7, %9 : vector<4x8xf32>
    %cst_8 = arith.constant 0.000000e+00 : f32
    %11 = vector.broadcast %cst_8 : f32 to vector<4x8xf32>
    %12 = arith.maximumf %10, %11 : vector<4x8xf32>
    %cst_9 = arith.constant 0.000000e+00 : f32
    %13 = vector.broadcast %cst_9 : f32 to vector<3x8xf32>
    %c0_10 = arith.constant 0 : index
    %c0_11 = arith.constant 0 : index
    %14 = vector.load %arg10[%c0_10, %c0_11] : memref<10x8xf32, #tpu.memory_space<vmem>>, vector<3x8xf32>
    tpu.vector_store %arg10[%c0_10, %c0_11], %13 {strides = array<i32>} : memref<10x8xf32, #tpu.memory_space<vmem>>, vector<3x8xf32>,
    %c7 = arith.constant 7 : index
    %c0_12 = arith.constant 0 : index
    %15 = vector.load %arg10[%c7, %c0_12] : memref<10x8xf32, #tpu.memory_space<vmem>>, vector<3x8xf32>
    tpu.vector_store %arg10[%c7, %c0_12], %13 {strides = array<i32>} : memref<10x8xf32, #tpu.memory_space<vmem>>, vector<3x8xf32>,
    %c3 = arith.constant 3 : index
    %c0_13 = arith.constant 0 : index
    %16 = vector.load %arg10[%c3, %c0_13] : memref<10x8xf32, #tpu.memory_space<vmem>>, vector<4x8xf32>
    tpu.vector_store %arg10[%c3, %c0_13], %12 {strides = array<i32>} : memref<10x8xf32, #tpu.memory_space<vmem>>, vector<4x8xf32>,
    %17 = arith.truncf %12 : vector<4x8xf32> to vector<4x8xbf16>
    %c4 = arith.constant 4 : index
    %c0_14 = arith.constant 0 : index
    %c0_15 = arith.constant 0 : index
    %18 = vector.load %arg5[%c4, %c0_14, %c0_15] : memref<9x8x32xbf16, #tpu.memory_space<vmem>>, vector<1x8x32xbf16>
    %19 = vector.shape_cast %18 : vector<1x8x32xbf16> to vector<8x32xbf16>
    %cst_16 = arith.constant dense<0.000000e+00> : vector<4x32xf32>
    %20 = tpu.matmul %17, %19, %cst_16 {dimension_numbers = #tpu.dot_dimension_numbers<[1], [0], [0], [1], [0, 0, 1, 1], [], []>} : vector<4x8xbf16>, vector<8x32xbf16>, vector<4x32xf32> -> vector<4x32xf32>
    %c0_17 = arith.constant 0 : index
    %c0_18 = arith.constant 0 : index
    %21 = vector.load %arg10[%c0_17, %c0_18] : memref<10x8xf32, #tpu.memory_space<vmem>>, vector<4x8xf32>
    %c0_19 = arith.constant 0 : index
    %c0_20 = arith.constant 0 : index
    %c0_21 = arith.constant 0 : index
    %22 = vector.load %arg8[%c0_19, %c0_20, %c0_21] : memref<2x4x1xf32, #tpu.memory_space<vmem>>, vector<1x4x1xf32>
    %23 = vector.shape_cast %22 : vector<1x4x1xf32> to vector<4x1xf32>
    %24 = vector.broadcast %23 : vector<4x1xf32> to vector<4x8xf32>
    %25 = arith.mulf %21, %24 : vector<4x8xf32>
    %26 = arith.truncf %25 : vector<4x8xf32> to vector<4x8xbf16>
    %c0_22 = arith.constant 0 : index
    %c0_23 = arith.constant 0 : index
    %c0_24 = arith.constant 0 : index
    %27 = vector.load %arg5[%c0_22, %c0_23, %c0_24] : memref<9x8x32xbf16, #tpu.memory_space<vmem>>, vector<1x8x32xbf16>
    %28 = vector.shape_cast %27 : vector<1x8x32xbf16> to vector<8x32xbf16>
    %cst_25 = arith.constant dense<0.000000e+00> : vector<4x32xf32>
    %29 = tpu.matmul %26, %28, %cst_25 {dimension_numbers = #tpu.dot_dimension_numbers<[1], [0], [0], [1], [0, 0, 1, 1], [], []>} : vector<4x8xbf16>, vector<8x32xbf16>, vector<4x32xf32> -> vector<4x32xf32>
    %30 = arith.addf %20, %29 : vector<4x32xf32>
    %c1 = arith.constant 1 : index
    %c0_26 = arith.constant 0 : index
    %31 = vector.load %arg10[%c1, %c0_26] : memref<10x8xf32, #tpu.memory_space<vmem>>, vector<4x8xf32>
    %32 = arith.truncf %31 : vector<4x8xf32> to vector<4x8xbf16>
    %c1_27 = arith.constant 1 : index
    %c0_28 = arith.constant 0 : index
    %c0_29 = arith.constant 0 : index
    %33 = vector.load %arg5[%c1_27, %c0_28, %c0_29] : memref<9x8x32xbf16, #tpu.memory_space<vmem>>, vector<1x8x32xbf16>
    %34 = vector.shape_cast %33 : vector<1x8x32xbf16> to vector<8x32xbf16>
    %cst_30 = arith.constant dense<0.000000e+00> : vector<4x32xf32>
    %35 = tpu.matmul %32, %34, %cst_30 {dimension_numbers = #tpu.dot_dimension_numbers<[1], [0], [0], [1], [0, 0, 1, 1], [], []>} : vector<4x8xbf16>, vector<8x32xbf16>, vector<4x32xf32> -> vector<4x32xf32>
    %36 = arith.addf %30, %35 : vector<4x32xf32>
    %c2 = arith.constant 2 : index
    %c0_31 = arith.constant 0 : index
    %37 = vector.load %arg10[%c2, %c0_31] : memref<10x8xf32, #tpu.memory_space<vmem>>, vector<4x8xf32>
    %c1_32 = arith.constant 1 : index
    %c0_33 = arith.constant 0 : index
    %c0_34 = arith.constant 0 : index
    %38 = vector.load %arg8[%c1_32, %c0_33, %c0_34] : memref<2x4x1xf32, #tpu.memory_space<vmem>>, vector<1x4x1xf32>
    %39 = vector.shape_cast %38 : vector<1x4x1xf32> to vector<4x1xf32>
    %40 = vector.broadcast %39 : vector<4x1xf32> to vector<4x8xf32>
    %41 = arith.mulf %37, %40 : vector<4x8xf32>
    %42 = arith.truncf %41 : vector<4x8xf32> to vector<4x8xbf16>
    %c2_35 = arith.constant 2 : index
    %c0_36 = arith.constant 0 : index
    %c0_37 = arith.constant 0 : index
    %43 = vector.load %arg5[%c2_35, %c0_36, %c0_37] : memref<9x8x32xbf16, #tpu.memory_space<vmem>>, vector<1x8x32xbf16>
    %44 = vector.shape_cast %43 : vector<1x8x32xbf16> to vector<8x32xbf16>
    %cst_38 = arith.constant dense<0.000000e+00> : vector<4x32xf32>
    %45 = tpu.matmul %42, %44, %cst_38 {dimension_numbers = #tpu.dot_dimension_numbers<[1], [0], [0], [1], [0, 0, 1, 1], [], []>} : vector<4x8xbf16>, vector<8x32xbf16>, vector<4x32xf32> -> vector<4x32xf32>
    %46 = arith.addf %36, %45 : vector<4x32xf32>
    %c2_39 = arith.constant 2 : index
    %c0_40 = arith.constant 0 : index
    %47 = vector.load %arg10[%c2_39, %c0_40] : memref<10x8xf32, #tpu.memory_space<vmem>>, vector<4x8xf32>
    %c0_41 = arith.constant 0 : index
    %c0_42 = arith.constant 0 : index
    %c0_43 = arith.constant 0 : index
    %48 = vector.load %arg8[%c0_41, %c0_42, %c0_43] : memref<2x4x1xf32, #tpu.memory_space<vmem>>, vector<1x4x1xf32>
    %49 = vector.shape_cast %48 : vector<1x4x1xf32> to vector<4x1xf32>
    %50 = vector.broadcast %49 : vector<4x1xf32> to vector<4x8xf32>
    %51 = arith.mulf %47, %50 : vector<4x8xf32>
    %52 = arith.truncf %51 : vector<4x8xf32> to vector<4x8xbf16>
    %c3_44 = arith.constant 3 : index
    %c0_45 = arith.constant 0 : index
    %c0_46 = arith.constant 0 : index
    %53 = vector.load %arg5[%c3_44, %c0_45, %c0_46] : memref<9x8x32xbf16, #tpu.memory_space<vmem>>, vector<1x8x32xbf16>
    %54 = vector.shape_cast %53 : vector<1x8x32xbf16> to vector<8x32xbf16>
    %cst_47 = arith.constant dense<0.000000e+00> : vector<4x32xf32>
    %55 = tpu.matmul %52, %54, %cst_47 {dimension_numbers = #tpu.dot_dimension_numbers<[1], [0], [0], [1], [0, 0, 1, 1], [], []>} : vector<4x8xbf16>, vector<8x32xbf16>, vector<4x32xf32> -> vector<4x32xf32>
    %56 = arith.addf %46, %55 : vector<4x32xf32>
    %c4_48 = arith.constant 4 : index
    %c0_49 = arith.constant 0 : index
    %57 = vector.load %arg10[%c4_48, %c0_49] : memref<10x8xf32, #tpu.memory_space<vmem>>, vector<4x8xf32>
    %c1_50 = arith.constant 1 : index
    %c0_51 = arith.constant 0 : index
    %c0_52 = arith.constant 0 : index
    %58 = vector.load %arg8[%c1_50, %c0_51, %c0_52] : memref<2x4x1xf32, #tpu.memory_space<vmem>>, vector<1x4x1xf32>
    %59 = vector.shape_cast %58 : vector<1x4x1xf32> to vector<4x1xf32>
    %60 = vector.broadcast %59 : vector<4x1xf32> to vector<4x8xf32>
    %61 = arith.mulf %57, %60 : vector<4x8xf32>
    %62 = arith.truncf %61 : vector<4x8xf32> to vector<4x8xbf16>
    %c5 = arith.constant 5 : index
    %c0_53 = arith.constant 0 : index
    %c0_54 = arith.constant 0 : index
    %63 = vector.load %arg5[%c5, %c0_53, %c0_54] : memref<9x8x32xbf16, #tpu.memory_space<vmem>>, vector<1x8x32xbf16>
    %64 = vector.shape_cast %63 : vector<1x8x32xbf16> to vector<8x32xbf16>
    %cst_55 = arith.constant dense<0.000000e+00> : vector<4x32xf32>
    %65 = tpu.matmul %62, %64, %cst_55 {dimension_numbers = #tpu.dot_dimension_numbers<[1], [0], [0], [1], [0, 0, 1, 1], [], []>} : vector<4x8xbf16>, vector<8x32xbf16>, vector<4x32xf32> -> vector<4x32xf32>
    %66 = arith.addf %56, %65 : vector<4x32xf32>
    %c4_56 = arith.constant 4 : index
    %c0_57 = arith.constant 0 : index
    %67 = vector.load %arg10[%c4_56, %c0_57] : memref<10x8xf32, #tpu.memory_space<vmem>>, vector<4x8xf32>
    %c0_58 = arith.constant 0 : index
    %c0_59 = arith.constant 0 : index
    %c0_60 = arith.constant 0 : index
    %68 = vector.load %arg8[%c0_58, %c0_59, %c0_60] : memref<2x4x1xf32, #tpu.memory_space<vmem>>, vector<1x4x1xf32>
    %69 = vector.shape_cast %68 : vector<1x4x1xf32> to vector<4x1xf32>
    %70 = vector.broadcast %69 : vector<4x1xf32> to vector<4x8xf32>
    %71 = arith.mulf %67, %70 : vector<4x8xf32>
    %72 = arith.truncf %71 : vector<4x8xf32> to vector<4x8xbf16>
    %c6 = arith.constant 6 : index
    %c0_61 = arith.constant 0 : index
    %c0_62 = arith.constant 0 : index
    %73 = vector.load %arg5[%c6, %c0_61, %c0_62] : memref<9x8x32xbf16, #tpu.memory_space<vmem>>, vector<1x8x32xbf16>
    %74 = vector.shape_cast %73 : vector<1x8x32xbf16> to vector<8x32xbf16>
    %cst_63 = arith.constant dense<0.000000e+00> : vector<4x32xf32>
    %75 = tpu.matmul %72, %74, %cst_63 {dimension_numbers = #tpu.dot_dimension_numbers<[1], [0], [0], [1], [0, 0, 1, 1], [], []>} : vector<4x8xbf16>, vector<8x32xbf16>, vector<4x32xf32> -> vector<4x32xf32>
    %76 = arith.addf %66, %75 : vector<4x32xf32>
    %c5_64 = arith.constant 5 : index
    %c0_65 = arith.constant 0 : index
    %77 = vector.load %arg10[%c5_64, %c0_65] : memref<10x8xf32, #tpu.memory_space<vmem>>, vector<4x8xf32>
    %78 = arith.truncf %77 : vector<4x8xf32> to vector<4x8xbf16>
    %c7_66 = arith.constant 7 : index
    %c0_67 = arith.constant 0 : index
    %c0_68 = arith.constant 0 : index
    %79 = vector.load %arg5[%c7_66, %c0_67, %c0_68] : memref<9x8x32xbf16, #tpu.memory_space<vmem>>, vector<1x8x32xbf16>
    %80 = vector.shape_cast %79 : vector<1x8x32xbf16> to vector<8x32xbf16>
    %cst_69 = arith.constant dense<0.000000e+00> : vector<4x32xf32>
    %81 = tpu.matmul %78, %80, %cst_69 {dimension_numbers = #tpu.dot_dimension_numbers<[1], [0], [0], [1], [0, 0, 1, 1], [], []>} : vector<4x8xbf16>, vector<8x32xbf16>, vector<4x32xf32> -> vector<4x32xf32>
    %82 = arith.addf %76, %81 : vector<4x32xf32>
    %c6_70 = arith.constant 6 : index
    %c0_71 = arith.constant 0 : index
    %83 = vector.load %arg10[%c6_70, %c0_71] : memref<10x8xf32, #tpu.memory_space<vmem>>, vector<4x8xf32>
    %c1_72 = arith.constant 1 : index
    %c0_73 = arith.constant 0 : index
    %c0_74 = arith.constant 0 : index
    %84 = vector.load %arg8[%c1_72, %c0_73, %c0_74] : memref<2x4x1xf32, #tpu.memory_space<vmem>>, vector<1x4x1xf32>
    %85 = vector.shape_cast %84 : vector<1x4x1xf32> to vector<4x1xf32>
    %86 = vector.broadcast %85 : vector<4x1xf32> to vector<4x8xf32>
    %87 = arith.mulf %83, %86 : vector<4x8xf32>
    %88 = arith.truncf %87 : vector<4x8xf32> to vector<4x8xbf16>
    %c8 = arith.constant 8 : index
    %c0_75 = arith.constant 0 : index
    %c0_76 = arith.constant 0 : index
    %89 = vector.load %arg5[%c8, %c0_75, %c0_76] : memref<9x8x32xbf16, #tpu.memory_space<vmem>>, vector<1x8x32xbf16>
    %90 = vector.shape_cast %89 : vector<1x8x32xbf16> to vector<8x32xbf16>
    %cst_77 = arith.constant dense<0.000000e+00> : vector<4x32xf32>
    %91 = tpu.matmul %88, %90, %cst_77 {dimension_numbers = #tpu.dot_dimension_numbers<[1], [0], [0], [1], [0, 0, 1, 1], [], []>} : vector<4x8xbf16>, vector<8x32xbf16>, vector<4x32xf32> -> vector<4x32xf32>
    %92 = arith.addf %82, %91 : vector<4x32xf32>
    %c0_78 = arith.constant 0 : index
    %c0_79 = arith.constant 0 : index
    %93 = vector.load %arg6[%c0_78, %c0_79] : memref<1x32xf32, #tpu.memory_space<vmem>>, vector<1x32xf32>
    %94 = vector.broadcast %93 : vector<1x32xf32> to vector<4x32xf32>
    %95 = arith.mulf %92, %94 : vector<4x32xf32>
    %c0_80 = arith.constant 0 : index
    %c0_81 = arith.constant 0 : index
    %96 = vector.load %arg7[%c0_80, %c0_81] : memref<1x32xf32, #tpu.memory_space<vmem>>, vector<1x32xf32>
    %97 = vector.broadcast %96 : vector<1x32xf32> to vector<4x32xf32>
    %98 = arith.addf %95, %97 : vector<4x32xf32>
    %cst_82 = arith.constant 0.000000e+00 : f32
    %99 = vector.broadcast %cst_82 : f32 to vector<4x32xf32>
    %100 = arith.maximumf %98, %99 : vector<4x32xf32>
    %101 = arith.addf %100, %1 : vector<4x32xf32>
    %c0_83 = arith.constant 0 : index
    %c0_84 = arith.constant 0 : index
    %c0_85 = arith.constant 0 : index
    %102 = vector.load %arg9[%c0_83, %c0_84, %c0_85] : memref<1x4x32xf32, #tpu.memory_space<vmem>>, vector<1x4x32xf32>
    %103 = vector.shape_cast %102 : vector<1x4x32xf32> to vector<4x32xf32>
    %104 = vector.shape_cast %101 : vector<4x32xf32> to vector<1x4x32xf32>
    tpu.vector_store %arg9[%c0_83, %c0_84, %c0_85], %104 {strides = array<i32>} : memref<1x4x32xf32, #tpu.memory_space<vmem>>, vector<1x4x32xf32>,
    return
  }
  func.func @transform_0(%arg0: i32) -> (i32, i32, i32) {
    %c0_i32 = arith.constant 0 : i32
    %c0_i32_0 = arith.constant 0 : i32
    %c0_i32_1 = arith.constant 0 : i32
    return %arg0, %c0_i32, %c0_i32_0 : i32, i32, i32
  }
  func.func @transform_1(%arg0: i32) -> (i32, i32) {
    %c0_i32 = arith.constant 0 : i32
    %c0_i32_0 = arith.constant 0 : i32
    %c0_i32_1 = arith.constant 0 : i32
    return %c0_i32, %c0_i32_0 : i32, i32
  }
  func.func @transform_2(%arg0: i32) -> (i32, i32) {
    %c0_i32 = arith.constant 0 : i32
    %c0_i32_0 = arith.constant 0 : i32
    %c0_i32_1 = arith.constant 0 : i32
    return %c0_i32, %c0_i32_0 : i32, i32
  }
  func.func @transform_3(%arg0: i32) -> (i32, i32) {
    %c0_i32 = arith.constant 0 : i32
    %c0_i32_0 = arith.constant 0 : i32
    %c0_i32_1 = arith.constant 0 : i32
    return %c0_i32, %c0_i32_0 : i32, i32
  }
  func.func @transform_4(%arg0: i32) -> (i32, i32, i32) {
    %c0_i32 = arith.constant 0 : i32
    %c0_i32_0 = arith.constant 0 : i32
    %c0_i32_1 = arith.constant 0 : i32
    %c0_i32_2 = arith.constant 0 : i32
    return %c0_i32, %c0_i32_0, %c0_i32_1 : i32, i32, i32
  }
  func.func @transform_5(%arg0: i32) -> (i32, i32) {
    %c0_i32 = arith.constant 0 : i32
    %c0_i32_0 = arith.constant 0 : i32
    %c0_i32_1 = arith.constant 0 : i32
    return %c0_i32, %c0_i32_0 : i32, i32
  }
  func.func @transform_6(%arg0: i32) -> (i32, i32) {
    %c0_i32 = arith.constant 0 : i32
    %c0_i32_0 = arith.constant 0 : i32
    %c0_i32_1 = arith.constant 0 : i32
    return %c0_i32, %c0_i32_0 : i32, i32
  }
  func.func @transform_7(%arg0: i32) -> (i32, i32, i32) {
    %c0_i32 = arith.constant 0 : i32
    %c0_i32_0 = arith.constant 0 : i32
    %c0_i32_1 = arith.constant 0 : i32
    %c0_i32_2 = arith.constant 0 : i32
    return %c0_i32, %c0_i32_0, %c0_i32_1 : i32, i32, i32
  }
  func.func @transform_8(%arg0: i32) -> (i32, i32, i32) {
    %c0_i32 = arith.constant 0 : i32
    %c0_i32_0 = arith.constant 0 : i32
    %c0_i32_1 = arith.constant 0 : i32
    return %arg0, %c0_i32, %c0_i32_0 : i32, i32, i32
  }
}

module attributes {stable_mosaic.version = 11 : i64} {
  func.func @_head_kernel(%arg0: i32, %arg1: memref<1x4x32xf32, #tpu.memory_space<vmem>>, %arg2: memref<32x16xbf16, #tpu.memory_space<vmem>>, %arg3: memref<1x16xf32, #tpu.memory_space<vmem>>, %arg4: memref<1x1x16xf32, #tpu.memory_space<vmem>>) attributes {dimension_semantics = [#tpu.dimension_semantics<parallel>], iteration_bounds = array<i64: 2>, scalar_prefetch = 0 : i64, scratch_operands = 0 : i64, tpu.core_type = #tpu.core_type<tc>, window_params = [{transform_indices = @transform_0, window_bounds = array<i64: 1, 4, 32>}, {pipeline_mode = #tpu.pipeline_mode<synchronous>, transform_indices = @transform_1, window_bounds = array<i64: 32, 16>}, {pipeline_mode = #tpu.pipeline_mode<synchronous>, transform_indices = @transform_2, window_bounds = array<i64: 1, 16>}, {transform_indices = @transform_3, window_bounds = array<i64: 1, 1, 16>}]} {
    %c0 = arith.constant 0 : index
    %c0_0 = arith.constant 0 : index
    %c0_1 = arith.constant 0 : index
    %0 = vector.load %arg1[%c0, %c0_0, %c0_1] : memref<1x4x32xf32, #tpu.memory_space<vmem>>, vector<1x4x32xf32>
    %1 = vector.shape_cast %0 : vector<1x4x32xf32> to vector<4x32xf32>
    %cst = arith.constant dense<0.000000e+00> : vector<32xf32>
    %2 = vector.multi_reduction <add>, %1, %cst [0] : vector<4x32xf32> to vector<32xf32>
    %3 = vector.shape_cast %2 : vector<32xf32> to vector<1x32xf32>
    %cst_2 = arith.constant 4.000000e+00 : f32
    %4 = vector.broadcast %cst_2 : f32 to vector<1x32xf32>
    %5 = arith.divf %3, %4 : vector<1x32xf32>
    %6 = arith.truncf %5 : vector<1x32xf32> to vector<1x32xbf16>
    %c0_3 = arith.constant 0 : index
    %c0_4 = arith.constant 0 : index
    %7 = vector.load %arg2[%c0_3, %c0_4] : memref<32x16xbf16, #tpu.memory_space<vmem>>, vector<32x16xbf16>
    %cst_5 = arith.constant dense<0.000000e+00> : vector<1x16xf32>
    %8 = tpu.matmul %6, %7, %cst_5 {dimension_numbers = #tpu.dot_dimension_numbers<[1], [0], [0], [1], [0, 0, 1, 1], [], []>} : vector<1x32xbf16>, vector<32x16xbf16>, vector<1x16xf32> -> vector<1x16xf32>
    %c0_6 = arith.constant 0 : index
    %c0_7 = arith.constant 0 : index
    %9 = vector.load %arg3[%c0_6, %c0_7] : memref<1x16xf32, #tpu.memory_space<vmem>>, vector<1x16xf32>
    %10 = arith.addf %8, %9 : vector<1x16xf32>
    %c0_8 = arith.constant 0 : index
    %c0_9 = arith.constant 0 : index
    %c0_10 = arith.constant 0 : index
    %11 = vector.load %arg4[%c0_8, %c0_9, %c0_10] : memref<1x1x16xf32, #tpu.memory_space<vmem>>, vector<1x1x16xf32>
    %12 = vector.shape_cast %11 : vector<1x1x16xf32> to vector<1x16xf32>
    %13 = vector.shape_cast %10 : vector<1x16xf32> to vector<1x1x16xf32>
    tpu.vector_store %arg4[%c0_8, %c0_9, %c0_10], %13 {strides = array<i32>} : memref<1x1x16xf32, #tpu.memory_space<vmem>>, vector<1x1x16xf32>,
    return
  }
  func.func @transform_0(%arg0: i32) -> (i32, i32, i32) {
    %c0_i32 = arith.constant 0 : i32
    %c0_i32_0 = arith.constant 0 : i32
    %c0_i32_1 = arith.constant 0 : i32
    return %arg0, %c0_i32, %c0_i32_0 : i32, i32, i32
  }
  func.func @transform_1(%arg0: i32) -> (i32, i32) {
    %c0_i32 = arith.constant 0 : i32
    %c0_i32_0 = arith.constant 0 : i32
    %c0_i32_1 = arith.constant 0 : i32
    return %c0_i32, %c0_i32_0 : i32, i32
  }
  func.func @transform_2(%arg0: i32) -> (i32, i32) {
    %c0_i32 = arith.constant 0 : i32
    %c0_i32_0 = arith.constant 0 : i32
    %c0_i32_1 = arith.constant 0 : i32
    return %c0_i32, %c0_i32_0 : i32, i32
  }
  func.func @transform_3(%arg0: i32) -> (i32, i32, i32) {
    %c0_i32 = arith.constant 0 : i32
    %c0_i32_0 = arith.constant 0 : i32
    %c0_i32_1 = arith.constant 0 : i32
    return %arg0, %c0_i32, %c0_i32_0 : i32, i32, i32
  }
}

</mosaic_0001>

<bundles_post_ra>
// kernel: squeezenet_forward.13
= control target key start
LH: loop header
LB: loop body
LE: loop exit
PB: predicated region body
PF: predicated region fallthrough
CT: control target
= control target key end

     0   :  { %s381_s6 = smov 0   ;;  %s444_s0 = inlined_call_operand.vmem [shape: f32[2,8,8,96], index: 0, kind: input, shape index: {}]   ;;  %s445_s1 = inlined_call_operand.vmem [shape: f32[2,4,4,96], index: 1, kind: output, shape index: {}]  }
   0x1 LB: > { %s340_s7 = sadd.s32 4294967295, %s368_s6   ;;  %p344_p0 = scmp.ge.s32.totalorder %s368_s6, 1  ;;  %s368_s6 = sphi %s381_s6, %s11_s6  }
   0x2   : > { %p87_p1 = scmp.lt.s32.totalorder %s368_s6, 3 }
   0x4   : > { %p88_p2 = pnand %p344_p0, %p87_p1 }
   0x5   : > { %p389_p3 = scmp.lt.s32.totalorder (!%p88_p2), %s340_s7, 1 }
   0x6   : > { %91 = sbr.rel (%p88_p2) target bundleno = 55 (0x37), region = 24 }
   0xb   : > { %vm117_vm0 = vcmask 785408   ;;  %vm119_vm1 = vcmask 779264   ;;  %v370_v0 = vmov -inf   ;;  %s448_s7 = smov (!%p389_p3, %s340_s7), 1  ;;  %vm258_vm2 = vcmask 781312  }
   0xc   : > { %118 = vst.msk [vmem:[#allocation2] sm:$0xff] %vm117_vm0, %v370_v0  ;;  %121 = vst.msk [vmem:[#allocation2 + $0x10] sm:$0xff] %vm117_vm0, %v370_v0  ;;  %s351_s9 = sshll.u32 %s448_s7, 6  ;;  %s352_s13 = sshll.u32 %s448_s7, 4 }
   0xd   : > { %123 = vst.msk [vmem:[#allocation2 + $0x20] sm:$0xff] %vm117_vm0, %v370_v0  ;;  %125 = vst.msk [vmem:[#allocation2 + $0x30] sm:$0xff] %vm117_vm0, %v370_v0  ;;  %s111_s12 = scalar_lea.vmem %s444_s0, %s351_s9  ;;  %s431_s16 = scalar_lea.vmem %s445_s1, %s352_s13 }
   0xe   : > { %127 = vst.msk [vmem:[#allocation2 + $0x40] sm:$0xff] %vm117_vm0, %v370_v0  ;;  %129 = vst.msk [vmem:[#allocation2 + $0x50] sm:$0xff] %vm117_vm0, %v370_v0  ;;  %v139_v1 = vld [vmem:[%s111_s12] sm:$0xff]  ;;  %v140_v2 = vld [vmem:[%s111_s12 + $0x8] sm:$0xff] }
   0xf   : > { %131 = vst.msk [vmem:[#allocation2 + $0x60] sm:$0xff] %vm117_vm0, %v370_v0  ;;  %133 = vst.msk [vmem:[#allocation2 + $0x70] sm:$0xff] %vm117_vm0, %v370_v0  ;;  %v142_v3 = vld [vmem:[%s111_s12 + $0x18] sm:$0xff]  ;;  %v144_v4 = vld [vmem:[%s111_s12 + $0x28] sm:$0xff] }
  0x10   : > { %135 = vst.msk [vmem:[#allocation2 + $0x80] sm:$0xff] %vm117_vm0, %v370_v0  ;;  %v141_v5 = vld [vmem:[%s111_s12 + $0x10] sm:$0xff]  ;;  %v143_v6 = vld [vmem:[%s111_s12 + $0x20] sm:$0xff]  ;;  %v146_v8 = vld [vmem:[%s111_s12 + $0x38] sm:$0xff] }
  0x11   : > { %120 = vst.msk [vmem:[#allocation2 + $0x8] sm:$0x3] %vm119_vm1, %v370_v0  ;;  %122 = vst.msk [vmem:[#allocation2 + $0x18] sm:$0x3] %vm119_vm1, %v370_v0  ;;  %v145_v7 = vld [vmem:[%s111_s12 + $0x30] sm:$0xff] }
  0x12   : > { %124 = vst.msk [vmem:[#allocation2 + $0x28] sm:$0x3] %vm119_vm1, %v370_v0  ;;  %126 = vst.msk [vmem:[#allocation2 + $0x38] sm:$0x3] %vm119_vm1, %v370_v0 }
  0x13   : > { %128 = vst.msk [vmem:[#allocation2 + $0x48] sm:$0x3] %vm119_vm1, %v370_v0  ;;  %130 = vst.msk [vmem:[#allocation2 + $0x58] sm:$0x3] %vm119_vm1, %v370_v0 }
  0x14   : > { %132 = vst.msk [vmem:[#allocation2 + $0x68] sm:$0x3] %vm119_vm1, %v370_v0  ;;  %134 = vst.msk [vmem:[#allocation2 + $0x78] sm:$0x3] %vm119_vm1, %v370_v0 }
  0x15   : > { %136 = vst.msk [vmem:[#allocation2 + $0x88] sm:$0x3] %vm119_vm1, %v370_v0  ;;  %v156_v9 = vld [vmem:[#allocation2] ss:$2 sm:$0xf] }
  0x16   : > { %148 = vst.msk [vmem:[#allocation2 + $0x11] sm:$0xff] %vm117_vm0, %v139_v1  ;;  %149 = vst.msk [vmem:[#allocation2 + $0x21] sm:$0xff] %vm117_vm0, %v140_v2  ;;  %v164_v10 = vld [vmem:[#allocation2 + $0x1] ss:$2 sm:$0xf] }
  0x17   : > { %151 = vst.msk [vmem:[#allocation2 + $0x41] sm:$0xff] %vm117_vm0, %v142_v3  ;;  %153 = vst.msk [vmem:[#allocation2 + $0x61] sm:$0xff] %vm117_vm0, %v144_v4  ;;  %v171_v12 = vmax.f32 %v156_v9, %v164_v10 }
  0x18   : > { %150 = vst.msk [vmem:[#allocation2 + $0x31] sm:$0xff] %vm117_vm0, %v141_v5  ;;  %152 = vst.msk [vmem:[#allocation2 + $0x51] sm:$0xff] %vm117_vm0, %v143_v6  ;;  %v176_v11 = vld [vmem:[#allocation2 + $0x2] ss:$2 sm:$0xf] }
  0x19   : > { %154 = vst.msk [vmem:[#allocation2 + $0x71] sm:$0xff] %vm117_vm0, %v145_v7  ;;  %155 = vst.msk [vmem:[#allocation2 + $0x81] sm:$0xff] %vm117_vm0, %v146_v8  ;;  %v183_v13 = vmax.f32 %v171_v12, %v176_v11 }
  0x1d   : > { %v187_v14 = vld [vmem:[#allocation2 + $0x10] ss:$2 sm:$0xf]  ;;  %v199_v15 = vld [vmem:[#allocation2 + $0x11] ss:$2 sm:$0xf] }
  0x1e   : > { %v194_v16 = vmax.f32 %v183_v13, %v187_v14  ;;  %v211_v17 = vld [vmem:[#allocation2 + $0x12] ss:$2 sm:$0xf]  ;;  %v158_v19 = vld [vmem:[#allocation2 + $0x20] ss:$2 sm:$0xf] }
  0x1f   : > { %v166_v20 = vld [vmem:[#allocation2 + $0x21] ss:$2 sm:$0xf]  ;;  %v178_v23 = vld [vmem:[#allocation2 + $0x22] ss:$2 sm:$0xf] }
  0x20   : > { %v206_v18 = vmax.f32 %v194_v16, %v199_v15  ;;  %v172_v21 = vmax.f32 %v158_v19, %v166_v20  ;;  %v189_v24 = vld [vmem:[#allocation2 + $0x30] ss:$2 sm:$0xf]  ;;  %v223_v25 = vld [vmem:[#allocation2 + $0x20] ss:$2 sm:$0xf] }
  0x21   : > { %v160_v28 = vld [vmem:[#allocation2 + $0x40] ss:$2 sm:$0xf]  ;;  %v235_v29 = vld [vmem:[#allocation2 + $0x21] ss:$2 sm:$0xf] }
  0x22   : > { %v218_v22 = vmax.f32 %v206_v18, %v211_v17  ;;  %v184_v26 = vmax.f32 %v172_v21, %v178_v23  ;;  %v168_v31 = vld [vmem:[#allocation2 + $0x41] ss:$2 sm:$0xf]  ;;  %v247_v33 = vld [vmem:[#allocation2 + $0x22] ss:$2 sm:$0xf] }
  0x23   : > { %v201_v34 = vld [vmem:[#allocation2 + $0x31] ss:$2 sm:$0xf]  ;;  %v173_v35 = vmax.f32 %v160_v28, %v168_v31  ;;  %v180_v37 = vld [vmem:[#allocation2 + $0x42] ss:$2 sm:$0xf] }
  0x24   : > { %v230_v27 = vmax.f32 %v218_v22, %v223_v25  ;;  %v195_v30 = vmax.f32 %v184_v26, %v189_v24  ;;  %v191_v38 = vld [vmem:[#allocation2 + $0x50] ss:$2 sm:$0xf]  ;;  %v162_v43 = vld [vmem:[#allocation2 + $0x60] ss:$2 sm:$0xf] }
  0x25   : > { %v213_v40 = vld [vmem:[#allocation2 + $0x32] ss:$2 sm:$0xf]  ;;  %v185_v41 = vmax.f32 %v173_v35, %v180_v37  ;;  %v170_v44 = vld [vmem:[#allocation2 + $0x61] ss:$2 sm:$0xf] }
  0x26   : > { %v242_v32 = vmax.f32 %v230_v27, %v235_v29  ;;  %v207_v36 = vmax.f32 %v195_v30, %v201_v34  ;;  %v225_v45 = vld [vmem:[#allocation2 + $0x40] ss:$2 sm:$0xf]  ;;  %v203_v47 = vld [vmem:[#allocation2 + $0x51] ss:$2 sm:$0xf]  ;;  %v174_v48 = vmax.f32 %v162_v43, %v170_v44 }
  0x27   : > { %v196_v46 = vmax.f32 %v185_v41, %v191_v38  ;;  %v182_v50 = vld [vmem:[#allocation2 + $0x62] ss:$2 sm:$0xf]  ;;  %v193_v51 = vld [vmem:[#allocation2 + $0x70] ss:$2 sm:$0xf] }
  0x28   : > { %v254_v39 = vmax.f32 %v242_v32, %v247_v33  ;;  %v219_v42 = vmax.f32 %v207_v36, %v213_v40  ;;  %v237_v52 = vld [vmem:[#allocation2 + $0x41] ss:$2 sm:$0xf]  ;;  %v186_v54 = vmax.f32 %v174_v48, %v182_v50  ;;  %v215_v56 = vld [vmem:[#allocation2 + $0x52] ss:$2 sm:$0xf] }
  0x29   : > { %v208_v53 = vmax.f32 %v196_v46, %v203_v47  ;;  %v249_v57 = vld [vmem:[#allocation2 + $0x42] ss:$2 sm:$0xf]  ;;  %v205_v62 = vld [vmem:[#allocation2 + $0x71] ss:$2 sm:$0xf] }
  0x2a   : > { %259 = vst.msk [vmem:[%s431_s16] sm:$0xf] %vm258_vm2, %v254_v39  ;;  %v231_v49 = vmax.f32 %v219_v42, %v225_v45  ;;  %v197_v59 = vmax.f32 %v186_v54, %v193_v51  ;;  %v227_v61 = vld [vmem:[#allocation2 + $0x60] ss:$2 sm:$0xf] }
  0x2b   : > { %v220_v58 = vmax.f32 %v208_v53, %v215_v56  ;;  %v239_v0 = vld [vmem:[#allocation2 + $0x61] ss:$2 sm:$0xf]  ;;  %v217_v2 = vld [vmem:[#allocation2 + $0x72] ss:$2 sm:$0xf] }
  0x2c   : > { %v243_v55 = vmax.f32 %v231_v49, %v237_v52  ;;  %v209_v1 = vmax.f32 %v197_v59, %v205_v62  ;;  %v229_v3 = vld [vmem:[#allocation2 + $0x80] ss:$2 sm:$0xf]  ;;  %v241_v9 = vld [vmem:[#allocation2 + $0x81] ss:$2 sm:$0xf] }
  0x2d   : > { %v232_v63 = vmax.f32 %v220_v58, %v227_v61  ;;  %v251_v6 = vld [vmem:[#allocation2 + $0x62] ss:$2 sm:$0xf] }
  0x2e   : > { %v255_v60 = vmax.f32 %v243_v55, %v249_v57  ;;  %v221_v5 = vmax.f32 %v209_v1, %v217_v2  ;;  %v253_v11 = vld [vmem:[#allocation2 + $0x82] ss:$2 sm:$0xf] }
  0x2f   : > { %v244_v4 = vmax.f32 %v232_v63, %v239_v0 }
  0x30   : > { %260 = vst.msk [vmem:[%s431_s16 + $0x4] sm:$0xf] %vm258_vm2, %v255_v60  ;;  %v233_v8 = vmax.f32 %v221_v5, %v229_v3 }
  0x31   : > { %v256_v7 = vmax.f32 %v244_v4, %v251_v6 }
  0x32   : > { %v245_v10 = vmax.f32 %v233_v8, %v241_v9 }
  0x33   : > { %261 = vst.msk [vmem:[%s431_s16 + $0x8] sm:$0xf] %vm258_vm2, %v256_v7 }
  0x34   : > { %v257_v12 = vmax.f32 %v245_v10, %v253_v11 }
  0x36   : > { %262 = vst.msk [vmem:[%s431_s16 + $0xc] sm:$0xf] %vm258_vm2, %v257_v12 }
  0x37 PF: > { %s11_s6 = sadd.s32 1, %s368_s6  }
  0x38   : > { %p8_p4 = scmp.ge.s32.totalorder %s11_s6, 4  }
  0x3a   :  { %10 = sbr.rel (!%p8_p4) target bundleno = 1 (0x1), region = 89 }

// kernel: squeezenet_forward.12
= control target key start
LH: loop header
LB: loop body
LE: loop exit
PB: predicated region body
PF: predicated region fallthrough
CT: control target
= control target key end

     0   :  { %v518_v0 = vmov 0   ;;  %vm206_vm0 = vcmask 556032   ;;  %vm231_vm1 = vcmask 1041408   ;;  %vm394_vm2 = vcmask 785408   ;;  %s771_s1 = inlined_call_operand.vmem [shape: bf16[196,96], index: 1, kind: input, shape index: {}]   ;;  %s772_s0 = inlined_call_operand.vmem [shape: bf16[128,196], index: 0, kind: input, shape index: {}]   ;;  %s773_s2 = inlined_call_operand.vmem [shape: f32[1,96], index: 2, kind: input, shape index: {}]   ;;  %s774_s3 = inlined_call_operand.vmem [shape: f32[1,96], index: 3, kind: input, shape index: {}]   ;;  %s775_s4 = inlined_call_operand.vmem [shape: f32[128,96], index: 4, kind: output, shape index: {}]  }
   0x1   :  { %235 = vmatprep.subr.bf16.mxu0 %v518_v0  ;;  %454 = vmatprep.subr.bf16.mxu1 %v518_v0  ;;  %v481_v1 = vld [vmem:[%s771_s1 + $0x38] sm:$0xff]   ;;  %v482_v2 = vld [vmem:[%s771_s1 + $0x30] sm:$0xff]   ;;  %v483_v3 = vld [vmem:[%s771_s1 + $0x28] sm:$0xff]  }
   0x2   :  { %236 = vmatpush1.bf16.msra.mxu0 %v481_v1  ;;  %467 = vmatpush1.bf16.msra.mxu1 %v481_v1  ;;  %v484_v4 = vld [vmem:[%s771_s1 + $0x20] sm:$0xff]   ;;  %v485_v6 = vld [vmem:[%s771_s1 + $0x18] sm:$0xff]   ;;  %v486_v8 = vld [vmem:[%s771_s1 + $0x10] sm:$0xff]  }
   0x3   :  { %237 = vmatprep.subr.bf16.mxu0 %v518_v0  ;;  %455 = vmatprep.subr.bf16.mxu1 %v518_v0  ;;  %v496_v5 = vld [vmem:[%s772_s0 + $0x4] ss:$8 sps:$4 sm:$0xff]   ;;  %v489_v11 = vld [vmem:[%s771_s1 + $0x60] ss:$0 sps:$4 sm:$0x33]   ;;  %v490_v13 = vld [vmem:[%s771_s1 + $0x58] sm:$0xff]  }
   0x4   :  { %v499_v7 = vld [vmem:[%s772_s0 + $0x44] ss:$8 sps:$4 sm:$0xff]   ;;  %444 = vmatprep.mubr.msk.bf16.mxu0 %vm206_vm0, %v496_v5  ;;  %v233_v12 = vsel %vm231_vm1, %v489_v11, 0  ;;  %v491_v14 = vld [vmem:[%s771_s1 + $0x50] sm:$0xff]   ;;  %v494_v17 = vld [vmem:[%s772_s0] ss:$8 sps:$4 sm:$0xff]  }
   0x5   :  { %448 = vmatprep.mubr.msk.bf16.mxu1 %vm206_vm0, %v499_v7  ;;  %v487_v9 = vld [vmem:[%s771_s1 + $0x8] sm:$0xff]   ;;  %v488_v10 = vld [vmem:[%s771_s1] sm:$0xff]   ;;  %v500_v19 = vld [vmem:[%s772_s0 + $0x14] ss:$8 sps:$4 sm:$0xff]  }
   0x6   :  { %238 = vmatpush1.bf16.msra.mxu0 %v482_v2  ;;  %468 = vmatpush1.bf16.msra.mxu1 %v482_v2  ;;  %v492_v15 = vld [vmem:[%s771_s1 + $0x48] sm:$0xff]   ;;  %v493_v16 = vld [vmem:[%s771_s1 + $0x40] sm:$0xff]   ;;  %v502_v20 = vld [vmem:[%s772_s0 + $0x54] ss:$8 sps:$4 sm:$0xff]  }
   0x7   :  { %239 = vmatprep.subr.bf16.mxu0 %v518_v0  ;;  %456 = vmatprep.subr.bf16.mxu1 %v518_v0  ;;  %v497_v18 = vld [vmem:[%s772_s0 + $0x40] ss:$8 sps:$4 sm:$0xff]   ;;  %v504_v21 = vld [vmem:[%s772_s0 + $0x10] ss:$8 sps:$4 sm:$0xff]   ;;  %v506_v23 = vld [vmem:[%s772_s0 + $0x24] ss:$8 sps:$4 sm:$0xff]  }
   0x8   :  { %v505_v22 = vld [vmem:[%s772_s0 + $0x50] ss:$8 sps:$4 sm:$0xff]   ;;  %v508_v24 = vld [vmem:[%s772_s0 + $0x64] ss:$8 sps:$4 sm:$0xff]   ;;  %v510_v25 = vld [vmem:[%s772_s0 + $0x20] ss:$8 sps:$4 sm:$0xff]  }
   0x9   :  { %v511_v26 = vld [vmem:[%s772_s0 + $0x60] ss:$8 sps:$4 sm:$0xff]   ;;  %v512_v27 = vld [vmem:[%s772_s0 + $0x34] ss:$8 sps:$4 sm:$0xff]   ;;  %v516_v29 = vld [vmem:[%s772_s0 + $0x30] ss:$8 sps:$4 sm:$0xff]  }
   0xa   :  { %240 = vmatpush1.bf16.msra.mxu0 %v483_v3  ;;  %469 = vmatpush1.bf16.msra.mxu1 %v483_v3  ;;  %v514_v28 = vld [vmem:[%s772_s0 + $0x74] ss:$8 sps:$4 sm:$0xff]   ;;  %v517_v30 = vld [vmem:[%s772_s0 + $0x70] ss:$8 sps:$4 sm:$0xff]   ;;  %v668_v31 = vld [vmem:[%s773_s2] ss:$0 sm:$0xff] }
   0xb   :  { %241 = vmatprep.subr.bf16.mxu0 %v518_v0  ;;  %457 = vmatprep.subr.bf16.mxu1 %v518_v0  ;;  %v673_v33 = vld [vmem:[%s774_s3] ss:$0 sm:$0xff] }
   0xe   :  { %242 = vmatpush1.bf16.msra.mxu0 %v484_v4  ;;  %470 = vmatpush1.bf16.msra.mxu1 %v484_v4 }
   0xf   :  { %243 = vmatprep.subr.bf16.mxu0 %v518_v0  ;;  %458 = vmatprep.subr.bf16.mxu1 %v518_v0 }
  0x12   :  { %244 = vmatpush1.bf16.msra.mxu0 %v485_v6  ;;  %471 = vmatpush1.bf16.msra.mxu1 %v485_v6 }
  0x13   :  { %245 = vmatprep.subr.bf16.mxu0 %v518_v0  ;;  %459 = vmatprep.subr.bf16.mxu1 %v518_v0 }
  0x16   :  { %246 = vmatpush1.bf16.msra.mxu0 %v486_v8  ;;  %472 = vmatpush1.bf16.msra.mxu1 %v486_v8 }
  0x17   :  { %247 = vmatprep.subr.bf16.mxu0 %v518_v0  ;;  %460 = vmatprep.subr.bf16.mxu1 %v518_v0 }
  0x1a   :  { %248 = vmatpush1.bf16.msra.mxu0 %v487_v9  ;;  %473 = vmatpush1.bf16.msra.mxu1 %v487_v9 }
  0x1b   :  { %249 = vmatprep.subr.bf16.mxu0 %v518_v0  ;;  %461 = vmatprep.subr.bf16.mxu1 %v518_v0 }
  0x1e   :  { %250 = vmatpush1.bf16.msra.mxu0 %v488_v10  ;;  %474 = vmatpush1.bf16.msra.mxu1 %v488_v10 }
  0x1f   :  { %257 = vmatprep.subr.bf16.mxu0 %v518_v0  ;;  %462 = vmatprep.subr.bf16.mxu1 %v518_v0 }
  0x22   :  { %258 = vmatpush2.bf16.msra.mxu0 %v233_v12  ;;  %475 = vmatpush2.bf16.msra.mxu1 %v233_v12 }
  0x23   :  { %259 = vmatprep.subr.bf16.mxu0 %v518_v0  ;;  %463 = vmatprep.subr.bf16.mxu1 %v518_v0 }
  0x26   :  { %260 = vmatpush2.bf16.msra.mxu0 %v490_v13  ;;  %476 = vmatpush2.bf16.msra.mxu1 %v490_v13 }
  0x27   :  { %261 = vmatprep.subr.bf16.mxu0 %v518_v0  ;;  %464 = vmatprep.subr.bf16.mxu1 %v518_v0 }
  0x2a   :  { %262 = vmatpush2.bf16.msra.mxu0 %v491_v14  ;;  %477 = vmatpush2.bf16.msra.mxu1 %v491_v14 }
  0x2b   :  { %263 = vmatprep.subr.bf16.mxu0 %v518_v0  ;;  %465 = vmatprep.subr.bf16.mxu1 %v518_v0 }
  0x2e   :  { %264 = vmatpush2.bf16.msra.mxu0 %v492_v15  ;;  %478 = vmatpush2.bf16.msra.mxu1 %v492_v15 }
  0x2f   :  { %265 = vmatprep.subr.bf16.mxu0 %v518_v0  ;;  %466 = vmatprep.subr.bf16.mxu1 %v518_v0 }
  0x32   :  { %266 = vmatpush2.bf16.msra.mxu0 %v493_v16  ;;  %479 = vmatpush2.bf16.msra.mxu1 %v493_v16 }
  0x35   :  { %268 = vmatmul.mubr.bf16.vlgmr.msra.gmra.mxu0 %v494_v17  ;;  %300 = vmatmul.mubr.bf16.vlgmr.msra.gmra.mxu1 %v497_v18 }
  0x36   :  { %445 = vmatprep.mubr.msk.bf16.mxu0 %vm206_vm0, %v500_v19  ;;  %449 = vmatprep.mubr.msk.bf16.mxu1 %vm206_vm0, %v502_v20 }
  0x3d   :  { %276 = vmatmul.mubr.bf16.gmra.mxu0 %v504_v21  ;;  %308 = vmatmul.mubr.bf16.gmra.mxu1 %v505_v22 }
  0x3e   :  { %446 = vmatprep.mubr.msk.bf16.mxu0 %vm206_vm0, %v506_v23  ;;  %450 = vmatprep.mubr.msk.bf16.mxu1 %vm206_vm0, %v508_v24 }
  0x45   :  { %284 = vmatmul.mubr.bf16.gmra.mxu0 %v510_v25  ;;  %316 = vmatmul.mubr.bf16.gmra.mxu1 %v511_v26 }
  0x46   :  { %447 = vmatprep.mubr.msk.bf16.mxu0 %vm206_vm0, %v512_v27  ;;  %451 = vmatprep.mubr.msk.bf16.mxu1 %vm206_vm0, %v514_v28 }
  0x4d   :  { %292 = vmatmul.mubr.bf16.gmra.mxu0 %v516_v29  ;;  %324 = vmatmul.mubr.bf16.gmra.mxu1 %v517_v30 }
  0xf5   :  { %v269_v32 = vpop.f32.mrf.mxu0  ;;  %v301_v34 = vpop.f32.mrf.mxu1 }
  0xf6   :  { %v339_v35 = vmul.f32 %v668_v31, %v269_v32  ;;  %v347_v36 = vmul.f32 %v668_v31, %v301_v34 }
  0xf7   :  { %v271_v37 = vpop.f32.mrf.mxu0  ;;  %v303_v38 = vpop.f32.mrf.mxu1 }
  0xf8   :  { %v362_v39 = vadd.f32 %v673_v33, %v339_v35  ;;  %v370_v40 = vadd.f32 %v673_v33, %v347_v36 }
  0xf9   :  { %v272_v41 = vpop.f32.mrf.mxu0  ;;  %v304_v42 = vpop.f32.mrf.mxu1 }
  0xfa   :  { %v378_v43 = vmax.f32 %v362_v39, 0.0  ;;  %v386_v44 = vmax.f32 %v370_v40, 0.0  ;;  %v340_v45 = vmul.f32 %v668_v31, %v272_v41  ;;  %v348_v46 = vmul.f32 %v668_v31, %v304_v42 }
  0xfb   :  { %v274_v47 = vpop.f32.mrf.mxu0  ;;  %v306_v48 = vpop.f32.mrf.mxu1 }
  0xfc   :  { %395 = vst.msk [vmem:[%s775_s4] sm:$0xff] %vm394_vm2, %v378_v43  ;;  %403 = vst.msk [vmem:[%s775_s4 + $0x40] sm:$0xff] %vm394_vm2, %v386_v44  ;;  %v363_v49 = vadd.f32 %v673_v33, %v340_v45  ;;  %v371_v50 = vadd.f32 %v673_v33, %v348_v46 }
  0xfd   :  { %v277_v51 = vpop.f32.mrf.mxu0  ;;  %v309_v52 = vpop.f32.mrf.mxu1 }
  0xfe   :  { %v379_v53 = vmax.f32 %v363_v49, 0.0  ;;  %v387_v54 = vmax.f32 %v371_v50, 0.0  ;;  %v341_v55 = vmul.f32 %v668_v31, %v277_v51  ;;  %v349_v56 = vmul.f32 %v668_v31, %v309_v52 }
  0xff   :  { %v279_v57 = vpop.f32.mrf.mxu0  ;;  %v311_v58 = vpop.f32.mrf.mxu1 }
 0x100   :  { %396 = vst.msk [vmem:[%s775_s4 + $0x8] sm:$0xff] %vm394_vm2, %v379_v53  ;;  %404 = vst.msk [vmem:[%s775_s4 + $0x48] sm:$0xff] %vm394_vm2, %v387_v54  ;;  %v364_v59 = vadd.f32 %v673_v33, %v341_v55  ;;  %v372_v60 = vadd.f32 %v673_v33, %v349_v56 }
 0x101   :  { %v280_v61 = vpop.f32.mrf.mxu0  ;;  %v312_v62 = vpop.f32.mrf.mxu1 }
 0x102   :  { %v380_v63 = vmax.f32 %v364_v59, 0.0  ;;  %v388_v0 = vmax.f32 %v372_v60, 0.0  ;;  %v342_v1 = vmul.f32 %v668_v31, %v280_v61  ;;  %v350_v2 = vmul.f32 %v668_v31, %v312_v62 }
 0x103   :  { %v282_v3 = vpop.f32.mrf.mxu0  ;;  %v314_v4 = vpop.f32.mrf.mxu1 }
 0x104   :  { %397 = vst.msk [vmem:[%s775_s4 + $0x10] sm:$0xff] %vm394_vm2, %v380_v63  ;;  %405 = vst.msk [vmem:[%s775_s4 + $0x50] sm:$0xff] %vm394_vm2, %v388_v0  ;;  %v365_v5 = vadd.f32 %v673_v33, %v342_v1  ;;  %v373_v6 = vadd.f32 %v673_v33, %v350_v2 }
 0x105   :  { %v285_v7 = vpop.f32.mrf.mxu0  ;;  %v317_v8 = vpop.f32.mrf.mxu1 }
 0x106   :  { %v381_v9 = vmax.f32 %v365_v5, 0.0  ;;  %v389_v10 = vmax.f32 %v373_v6, 0.0  ;;  %v343_v11 = vmul.f32 %v668_v31, %v285_v7  ;;  %v351_v12 = vmul.f32 %v668_v31, %v317_v8 }
 0x107   :  { %v287_v13 = vpop.f32.mrf.mxu0  ;;  %v319_v14 = vpop.f32.mrf.mxu1 }
 0x108   :  { %398 = vst.msk [vmem:[%s775_s4 + $0x18] sm:$0xff] %vm394_vm2, %v381_v9  ;;  %406 = vst.msk [vmem:[%s775_s4 + $0x58] sm:$0xff] %vm394_vm2, %v389_v10  ;;  %v366_v15 = vadd.f32 %v673_v33, %v343_v11  ;;  %v374_v16 = vadd.f32 %v673_v33, %v351_v12 }
 0x109   :  { %v288_v17 = vpop.f32.mrf.mxu0  ;;  %v320_v18 = vpop.f32.mrf.mxu1 }
 0x10a   :  { %v382_v19 = vmax.f32 %v366_v15, 0.0  ;;  %v390_v20 = vmax.f32 %v374_v16, 0.0  ;;  %v344_v21 = vmul.f32 %v668_v31, %v288_v17  ;;  %v352_v22 = vmul.f32 %v668_v31, %v320_v18 }
 0x10b   :  { %v290_v23 = vpop.f32.mrf.mxu0  ;;  %v322_v24 = vpop.f32.mrf.mxu1 }
 0x10c   :  { %399 = vst.msk [vmem:[%s775_s4 + $0x20] sm:$0xff] %vm394_vm2, %v382_v19  ;;  %407 = vst.msk [vmem:[%s775_s4 + $0x60] sm:$0xff] %vm394_vm2, %v390_v20  ;;  %v367_v25 = vadd.f32 %v673_v33, %v344_v21  ;;  %v375_v26 = vadd.f32 %v673_v33, %v352_v22 }
 0x10d   :  { %v293_v27 = vpop.f32.mrf.mxu0  ;;  %v325_v28 = vpop.f32.mrf.mxu1 }
 0x10e   :  { %v383_v29 = vmax.f32 %v367_v25, 0.0  ;;  %v391_v30 = vmax.f32 %v375_v26, 0.0  ;;  %v345_v32 = vmul.f32 %v668_v31, %v293_v27  ;;  %v353_v34 = vmul.f32 %v668_v31, %v325_v28 }
 0x10f   :  { %v295_v35 = vpop.f32.mrf.mxu0  ;;  %v327_v36 = vpop.f32.mrf.mxu1 }
 0x110   :  { %400 = vst.msk [vmem:[%s775_s4 + $0x28] sm:$0xff] %vm394_vm2, %v383_v29  ;;  %408 = vst.msk [vmem:[%s775_s4 + $0x68] sm:$0xff] %vm394_vm2, %v391_v30  ;;  %v368_v37 = vadd.f32 %v673_v33, %v345_v32  ;;  %v376_v38 = vadd.f32 %v673_v33, %v353_v34 }
 0x111   :  { %v296_v39 = vpop.f32.mrf.mxu0  ;;  %v328_v40 = vpop.f32.mrf.mxu1 }
 0x112   :  { %v384_v41 = vmax.f32 %v368_v37, 0.0  ;;  %v392_v42 = vmax.f32 %v376_v38, 0.0  ;;  %v346_v43 = vmul.f32 %v668_v31, %v296_v39  ;;  %v354_v44 = vmul.f32 %v668_v31, %v328_v40 }
 0x113   :  { %v298_v45 = vpop.f32.mrf.mxu0  ;;  %v330_v46 = vpop.f32.mrf.mxu1 }
 0x114   :  { %401 = vst.msk [vmem:[%s775_s4 + $0x30] sm:$0xff] %vm394_vm2, %v384_v41  ;;  %409 = vst.msk [vmem:[%s775_s4 + $0x70] sm:$0xff] %vm394_vm2, %v392_v42  ;;  %v369_v47 = vadd.f32 %v673_v33, %v346_v43  ;;  %v377_v48 = vadd.f32 %v673_v33, %v354_v44 }
 0x116   :  { %v385_v49 = vmax.f32 %v369_v47, 0.0  ;;  %v393_v50 = vmax.f32 %v377_v48, 0.0 }
 0x118   :  { %402 = vst.msk [vmem:[%s775_s4 + $0x38] sm:$0xff] %vm394_vm2, %v385_v49  ;;  %410 = vst.msk [vmem:[%s775_s4 + $0x78] sm:$0xff] %vm394_vm2, %v393_v50 }

// kernel: squeezenet_forward.14
= control target key start
LH: loop header
LB: loop body
LE: loop exit
PB: predicated region body
PF: predicated region fallthrough
CT: control target
= control target key end

     0   :  { %s1482_s17 = smov 0   ;;  %s1678_s0 = inlined_call_operand.vmem [shape: f32[2,16,96], index: 0, kind: input, shape index: {}]   ;;  %s1679_s1 = inlined_call_operand.vmem [shape: bf16[96,4], index: 1, kind: input, shape index: {}]   ;;  %s1680_s2 = inlined_call_operand.vmem [shape: f32[1,4], index: 2, kind: input, shape index: {}]   ;;  %s1681_s3 = inlined_call_operand.vmem [shape: f32[1,4], index: 3, kind: input, shape index: {}]   ;;  %s1682_s4 = inlined_call_operand.vmem [shape: bf16[9,4,16], index: 4, kind: input, shape index: {}]   ;;  %s1683_s5 = inlined_call_operand.vmem [shape: f32[1,16], index: 5, kind: input, shape index: {}]   ;;  %s1684_s6 = inlined_call_operand.vmem [shape: f32[1,16], index: 6, kind: input, shape index: {}]   ;;  %s1685_s7 = inlined_call_operand.vmem [shape: f32[2,16,1], index: 7, kind: input, shape index: {}]   ;;  %s1686_s8 = inlined_call_operand.vmem [shape: bf16[96,16], index: 8, kind: input, shape index: {}]   ;;  %s1687_s9 = inlined_call_operand.vmem [shape: f32[1,16], index: 9, kind: input, shape index: {}]   ;;  %s1688_s10 = inlined_call_operand.vmem [shape: f32[1,16], index: 10, kind: input, shape index: {}]   ;;  %s1689_s11 = inlined_call_operand.vmem [shape: f32[2,16,16], index: 11, kind: output, shape index: {}]  }
   0x1 LB: > { %s1216_s18 = sadd.s32 4294967295, %s1417_s17   ;;  %p1220_p0 = scmp.ge.s32.totalorder %s1417_s17, 1  ;;  %s1417_s17 = sphi %s1482_s17, %s21_s17  }
   0x2   : > { %p337_p1 = scmp.lt.s32.totalorder %s1417_s17, 3 }
   0x4   : > { %p338_p2 = pnand %p1220_p0, %p337_p1 }
   0x5   : > { %p377_p3 = scmp.lt.s32.totalorder (!%p338_p2), %s1216_s18, 1 }
   0x6   : > { %341 = sbr.rel (%p338_p2) target bundleno = 491 (0x1eb), region = 64 }
   0xb   : > { %v1399_v0 = vld [vmem:[%s1679_s1 + $0x28] sm:$0xff]   ;;  %v1419_v1 = vmov 0.0   ;;  %v1400_v2 = vld [vmem:[%s1679_s1 + $0x20] sm:$0xff]   ;;  %vm1420_vm0 = vmmov 0   ;;  %v1401_v3 = vld [vmem:[%s1679_s1 + $0x18] sm:$0xff]   ;;  %v1421_v4 = vmov 0  }
   0xc   : > { %1300 = vmatprep.subr.bf16.mxu0 %v1419_v1  ;;  %1316 = vmatprep.subr.bf16.mxu1 %v1419_v1  ;;  %v624_v5 = vld [vmem:[%s1685_s7] sm:$0xff]  ;;  %v1248_v6 = vld [vmem:[%s1685_s7 + $0x10] sm:$0xff]  ;;  %s1691_s18 = smov (!%p377_p3, %s1216_s18), 1  ;;  %v625_v8 = vld [vmem:[%s1685_s7 + $0x8] sm:$0xff]  ;;  %vm439_vm1 = vcmask 785408   ;;  %vm613_vm2 = vcmask 28672  }
   0xd   : > { %1301 = vmatpush3.bf16.msra.mxu0 %v1399_v0  ;;  %1312 = vmatprep.mubr.msk.bf16.mxu0 %vm1420_vm0, %v1419_v1  ;;  %v1402_v7 = vld [vmem:[%s1679_s1 + $0x10] sm:$0xff]   ;;  %v1405_v9 = vld [vmem:[%s1686_s8 + $0x28] sm:$0xff]   ;;  %v1249_v10 = vld [vmem:[%s1685_s7 + $0x18] sm:$0xff]  ;;  %s1266_s22 = sshll.u32 %s1691_s18, 4  ;;  %614 = vst.msk [vmem:[#allocation2] sm:$0x1f] %vm613_vm2, %v1419_v1 }
   0xe   : > { %1302 = vmatprep.subr.bf16.mxu0 %v1419_v1  ;;  %1328 = vmatprep.mubr.msk.bf16.mxu1 %vm1420_vm0, %v1419_v1  ;;  %v1406_v11 = vld [vmem:[%s1686_s8 + $0x20] sm:$0xff]   ;;  %v1403_v12 = vld [vmem:[%s1679_s1 + $0x8] sm:$0xff]   ;;  %v1407_v13 = vld [vmem:[%s1686_s8 + $0x18] sm:$0xff]   ;;  %s381_s29 = scalar_lea.vmem %s1678_s0, %s1266_s22  ;;  %615 = vst.msk [vmem:[#allocation2 + $0x15] sm:$0x1f] %vm613_vm2, %v1419_v1  ;;  %vm643_vm3 = vcmask 1041408   ;;  %s386_s21 = scalar_lea.vmem %s1689_s11, %s1266_s22 }
   0xf   : > { %1397 = vset.pattern.permute.xlu0 %v1421_v4  ;;  %1398 = vset.pattern.permute.xlu1 %v1421_v4  ;;  %v1404_v14 = vld [vmem:[%s1679_s1] sm:$0xff]   ;;  %v389_v16 = vld [vmem:[%s381_s29 + $0x8] sm:$0xff]  ;;  %v1408_v17 = vld [vmem:[%s1686_s8 + $0x10] sm:$0xff]   ;;  %vm616_vm4 = vcmask 31744   ;;  %vm1158_vm5 = vcmask 130048  }
  0x10   : > { %628 = vperm.xlu0 %1397, %v624_v5   ;;  %796 = vperm.xlu1 %1398, %v1248_v6   ;;  %v388_v15 = vld [vmem:[%s381_s29] sm:$0xff]  ;;  %v1409_v19 = vld [vmem:[%s1686_s8 + $0x8] sm:$0xff]  }
  0x11   : > { %1303 = vmatpush3.bf16.msra.mxu0 %v1400_v2  ;;  %1317 = vmatpush3.bf16.msra.mxu1 %v1405_v9  ;;  %v390_v18 = vpack.c.bf16 %v389_v16, %v388_v15  ;;  %v1410_v20 = vld [vmem:[%s1686_s8] sm:$0xff]   ;;  %v1243_v21 = vld [vmem:[%s1682_s4 + $0x8] sm:$0x3]  ;;  %v1254_v51 = vld [vmem:[%s1682_s4 + $0xa] sm:$0x3] }
  0x12   : > { %1304 = vmatprep.subr.bf16.mxu0 %v1419_v1  ;;  %1318 = vmatprep.subr.bf16.mxu1 %v1419_v1  ;;  %v692_v22 = vsel %vm643_vm3, %v1243_v21, 0  ;;  %v639_v23 = vld [vmem:[%s1682_s4] sm:$0x3]  ;;  %v1250_v36 = vld [vmem:[%s1682_s4 + $0x4] sm:$0x3]  ;;  %v925_v57 = vsel %vm643_vm3, %v1254_v51, 0 }
  0x13   : > { %v645_v24 = vsel %vm643_vm3, %v639_v23, 0  ;;  %v1232_v25 = vld [vmem:[%s1680_s2] ss:$0 sm:$0xff]  ;;  %v813_v40 = vsel %vm643_vm3, %v1250_v36, 0  ;;  %v1246_v48 = vld [vmem:[%s1682_s4 + $0x2] sm:$0x3] }
  0x14   : > { %633 = vperm.xlu0 %1397, %v625_v8   ;;  %801 = vperm.xlu1 %1398, %v1249_v10   ;;  %v1233_v27 = vld [vmem:[%s1681_s3] ss:$0 sm:$0xff]  ;;  %v744_v55 = vsel %vm643_vm3, %v1246_v48, 0  ;;  %v1252_v63 = vld [vmem:[%s1682_s4 + $0x6] sm:$0x3] }
  0x15   : > { %1305 = vmatpush3.bf16.msra.mxu0 %v1401_v3  ;;  %1319 = vmatpush3.bf16.msra.mxu1 %v1406_v11  ;;  %v1258_v0 = vld [vmem:[%s1682_s4 + $0xe] sm:$0x3]  ;;  %v869_v4 = vsel %vm643_vm3, %v1252_v63, 0  ;;  %v1256_v10 = vld [vmem:[%s1682_s4 + $0xc] sm:$0x3] }
  0x16   : > { %1306 = vmatprep.subr.bf16.mxu0 %v1419_v1  ;;  %1320 = vmatprep.subr.bf16.mxu1 %v1419_v1 }
  0x19   : > { %1307 = vmatpush3.bf16.msra.mxu0 %v1402_v7  ;;  %1321 = vmatpush3.bf16.msra.mxu1 %v1407_v13  ;;  %v1035_v7 = vsel %vm643_vm3, %v1258_v0, 0 }
  0x1a   : > { %1308 = vmatprep.subr.bf16.mxu0 %v1419_v1  ;;  %1322 = vmatprep.subr.bf16.mxu1 %v1419_v1 }
  0x1d   : > { %1309 = vmatpush3.bf16.msra.mxu0 %v1403_v12  ;;  %1323 = vmatpush3.bf16.msra.mxu1 %v1408_v17 }
  0x1e   : > { %1310 = vmatprep.subr.bf16.mxu0 %v1419_v1  ;;  %1324 = vmatprep.subr.bf16.mxu1 %v1419_v1 }
  0x21   : > { %1311 = vmatpush3.bf16.msra.mxu0 %v1404_v14  ;;  %1325 = vmatpush3.bf16.msra.mxu1 %v1409_v19  ;;  %v981_v14 = vsel %vm643_vm3, %v1256_v10, 0  ;;  %v1260_v19 = vld [vmem:[%s1682_s4 + $0x10] sm:$0x3] }
  0x22   : > { %1332 = vmatprep.subr.bf16.mxu0 %v1419_v1  ;;  %1326 = vmatprep.subr.bf16.mxu1 %v1419_v1  ;;  %v1091_v21 = vsel %vm643_vm3, %v1260_v19, 0 }
  0x24   : > { %1313 = vmatmul.mubr.msk.bf16.vlgmr.msra.gmra.mxu0 %vm439_vm1, %v390_v18 }
  0x25   : > { %1334 = vmatprep.mubr.msk.bf16.mxu0 %vm1420_vm0, %v1419_v1  ;;  %1327 = vmatpush3.bf16.msra.mxu1 %v1410_v20 }
  0x26   : > { %1338 = vmatprep.subr.bf16.mxu1 %v1419_v1  ;;  %1333 = vmatpush3.bf16.msra.mxu0 %v645_v24 }
  0x27   : > { %1344 = vmatprep.subr.bf16.mxu0 %v1419_v1 }
  0x28   : > { %1329 = vmatmul.mubr.msk.bf16.vlgmr.msra.gmra.mxu1 %vm439_vm1, %v390_v18 }
  0x29   : > { %1340 = vmatprep.mubr.msk.bf16.mxu1 %vm1420_vm0, %v1419_v1  ;;  %1339 = vmatpush3.bf16.msra.mxu1 %v692_v22 }
  0x2a   : > { %1350 = vmatprep.subr.bf16.mxu1 %v1419_v1 }
  0x8b   : > { %v1591_v39 = vpop.permute.xlu1 %796  ;;  %v629_v41 = vpop.permute.xlu0 %628 }
  0x8f   : > { %v1598_v44 = vpop.permute.xlu1 %801  ;;  %v634_v47 = vpop.permute.xlu0 %633 }
  0xe4   : > { %v477_v26 = vpop.f32.mrf.mxu0 }
  0xe5   : > { %v491_v28 = vmul.f32 %v1232_v25, %v477_v26 }
  0xe6   : > { %v1314_v29 = vpop.f32.mrf.mxu0 }
  0xe7   : > { %v500_v30 = vadd.f32 %v1233_v27, %v491_v28 }
  0xe8   : > { %v480_v31 = vpop.f32.mrf.mxu0  ;;  %v586_v26 = vpop.f32.mrf.mxu1 }
  0xe9   : > { %v502_v32 = vmax.f32 %v500_v30, 0.0  ;;  %v492_v33 = vmul.f32 %v1232_v25, %v480_v31 }
  0xea   : > { %v1315_v34 = vpop.f32.mrf.mxu0 }
  0xeb   : > { %617 = vst.msk [vmem:[#allocation2 + $0x5] sm:$0xff] %vm616_vm4, %v502_v32  ;;  %v501_v35 = vadd.f32 %v1233_v27, %v492_v33  ;;  %v1330_v27 = vpop.f32.mrf.mxu1 }
  0xed   : > { %v503_v37 = vmax.f32 %v501_v35, 0.0  ;;  %v589_v28 = vpop.f32.mrf.mxu1 }
  0xef   : > { %618 = vst.msk [vmem:[#allocation2 + $0xd] sm:$0xff] %vm616_vm4, %v503_v37  ;;  %v619_v38 = vpack.c.bf16 %v503_v37, %v502_v32  ;;  %v1331_v29 = vpop.f32.mrf.mxu1 }
  0xf1   : > { %1341 = vmatmul.mubr.msk.bf16.vlgmr.msra.gmra.mxu1 %vm616_vm4, %v619_v38 }
  0xf2   : > { %1351 = vmatpush3.bf16.msra.mxu1 %v813_v40  ;;  %1352 = vmatprep.mubr.msk.bf16.mxu1 %vm1420_vm0, %v1419_v1  ;;  %v622_v42 = vld [vmem:[#allocation2] sm:$0xff] }
  0xf3   : > { %1362 = vmatprep.subr.bf16.mxu1 %v1419_v1  ;;  %v789_v43 = vld [vmem:[#allocation2 + $0x2] sm:$0xff]  ;;  %v636_v49 = vmul.f32 %v629_v41, %v622_v42 }
  0xf4   : > { %v804_v52 = vmul.f32 %v1591_v39, %v789_v43  ;;  %v735_v2 = vld [vmem:[#allocation2 + $0x1] sm:$0xff] }
  0xf5   : > { %v858_v8 = vld [vmem:[#allocation2 + $0x4] sm:$0xff] }
  0xf6   : > { %v970_v45 = vld [vmem:[#allocation2 + $0x8] sm:$0xff]  ;;  %v860_v11 = vmul.f32 %v858_v8, %v629_v41  ;;  %v1027_v12 = vld [vmem:[#allocation2 + $0x11] sm:$0xff] }
  0xf7   : > { %v1600_v46 = vld [vmem:[#allocation2 + $0xa] sm:$0xff]  ;;  %v637_v50 = vmul.f32 %v970_v45, %v634_v47  ;;  %v972_v17 = vmul.f32 %v970_v45, %v629_v41  ;;  %v1081_v22 = vld [vmem:[#allocation2 + $0x12] sm:$0xff] }
  0xf8   : > { %v805_v53 = vmul.f32 %v1600_v46, %v1598_v44  ;;  %v914_v58 = vld [vmem:[#allocation2 + $0x6] sm:$0xff]  ;;  %v915_v59 = vld [vmem:[#allocation2 + $0xe] sm:$0xff]  ;;  %v1082_v23 = vmul.f32 %v1600_v46, %v1591_v39  ;;  %v1083_v24 = vmul.f32 %v1081_v22, %v1598_v44 }
  0xf9   : > { %v638_v54 = vpack.c.bf16 %v637_v50, %v636_v49  ;;  %v916_v60 = vmul.f32 %v914_v58, %v1591_v39  ;;  %v917_v61 = vmul.f32 %v915_v59, %v1598_v44  ;;  %v736_v62 = vld [vmem:[#allocation2 + $0x9] sm:$0xff] }
  0xfa   : > { %v806_v56 = vpack.c.bf16 %v805_v53, %v804_v52  ;;  %v737_v3 = vpack.c.bf16 %v736_v62, %v735_v2  ;;  %v859_v5 = vld [vmem:[#allocation2 + $0xc] sm:$0xff]  ;;  %v1028_v16 = vpack.c.bf16 %v1027_v12, %v736_v62  ;;  %v1084_v25 = vpack.c.bf16 %v1083_v24, %v1082_v23 }
  0xfb   : > { %1335 = vmatmul.mubr.msk.bf16.vlgmr.msra.gmra.mxu0 %vm616_vm4, %v638_v54  ;;  %v918_v6 = vpack.c.bf16 %v917_v61, %v916_v60  ;;  %v861_v9 = vmul.f32 %v859_v5, %v634_v47  ;;  %v971_v15 = vld [vmem:[#allocation2 + $0x10] sm:$0xff] }
  0xfc   : > { %1345 = vmatpush3.bf16.msra.mxu0 %v744_v55  ;;  %1353 = vmatmul.mubr.msk.bf16.vlgmr.msra.gmra.mxu1 %vm616_vm4, %v806_v56  ;;  %v973_v18 = vmul.f32 %v971_v15, %v634_v47  ;;  %v1262_v15 = vld [vmem:[%s1683_s5] ss:$0 sm:$0xff] }
  0xfd   : > { %1363 = vmatpush3.bf16.msra.mxu1 %v925_v57  ;;  %1346 = vmatprep.mubr.msk.bf16.mxu0 %vm1420_vm0, %v1419_v1  ;;  %v862_v13 = vpack.c.bf16 %v861_v9, %v860_v11 }
  0xfe   : > { %1356 = vmatprep.subr.bf16.mxu0 %v1419_v1  ;;  %1364 = vmatprep.mubr.msk.bf16.mxu1 %vm1420_vm0, %v1419_v1  ;;  %v974_v20 = vpack.c.bf16 %v973_v18, %v972_v17  ;;  %v1263_v17 = vld [vmem:[%s1684_s6] ss:$0 sm:$0xff] }
  0xff   : > { %1374 = vmatprep.subr.bf16.mxu1 %v1419_v1 }
 0x103   : > { %1347 = vmatmul.mubr.msk.bf16.vlgmr.msra.gmra.mxu0 %vm616_vm4, %v737_v3 }
 0x104   : > { %1357 = vmatpush3.bf16.msra.mxu0 %v869_v4  ;;  %1365 = vmatmul.mubr.msk.bf16.vlgmr.msra.gmra.mxu1 %vm616_vm4, %v918_v6  ;;  %v1241_v6 = vld [vmem:[%s1687_s9] ss:$0 sm:$0xff] }
 0x105   : > { %1375 = vmatpush3.bf16.msra.mxu1 %v1035_v7  ;;  %1358 = vmatprep.mubr.msk.bf16.mxu0 %vm1420_vm0, %v1419_v1  ;;  %v600_v10 = vmul.f32 %v1241_v6, %v586_v26 }
 0x106   : > { %1368 = vmatprep.subr.bf16.mxu0 %v1419_v1  ;;  %1376 = vmatprep.mubr.msk.bf16.mxu1 %vm1420_vm0, %v1419_v1 }
 0x10b   : > { %1359 = vmatmul.mubr.msk.bf16.vlgmr.msra.gmra.mxu0 %vm616_vm4, %v862_v13  ;;  %v1242_v13 = vld [vmem:[%s1688_s10] ss:$0 sm:$0xff] }
 0x10c   : > { %1369 = vmatpush3.bf16.msra.mxu0 %v981_v14  ;;  %1377 = vmatmul.mubr.msk.bf16.vlgmr.msra.gmra.mxu1 %vm616_vm4, %v1028_v16  ;;  %v609_v19 = vadd.f32 %v1242_v13, %v600_v10 }
 0x10d   : > { %1370 = vmatprep.mubr.msk.bf16.mxu0 %vm1420_vm0, %v1419_v1  ;;  %1380 = vmatprep.subr.bf16.mxu0 %v1419_v1 }
 0x10e   : > { %v611_v27 = vmax.f32 %v609_v19, 0.0 }
 0x113   : > { %1371 = vmatmul.mubr.msk.bf16.vlgmr.msra.gmra.mxu0 %vm616_vm4, %v974_v20  ;;  %v601_v20 = vmul.f32 %v1241_v6, %v589_v28 }
 0x114   : > { %1381 = vmatpush3.bf16.msra.mxu0 %v1091_v21  ;;  %1382 = vmatprep.mubr.msk.bf16.mxu0 %vm1420_vm0, %v1419_v1 }
 0x115   : > { %v610_v29 = vadd.f32 %v1242_v13, %v601_v20 }
 0x11b   : > { %1383 = vmatmul.mubr.msk.bf16.vlgmr.msra.gmra.mxu0 %vm616_vm4, %v1084_v25 }
 0x1b1   : > { %v728_v30 = vpop.f32.mrf.mxu1 }
 0x1b3   : > { %v1342_v31 = vpop.f32.mrf.mxu1 }
 0x1b5   : > { %v731_v32 = vpop.f32.mrf.mxu1 }
 0x1b7   : > { %v1343_v33 = vpop.f32.mrf.mxu1 }
 0x1bb   : > { %v681_v34 = vpop.f32.mrf.mxu0 }
 0x1bc   : > { %v849_v35 = vpop.f32.mrf.mxu1  ;;  %v729_v46 = vadd.f32 %v728_v30, %v681_v34  ;;  %v612_v34 = vmax.f32 %v610_v29, 0.0 }
 0x1bd   : > { %v1336_v36 = vpop.f32.mrf.mxu0 }
 0x1be   : > { %v1354_v1 = vpop.f32.mrf.mxu1 }
 0x1bf   : > { %v684_v37 = vpop.f32.mrf.mxu0 }
 0x1c0   : > { %v852_v38 = vpop.f32.mrf.mxu1  ;;  %v732_v52 = vadd.f32 %v731_v32, %v684_v37 }
 0x1c1   : > { %v1337_v39 = vpop.f32.mrf.mxu0 }
 0x1c2   : > { %v1355_v40 = vpop.f32.mrf.mxu1 }
 0x1c3   : > { %v780_v41 = vpop.f32.mrf.mxu0 }
 0x1c4   : > { %v961_v42 = vpop.f32.mrf.mxu1  ;;  %v787_v49 = vadd.f32 %v780_v41, %v729_v46 }
 0x1c5   : > { %v1348_v43 = vpop.f32.mrf.mxu0 }
 0x1c6   : > { %v1366_v44 = vpop.f32.mrf.mxu1  ;;  %v856_v56 = vadd.f32 %v849_v35, %v787_v49 }
 0x1c7   : > { %v783_v45 = vpop.f32.mrf.mxu0 }
 0x1c8   : > { %v964_v47 = vpop.f32.mrf.mxu1  ;;  %v788_v55 = vadd.f32 %v783_v45, %v732_v52 }
 0x1c9   : > { %v1349_v48 = vpop.f32.mrf.mxu0 }
 0x1ca   : > { %v1367_v50 = vpop.f32.mrf.mxu1  ;;  %v857_v62 = vadd.f32 %v852_v38, %v788_v55 }
 0x1cb   : > { %v905_v51 = vpop.f32.mrf.mxu0 }
 0x1cc   : > { %v1071_v53 = vpop.f32.mrf.mxu1  ;;  %v912_v59 = vadd.f32 %v905_v51, %v856_v56 }
 0x1cd   : > { %v1360_v54 = vpop.f32.mrf.mxu0 }
 0x1ce   : > { %v1378_v57 = vpop.f32.mrf.mxu1  ;;  %v968_v3 = vadd.f32 %v961_v42, %v912_v59 }
 0x1cf   : > { %v908_v58 = vpop.f32.mrf.mxu0 }
 0x1d0   : > { %v1074_v60 = vpop.f32.mrf.mxu1  ;;  %v913_v2 = vadd.f32 %v908_v58, %v857_v62 }
 0x1d1   : > { %v1361_v61 = vpop.f32.mrf.mxu0 }
 0x1d2   : > { %v1379_v63 = vpop.f32.mrf.mxu1  ;;  %v969_v8 = vadd.f32 %v964_v47, %v913_v2 }
 0x1d3   : > { %v1017_v0 = vpop.f32.mrf.mxu0 }
 0x1d4   : > { %v1024_v5 = vadd.f32 %v1017_v0, %v968_v3 }
 0x1d5   : > { %v1372_v4 = vpop.f32.mrf.mxu0 }
 0x1d6   : > { %v1078_v12 = vadd.f32 %v1071_v53, %v1024_v5 }
 0x1d7   : > { %v1020_v7 = vpop.f32.mrf.mxu0 }
 0x1d8   : > { %v1025_v11 = vadd.f32 %v1020_v7, %v969_v8 }
 0x1d9   : > { %v1373_v9 = vpop.f32.mrf.mxu0 }
 0x1da   : > { %v1079_v22 = vadd.f32 %v1074_v60, %v1025_v11 }
 0x1db   : > { %v1127_v14 = vpop.f32.mrf.mxu0 }
 0x1dc   : > { %v1134_v16 = vadd.f32 %v1127_v14, %v1078_v12 }
 0x1dd   : > { %v1384_v18 = vpop.f32.mrf.mxu0 }
 0x1de   : > { %v1143_v21 = vmul.f32 %v1262_v15, %v1134_v16 }
 0x1df   : > { %v1130_v23 = vpop.f32.mrf.mxu0 }
 0x1e0   : > { %v1152_v24 = vadd.f32 %v1263_v17, %v1143_v21  ;;  %v1135_v25 = vadd.f32 %v1130_v23, %v1079_v22 }
 0x1e1   : > { %v1385_v26 = vpop.f32.mrf.mxu0 }
 0x1e2   : > { %v1154_v30 = vmax.f32 %v1152_v24, 0.0  ;;  %v1144_v31 = vmul.f32 %v1262_v15, %v1135_v25 }
 0x1e4   : > { %v1156_v32 = vadd.f32 %v1154_v30, %v611_v27  ;;  %v1153_v33 = vadd.f32 %v1263_v17, %v1144_v31 }
 0x1e6   : > { %1159 = vst.msk [vmem:[%s386_s21] sm:$0xff] %vm1158_vm5, %v1156_v32  ;;  %v1155_v28 = vmax.f32 %v1153_v33, 0.0 }
 0x1e8   : > { %v1157_v35 = vadd.f32 %v1155_v28, %v612_v34 }
 0x1ea   : > { %1160 = vst.msk [vmem:[%s386_s21 + $0x8] sm:$0xff] %vm1158_vm5, %v1157_v35 }
 0x1eb PF: > { %s21_s17 = sadd.s32 1, %s1417_s17  }
 0x1ec   : > { %p18_p4 = scmp.ge.s32.totalorder %s21_s17, 4  }
 0x1ee   :  { %20 = sbr.rel (!%p18_p4) target bundleno = 1 (0x1), region = 103 }

// kernel: squeezenet_forward.16
= control target key start
LH: loop header
LB: loop body
LE: loop exit
PB: predicated region body
PF: predicated region fallthrough
CT: control target
= control target key end

     0   :  { %s1173_s27 = smov 0   ;;  %s1328_s0 = inlined_call_operand.vmem [shape: f32[2,16,16], index: 0, kind: input, shape index: {}]   ;;  %s1329_s1 = inlined_call_operand.vmem [shape: bf16[16,4], index: 1, kind: input, shape index: {}]   ;;  %s1330_s2 = inlined_call_operand.vmem [shape: f32[1,4], index: 2, kind: input, shape index: {}]   ;;  %s1331_s3 = inlined_call_operand.vmem [shape: f32[1,4], index: 3, kind: input, shape index: {}]   ;;  %s1332_s4 = inlined_call_operand.vmem [shape: bf16[9,4,16], index: 4, kind: input, shape index: {}]   ;;  %s1333_s5 = inlined_call_operand.vmem [shape: f32[1,16], index: 5, kind: input, shape index: {}]   ;;  %s1334_s6 = inlined_call_operand.vmem [shape: f32[1,16], index: 6, kind: input, shape index: {}]   ;;  %s1335_s7 = inlined_call_operand.vmem [shape: f32[2,16,1], index: 7, kind: input, shape index: {}]   ;;  %s1336_s8 = inlined_call_operand.vmem [shape: f32[2,16,16], index: 8, kind: output, shape index: {}]  }
   0x1 LB: > { %s985_s28 = sadd.s32 4294967295, %s1123_s27   ;;  %p989_p0 = scmp.ge.s32.totalorder %s1123_s27, 1  ;;  %s1123_s27 = sphi %s1173_s27, %s18_s27  }
   0x2   : > { %p262_p1 = scmp.lt.s32.totalorder %s1123_s27, 3 }
   0x4   : > { %p263_p2 = pnand %p989_p0, %p262_p1 }
   0x5   : > { %p296_p3 = scmp.lt.s32.totalorder (!%p263_p2), %s985_s28, 1 }
   0x6   : > { %266 = sbr.rel (%p263_p2) target bundleno = 472 (0x1d8), region = 52 }
   0xb   : > { %v1116_v0 = vld [vmem:[%s1329_s1] sm:$0xff]   ;;  %v1125_v1 = vmov 0.0   ;;  %v1003_v3 = vld [vmem:[%s1335_s7 + $0x10] sm:$0xff]  ;;  %vm1126_vm0 = vmmov 0   ;;  %s1338_s28 = smov (!%p296_p3, %s985_s28), 1  ;;  %v1127_v4 = vmov 0  }
   0xc   : > { %1043 = vmatprep.subr.bf16.mxu0 %v1125_v1  ;;  %v394_v2 = vld [vmem:[%s1335_s7] sm:$0xff]  ;;  %1049 = vmatprep.subr.bf16.mxu1 %v1125_v1  ;;  %s1021_s13 = sshll.u32 %s1338_s28, 4  ;;  %v395_v5 = vld [vmem:[%s1335_s7 + $0x8] sm:$0xff]  ;;  %v1004_v6 = vld [vmem:[%s1335_s7 + $0x18] sm:$0xff]  ;;  %vm318_vm1 = vcmask 130048   ;;  %vm383_vm2 = vcmask 28672  }
   0xd   : > { %1044 = vmatpush3.bf16.msra.mxu0 %v1116_v0  ;;  %1045 = vmatprep.mubr.msk.bf16.mxu0 %vm1126_vm0, %v1125_v1  ;;  %s300_s20 = scalar_lea.vmem %s1328_s0, %s1021_s13  ;;  %384 = vst.msk [vmem:[#allocation2] sm:$0x1f] %vm383_vm2, %v1125_v1  ;;  %385 = vst.msk [vmem:[#allocation2 + $0x15] sm:$0x1f] %vm383_vm2, %v1125_v1  ;;  %v998_v10 = vld [vmem:[%s1332_s4 + $0x8] sm:$0x3]  ;;  %s305_s10 = scalar_lea.vmem %s1336_s8, %s1021_s13 }
   0xe   : > { %1114 = vset.pattern.permute.xlu0 %v1127_v4  ;;  %1115 = vset.pattern.permute.xlu1 %v1127_v4  ;;  %v1211_v7 = vld [vmem:[%s300_s20] sm:$0xff]  ;;  %v1213_v8 = vld [vmem:[%s300_s20 + $0x8] sm:$0xff]  ;;  %vm413_vm3 = vcmask 1041408   ;;  %vm386_vm4 = vcmask 31744  }
   0xf   : > { %398 = vperm.xlu0 %1114, %v394_v2   ;;  %566 = vperm.xlu1 %1115, %v1003_v3   ;;  %v309_v9 = vpack.c.bf16 %v1213_v8, %v1211_v7  ;;  %v462_v11 = vsel %vm413_vm3, %v998_v10, 0  ;;  %v409_v12 = vld [vmem:[%s1332_s4] sm:$0x3]  ;;  %v1005_v25 = vld [vmem:[%s1332_s4 + $0x4] sm:$0x3] }
  0x10   : > { %1055 = vmatprep.subr.bf16.mxu0 %v1125_v1  ;;  %1051 = vmatprep.mubr.msk.bf16.mxu1 %vm1126_vm0, %v1125_v1  ;;  %v415_v13 = vsel %vm413_vm3, %v409_v12, 0  ;;  %v996_v14 = vld [vmem:[%s1330_s2] ss:$0 sm:$0xff]  ;;  %v583_v29 = vsel %vm413_vm3, %v1005_v25, 0  ;;  %v1001_v37 = vld [vmem:[%s1332_s4 + $0x2] sm:$0x3] }
  0x11   : > { %1046 = vmatmul.mubr.msk.bf16.vlgmr.msra.gmra.mxu0 %vm318_vm1, %v309_v9  ;;  %1050 = vmatpush3.bf16.msra.mxu1 %v415_v13  ;;  %v997_v16 = vld [vmem:[%s1331_s3] ss:$0 sm:$0xff]  ;;  %v1009_v40 = vld [vmem:[%s1332_s4 + $0xa] sm:$0x3]  ;;  %v514_v44 = vsel %vm413_vm3, %v1001_v37, 0 }
  0x12   : > { %1057 = vmatprep.mubr.msk.bf16.mxu0 %vm1126_vm0, %v1125_v1  ;;  %1056 = vmatpush3.bf16.msra.mxu0 %v462_v11  ;;  %v695_v46 = vsel %vm413_vm3, %v1009_v40, 0  ;;  %v1007_v52 = vld [vmem:[%s1332_s4 + $0x6] sm:$0x3]  ;;  %v1013_v53 = vld [vmem:[%s1332_s4 + $0xe] sm:$0x3] }
  0x13   : > { %403 = vperm.xlu0 %1114, %v395_v5   ;;  %571 = vperm.xlu1 %1115, %v1004_v6   ;;  %v639_v56 = vsel %vm413_vm3, %v1007_v52, 0  ;;  %v805_v59 = vsel %vm413_vm3, %v1013_v53, 0  ;;  %v1011_v62 = vld [vmem:[%s1332_s4 + $0xc] sm:$0x3]  ;;  %v1015_v10 = vld [vmem:[%s1332_s4 + $0x10] sm:$0x3] }
  0x14   : > { %1067 = vmatprep.subr.bf16.mxu0 %v1125_v1  ;;  %1061 = vmatprep.subr.bf16.mxu1 %v1125_v1  ;;  %v751_v3 = vsel %vm413_vm3, %v1011_v62, 0  ;;  %v861_v12 = vsel %vm413_vm3, %v1015_v10, 0  ;;  %v1017_v62 = vld [vmem:[%s1333_s5] ss:$0 sm:$0xff] }
  0x8a   : > { %v1243_v28 = vpop.permute.xlu1 %566  ;;  %v399_v30 = vpop.permute.xlu0 %398 }
  0x8e   : > { %v1250_v33 = vpop.permute.xlu1 %571  ;;  %v404_v36 = vpop.permute.xlu0 %403 }
  0xd1   : > { %v356_v15 = vpop.f32.mrf.mxu0 }
  0xd2   : > { %v370_v17 = vmul.f32 %v996_v14, %v356_v15 }
  0xd3   : > { %v1047_v18 = vpop.f32.mrf.mxu0 }
  0xd4   : > { %v379_v19 = vadd.f32 %v997_v16, %v370_v17 }
  0xd5   : > { %v359_v20 = vpop.f32.mrf.mxu0 }
  0xd6   : > { %v381_v21 = vmax.f32 %v379_v19, 0.0  ;;  %v371_v22 = vmul.f32 %v996_v14, %v359_v20 }
  0xd7   : > { %v1048_v23 = vpop.f32.mrf.mxu0 }
  0xd8   : > { %387 = vst.msk [vmem:[#allocation2 + $0x5] sm:$0xff] %vm386_vm4, %v381_v21  ;;  %v380_v24 = vadd.f32 %v997_v16, %v371_v22 }
  0xda   : > { %v382_v26 = vmax.f32 %v380_v24, 0.0 }
  0xdc   : > { %388 = vst.msk [vmem:[#allocation2 + $0xd] sm:$0xff] %vm386_vm4, %v382_v26  ;;  %v389_v27 = vpack.c.bf16 %v382_v26, %v381_v21 }
  0xde   : > { %1058 = vmatmul.mubr.msk.bf16.vlgmr.msra.gmra.mxu0 %vm386_vm4, %v389_v27 }
  0xdf   : > { %1068 = vmatpush3.bf16.msra.mxu0 %v583_v29  ;;  %1069 = vmatprep.mubr.msk.bf16.mxu0 %vm1126_vm0, %v1125_v1  ;;  %v392_v31 = vld [vmem:[#allocation2] sm:$0xff] }
  0xe0   : > { %1079 = vmatprep.subr.bf16.mxu0 %v1125_v1  ;;  %v559_v32 = vld [vmem:[#allocation2 + $0x2] sm:$0xff]  ;;  %v406_v38 = vmul.f32 %v399_v30, %v392_v31 }
  0xe1   : > { %v574_v41 = vmul.f32 %v1243_v28, %v559_v32  ;;  %v505_v54 = vld [vmem:[#allocation2 + $0x1] sm:$0xff] }
  0xe2   : > { %v628_v60 = vld [vmem:[#allocation2 + $0x4] sm:$0xff] }
  0xe3   : > { %v740_v34 = vld [vmem:[#allocation2 + $0x8] sm:$0xff]  ;;  %v630_v63 = vmul.f32 %v628_v60, %v399_v30  ;;  %v797_v0 = vld [vmem:[#allocation2 + $0x11] sm:$0xff] }
  0xe4   : > { %v1252_v35 = vld [vmem:[#allocation2 + $0xa] sm:$0xff]  ;;  %v407_v39 = vmul.f32 %v740_v34, %v404_v36  ;;  %v742_v6 = vmul.f32 %v740_v34, %v399_v30  ;;  %v851_v13 = vld [vmem:[#allocation2 + $0x12] sm:$0xff] }
  0xe5   : > { %v575_v42 = vmul.f32 %v1252_v35, %v1250_v33  ;;  %v684_v47 = vld [vmem:[#allocation2 + $0x6] sm:$0xff]  ;;  %v685_v48 = vld [vmem:[#allocation2 + $0xe] sm:$0xff]  ;;  %v852_v14 = vmul.f32 %v1252_v35, %v1243_v28  ;;  %v853_v15 = vmul.f32 %v851_v13, %v1250_v33 }
  0xe6   : > { %v408_v43 = vpack.c.bf16 %v407_v39, %v406_v38  ;;  %v686_v49 = vmul.f32 %v684_v47, %v1243_v28  ;;  %v687_v50 = vmul.f32 %v685_v48, %v1250_v33  ;;  %v506_v51 = vld [vmem:[#allocation2 + $0x9] sm:$0xff] }
  0xe7   : > { %v576_v45 = vpack.c.bf16 %v575_v42, %v574_v41  ;;  %v507_v55 = vpack.c.bf16 %v506_v51, %v505_v54  ;;  %v629_v57 = vld [vmem:[#allocation2 + $0xc] sm:$0xff]  ;;  %v798_v5 = vpack.c.bf16 %v797_v0, %v506_v51  ;;  %v854_v16 = vpack.c.bf16 %v853_v15, %v852_v14  ;;  %v1018_v0 = vld [vmem:[%s1334_s6] ss:$0 sm:$0xff] }
  0xe8   : > { %1052 = vmatmul.mubr.msk.bf16.vlgmr.msra.gmra.mxu1 %vm386_vm4, %v408_v43  ;;  %v688_v58 = vpack.c.bf16 %v687_v50, %v686_v49  ;;  %v631_v61 = vmul.f32 %v629_v57, %v404_v36  ;;  %v741_v4 = vld [vmem:[#allocation2 + $0x10] sm:$0xff] }
  0xe9   : > { %1062 = vmatpush3.bf16.msra.mxu1 %v514_v44  ;;  %1070 = vmatmul.mubr.msk.bf16.vlgmr.msra.gmra.mxu0 %vm386_vm4, %v576_v45  ;;  %v743_v9 = vmul.f32 %v741_v4, %v404_v36 }
  0xea   : > { %1080 = vmatpush3.bf16.msra.mxu0 %v695_v46  ;;  %1063 = vmatprep.mubr.msk.bf16.mxu1 %vm1126_vm0, %v1125_v1  ;;  %v632_v2 = vpack.c.bf16 %v631_v61, %v630_v63 }
  0xeb   : > { %1073 = vmatprep.subr.bf16.mxu1 %v1125_v1  ;;  %1081 = vmatprep.mubr.msk.bf16.mxu0 %vm1126_vm0, %v1125_v1  ;;  %v744_v11 = vpack.c.bf16 %v743_v9, %v742_v6 }
  0xec   : > { %1091 = vmatprep.subr.bf16.mxu0 %v1125_v1 }
  0xf0   : > { %1064 = vmatmul.mubr.msk.bf16.vlgmr.msra.gmra.mxu1 %vm386_vm4, %v507_v55 }
  0xf1   : > { %1074 = vmatpush3.bf16.msra.mxu1 %v639_v56  ;;  %1082 = vmatmul.mubr.msk.bf16.vlgmr.msra.gmra.mxu0 %vm386_vm4, %v688_v58 }
  0xf2   : > { %1092 = vmatpush3.bf16.msra.mxu0 %v805_v59  ;;  %1075 = vmatprep.mubr.msk.bf16.mxu1 %vm1126_vm0, %v1125_v1 }
  0xf3   : > { %1085 = vmatprep.subr.bf16.mxu1 %v1125_v1  ;;  %1093 = vmatprep.mubr.msk.bf16.mxu0 %vm1126_vm0, %v1125_v1 }
  0xf8   : > { %1076 = vmatmul.mubr.msk.bf16.vlgmr.msra.gmra.mxu1 %vm386_vm4, %v632_v2 }
  0xf9   : > { %1086 = vmatpush3.bf16.msra.mxu1 %v751_v3  ;;  %1094 = vmatmul.mubr.msk.bf16.vlgmr.msra.gmra.mxu0 %vm386_vm4, %v798_v5 }
  0xfa   : > { %1087 = vmatprep.mubr.msk.bf16.mxu1 %vm1126_vm0, %v1125_v1  ;;  %1097 = vmatprep.subr.bf16.mxu1 %v1125_v1 }
 0x100   : > { %1088 = vmatmul.mubr.msk.bf16.vlgmr.msra.gmra.mxu1 %vm386_vm4, %v744_v11 }
 0x101   : > { %1098 = vmatpush3.bf16.msra.mxu1 %v861_v12  ;;  %1099 = vmatprep.mubr.msk.bf16.mxu1 %vm1126_vm0, %v1125_v1 }
 0x108   : > { %1100 = vmatmul.mubr.msk.bf16.vlgmr.msra.gmra.mxu1 %vm386_vm4, %v854_v16 }
 0x19e   : > { %v498_v17 = vpop.f32.mrf.mxu0 }
 0x1a0   : > { %v1059_v18 = vpop.f32.mrf.mxu0 }
 0x1a2   : > { %v501_v19 = vpop.f32.mrf.mxu0 }
 0x1a4   : > { %v1060_v20 = vpop.f32.mrf.mxu0 }
 0x1a8   : > { %v451_v21 = vpop.f32.mrf.mxu1 }
 0x1a9   : > { %v619_v22 = vpop.f32.mrf.mxu0  ;;  %v499_v33 = vadd.f32 %v498_v17, %v451_v21 }
 0x1aa   : > { %v1053_v23 = vpop.f32.mrf.mxu1 }
 0x1ab   : > { %v1071_v24 = vpop.f32.mrf.mxu0 }
 0x1ac   : > { %v454_v25 = vpop.f32.mrf.mxu1 }
 0x1ad   : > { %v622_v26 = vpop.f32.mrf.mxu0  ;;  %v502_v39 = vadd.f32 %v501_v19, %v454_v25 }
 0x1ae   : > { %v1054_v27 = vpop.f32.mrf.mxu1 }
 0x1af   : > { %v1072_v1 = vpop.f32.mrf.mxu0 }
 0x1b0   : > { %v550_v29 = vpop.f32.mrf.mxu1 }
 0x1b1   : > { %v731_v30 = vpop.f32.mrf.mxu0  ;;  %v557_v36 = vadd.f32 %v550_v29, %v499_v33 }
 0x1b2   : > { %v1065_v28 = vpop.f32.mrf.mxu1 }
 0x1b3   : > { %v1083_v31 = vpop.f32.mrf.mxu0  ;;  %v626_v43 = vadd.f32 %v619_v22, %v557_v36 }
 0x1b4   : > { %v553_v32 = vpop.f32.mrf.mxu1 }
 0x1b5   : > { %v734_v34 = vpop.f32.mrf.mxu0  ;;  %v558_v42 = vadd.f32 %v553_v32, %v502_v39 }
 0x1b6   : > { %v1066_v35 = vpop.f32.mrf.mxu1 }
 0x1b7   : > { %v1084_v37 = vpop.f32.mrf.mxu0  ;;  %v627_v49 = vadd.f32 %v622_v26, %v558_v42 }
 0x1b8   : > { %v675_v38 = vpop.f32.mrf.mxu1 }
 0x1b9   : > { %v841_v40 = vpop.f32.mrf.mxu0  ;;  %v682_v46 = vadd.f32 %v675_v38, %v626_v43 }
 0x1ba   : > { %v1077_v41 = vpop.f32.mrf.mxu1 }
 0x1bb   : > { %v1095_v44 = vpop.f32.mrf.mxu0  ;;  %v738_v53 = vadd.f32 %v731_v30, %v682_v46 }
 0x1bc   : > { %v678_v45 = vpop.f32.mrf.mxu1 }
 0x1bd   : > { %v844_v47 = vpop.f32.mrf.mxu0  ;;  %v683_v52 = vadd.f32 %v678_v45, %v627_v49 }
 0x1be   : > { %v1078_v48 = vpop.f32.mrf.mxu1 }
 0x1bf   : > { %v1096_v50 = vpop.f32.mrf.mxu0  ;;  %v739_v57 = vadd.f32 %v734_v34, %v683_v52 }
 0x1c0   : > { %v787_v51 = vpop.f32.mrf.mxu1 }
 0x1c1   : > { %v794_v55 = vadd.f32 %v787_v51, %v738_v53 }
 0x1c2   : > { %v1089_v54 = vpop.f32.mrf.mxu1 }
 0x1c3   : > { %v848_v60 = vadd.f32 %v841_v40, %v794_v55 }
 0x1c4   : > { %v790_v56 = vpop.f32.mrf.mxu1 }
 0x1c5   : > { %v795_v59 = vadd.f32 %v790_v56, %v739_v57 }
 0x1c6   : > { %v1090_v58 = vpop.f32.mrf.mxu1 }
 0x1c7   : > { %v849_v4 = vadd.f32 %v844_v47, %v795_v59 }
 0x1c8   : > { %v897_v61 = vpop.f32.mrf.mxu1 }
 0x1c9   : > { %v904_v63 = vadd.f32 %v897_v61, %v848_v60 }
 0x1ca   : > { %v1101_v2 = vpop.f32.mrf.mxu1 }
 0x1cb   : > { %v913_v3 = vmul.f32 %v1017_v62, %v904_v63 }
 0x1cc   : > { %v900_v5 = vpop.f32.mrf.mxu1 }
 0x1cd   : > { %v922_v6 = vadd.f32 %v1018_v0, %v913_v3  ;;  %v905_v9 = vadd.f32 %v900_v5, %v849_v4 }
 0x1ce   : > { %v1102_v10 = vpop.f32.mrf.mxu1 }
 0x1cf   : > { %v924_v11 = vmax.f32 %v922_v6, 0.0  ;;  %v914_v12 = vmul.f32 %v1017_v62, %v905_v9 }
 0x1d1   : > { %v926_v13 = vadd.f32 %v924_v11, %v1211_v7  ;;  %v923_v14 = vadd.f32 %v1018_v0, %v914_v12 }
 0x1d3   : > { %928 = vst.msk [vmem:[%s305_s10] sm:$0xff] %vm318_vm1, %v926_v13  ;;  %v925_v15 = vmax.f32 %v923_v14, 0.0 }
 0x1d5   : > { %v927_v16 = vadd.f32 %v925_v15, %v1213_v8 }
 0x1d7   : > { %929 = vst.msk [vmem:[%s305_s10 + $0x8] sm:$0xff] %vm318_vm1, %v927_v16 }
 0x1d8 PF: > { %s18_s27 = sadd.s32 1, %s1123_s27  }
 0x1d9   : > { %p15_p4 = scmp.ge.s32.totalorder %s18_s27, 4  }
 0x1db   :  { %17 = sbr.rel (!%p15_p4) target bundleno = 1 (0x1), region = 91 }

// kernel: squeezenet_forward.15
= control target key start
LH: loop header
LB: loop body
LE: loop exit
PB: predicated region body
PF: predicated region fallthrough
CT: control target
= control target key end

     0   :  { %s1351_s17 = smov 0   ;;  %s1511_s0 = inlined_call_operand.vmem [shape: f32[2,16,16], index: 0, kind: input, shape index: {}]   ;;  %s1512_s1 = inlined_call_operand.vmem [shape: bf16[16,4], index: 1, kind: input, shape index: {}]   ;;  %s1513_s2 = inlined_call_operand.vmem [shape: f32[1,4], index: 2, kind: input, shape index: {}]   ;;  %s1514_s3 = inlined_call_operand.vmem [shape: f32[1,4], index: 3, kind: input, shape index: {}]   ;;  %s1515_s4 = inlined_call_operand.vmem [shape: bf16[9,4,16], index: 4, kind: input, shape index: {}]   ;;  %s1516_s5 = inlined_call_operand.vmem [shape: f32[1,16], index: 5, kind: input, shape index: {}]   ;;  %s1517_s6 = inlined_call_operand.vmem [shape: f32[1,16], index: 6, kind: input, shape index: {}]   ;;  %s1518_s7 = inlined_call_operand.vmem [shape: f32[2,16,1], index: 7, kind: input, shape index: {}]   ;;  %s1519_s8 = inlined_call_operand.vmem [shape: bf16[16,16], index: 8, kind: input, shape index: {}]   ;;  %s1520_s9 = inlined_call_operand.vmem [shape: f32[1,16], index: 9, kind: input, shape index: {}]   ;;  %s1521_s10 = inlined_call_operand.vmem [shape: f32[1,16], index: 10, kind: input, shape index: {}]   ;;  %s1522_s11 = inlined_call_operand.vmem [shape: f32[2,16,16], index: 11, kind: output, shape index: {}]  }
   0x1 LB: > { %s1135_s18 = sadd.s32 4294967295, %s1286_s17   ;;  %p1139_p0 = scmp.ge.s32.totalorder %s1286_s17, 1  ;;  %s1286_s17 = sphi %s1351_s17, %s21_s17  }
   0x2   : > { %p337_p1 = scmp.lt.s32.totalorder %s1286_s17, 3 }
   0x4   : > { %p338_p2 = pnand %p1139_p0, %p337_p1 }
   0x5   : > { %p377_p3 = scmp.lt.s32.totalorder (!%p338_p2), %s1135_s18, 1 }
   0x6   : > { %341 = sbr.rel (%p338_p2) target bundleno = 472 (0x1d8), region = 64 }
   0xb   : > { %v1278_v0 = vld [vmem:[%s1512_s1] sm:$0xff]   ;;  %v1288_v1 = vmov 0.0   ;;  %v1157_v3 = vld [vmem:[%s1518_s7 + $0x10] sm:$0xff]  ;;  %vm1289_vm0 = vmmov 0   ;;  %s1524_s18 = smov (!%p377_p3, %s1135_s18), 1  ;;  %v1290_v4 = vmov 0  }
   0xc   : > { %1199 = vmatprep.subr.bf16.mxu0 %v1288_v1  ;;  %v544_v2 = vld [vmem:[%s1518_s7] sm:$0xff]  ;;  %1205 = vmatprep.subr.bf16.mxu1 %v1288_v1  ;;  %s1175_s25 = sshll.u32 %s1524_s18, 4  ;;  %v545_v5 = vld [vmem:[%s1518_s7 + $0x8] sm:$0xff]  ;;  %v1158_v6 = vld [vmem:[%s1518_s7 + $0x18] sm:$0xff]  ;;  %vm399_vm1 = vcmask 130048   ;;  %vm533_vm2 = vcmask 28672  }
   0xd   : > { %1200 = vmatpush3.bf16.msra.mxu0 %v1278_v0  ;;  %1201 = vmatprep.mubr.msk.bf16.mxu0 %vm1289_vm0, %v1288_v1  ;;  %s381_s13 = scalar_lea.vmem %s1511_s0, %s1175_s25  ;;  %v1279_v10 = vld [vmem:[%s1519_s8] sm:$0xff]   ;;  %534 = vst.msk [vmem:[#allocation2] sm:$0x1f] %vm533_vm2, %v1288_v1  ;;  %535 = vst.msk [vmem:[#allocation2 + $0x15] sm:$0x1f] %vm533_vm2, %v1288_v1  ;;  %vm563_vm3 = vcmask 1041408   ;;  %s386_s16 = scalar_lea.vmem %s1522_s11, %s1175_s25 }
   0xe   : > { %1276 = vset.pattern.permute.xlu0 %v1290_v4  ;;  %1277 = vset.pattern.permute.xlu1 %v1290_v4  ;;  %v388_v7 = vld [vmem:[%s381_s13] sm:$0xff]  ;;  %v389_v8 = vld [vmem:[%s381_s13 + $0x8] sm:$0xff]  ;;  %vm536_vm4 = vcmask 31744  }
   0xf   : > { %548 = vperm.xlu0 %1276, %v544_v2   ;;  %716 = vperm.xlu1 %1277, %v1157_v3   ;;  %v390_v9 = vpack.c.bf16 %v389_v8, %v388_v7  ;;  %v1152_v11 = vld [vmem:[%s1515_s4 + $0x8] sm:$0x3]  ;;  %v559_v13 = vld [vmem:[%s1515_s4] sm:$0x3]  ;;  %v1159_v26 = vld [vmem:[%s1515_s4 + $0x4] sm:$0x3] }
  0x10   : > { %1207 = vmatprep.mubr.msk.bf16.mxu1 %vm1289_vm0, %v1288_v1  ;;  %1211 = vmatprep.subr.bf16.mxu0 %v1288_v1  ;;  %v612_v12 = vsel %vm563_vm3, %v1152_v11, 0  ;;  %v565_v14 = vsel %vm563_vm3, %v559_v13, 0  ;;  %v1146_v15 = vld [vmem:[%s1513_s2] ss:$0 sm:$0xff]  ;;  %v733_v30 = vsel %vm563_vm3, %v1159_v26, 0 }
  0x11   : > { %1202 = vmatmul.mubr.msk.bf16.vlgmr.msra.gmra.mxu0 %vm399_vm1, %v390_v9  ;;  %1206 = vmatpush3.bf16.msra.mxu1 %v1279_v10  ;;  %v1147_v17 = vld [vmem:[%s1514_s3] ss:$0 sm:$0xff]  ;;  %v1155_v38 = vld [vmem:[%s1515_s4 + $0x2] sm:$0x3]  ;;  %v1163_v41 = vld [vmem:[%s1515_s4 + $0xa] sm:$0x3] }
  0x12   : > { %1213 = vmatprep.mubr.msk.bf16.mxu0 %vm1289_vm0, %v1288_v1  ;;  %1217 = vmatprep.subr.bf16.mxu1 %v1288_v1  ;;  %v664_v45 = vsel %vm563_vm3, %v1155_v38, 0  ;;  %v845_v47 = vsel %vm563_vm3, %v1163_v41, 0  ;;  %v1161_v53 = vld [vmem:[%s1515_s4 + $0x6] sm:$0x3]  ;;  %v1167_v54 = vld [vmem:[%s1515_s4 + $0xe] sm:$0x3] }
  0x13   : > { %553 = vperm.xlu0 %1276, %v545_v5   ;;  %721 = vperm.xlu1 %1277, %v1158_v6   ;;  %v789_v57 = vsel %vm563_vm3, %v1161_v53, 0  ;;  %v955_v60 = vsel %vm563_vm3, %v1167_v54, 0  ;;  %v1165_v63 = vld [vmem:[%s1515_s4 + $0xc] sm:$0x3] }
  0x14   : > { %1208 = vmatmul.mubr.msk.bf16.vlgmr.msra.gmra.mxu1 %vm399_vm1, %v390_v9  ;;  %1212 = vmatpush3.bf16.msra.mxu0 %v565_v14  ;;  %v901_v4 = vsel %vm563_vm3, %v1165_v63, 0  ;;  %v1169_v9 = vld [vmem:[%s1515_s4 + $0x10] sm:$0x3] }
  0x15   : > { %1219 = vmatprep.mubr.msk.bf16.mxu1 %vm1289_vm0, %v1288_v1  ;;  %1218 = vmatpush3.bf16.msra.mxu1 %v612_v12  ;;  %v1011_v11 = vsel %vm563_vm3, %v1169_v9, 0 }
  0x16   : > { %1229 = vmatprep.subr.bf16.mxu1 %v1288_v1  ;;  %1223 = vmatprep.subr.bf16.mxu0 %v1288_v1 }
  0x8a   : > { %v1422_v29 = vpop.permute.xlu1 %716  ;;  %v549_v31 = vpop.permute.xlu0 %548 }
  0x8e   : > { %v1429_v34 = vpop.permute.xlu1 %721  ;;  %v554_v37 = vpop.permute.xlu0 %553 }
  0xd1   : > { %v437_v16 = vpop.f32.mrf.mxu0 }
  0xd2   : > { %v451_v18 = vmul.f32 %v1146_v15, %v437_v16 }
  0xd3   : > { %v1203_v19 = vpop.f32.mrf.mxu0 }
  0xd4   : > { %v460_v20 = vadd.f32 %v1147_v17, %v451_v18  ;;  %v506_v16 = vpop.f32.mrf.mxu1 }
  0xd5   : > { %v440_v21 = vpop.f32.mrf.mxu0 }
  0xd6   : > { %v462_v22 = vmax.f32 %v460_v20, 0.0  ;;  %v452_v23 = vmul.f32 %v1146_v15, %v440_v21 }
  0xd7   : > { %v1204_v24 = vpop.f32.mrf.mxu0 }
  0xd8   : > { %537 = vst.msk [vmem:[#allocation2 + $0x5] sm:$0xff] %vm536_vm4, %v462_v22  ;;  %v461_v25 = vadd.f32 %v1147_v17, %v452_v23  ;;  %v1209_v17 = vpop.f32.mrf.mxu1 }
  0xda   : > { %v463_v27 = vmax.f32 %v461_v25, 0.0  ;;  %v509_v18 = vpop.f32.mrf.mxu1 }
  0xdc   : > { %538 = vst.msk [vmem:[#allocation2 + $0xd] sm:$0xff] %vm536_vm4, %v463_v27  ;;  %v539_v28 = vpack.c.bf16 %v463_v27, %v462_v22  ;;  %v1210_v19 = vpop.f32.mrf.mxu1 }
  0xde   : > { %1220 = vmatmul.mubr.msk.bf16.vlgmr.msra.gmra.mxu1 %vm536_vm4, %v539_v28 }
  0xdf   : > { %1230 = vmatpush3.bf16.msra.mxu1 %v733_v30  ;;  %1231 = vmatprep.mubr.msk.bf16.mxu1 %vm1289_vm0, %v1288_v1  ;;  %v542_v32 = vld [vmem:[#allocation2] sm:$0xff] }
  0xe0   : > { %1241 = vmatprep.subr.bf16.mxu1 %v1288_v1  ;;  %v709_v33 = vld [vmem:[#allocation2 + $0x2] sm:$0xff]  ;;  %v556_v39 = vmul.f32 %v549_v31, %v542_v32 }
  0xe1   : > { %v724_v42 = vmul.f32 %v1422_v29, %v709_v33  ;;  %v655_v55 = vld [vmem:[#allocation2 + $0x1] sm:$0xff] }
  0xe2   : > { %v778_v61 = vld [vmem:[#allocation2 + $0x4] sm:$0xff] }
  0xe3   : > { %v890_v35 = vld [vmem:[#allocation2 + $0x8] sm:$0xff]  ;;  %v780_v0 = vmul.f32 %v778_v61, %v549_v31  ;;  %v947_v2 = vld [vmem:[#allocation2 + $0x11] sm:$0xff] }
  0xe4   : > { %v1431_v36 = vld [vmem:[#allocation2 + $0xa] sm:$0xff]  ;;  %v557_v40 = vmul.f32 %v890_v35, %v554_v37  ;;  %v892_v7 = vmul.f32 %v890_v35, %v549_v31  ;;  %v1001_v12 = vld [vmem:[#allocation2 + $0x12] sm:$0xff] }
  0xe5   : > { %v725_v43 = vmul.f32 %v1431_v36, %v1429_v34  ;;  %v834_v48 = vld [vmem:[#allocation2 + $0x6] sm:$0xff]  ;;  %v835_v49 = vld [vmem:[#allocation2 + $0xe] sm:$0xff]  ;;  %v1002_v13 = vmul.f32 %v1431_v36, %v1422_v29  ;;  %v1003_v14 = vmul.f32 %v1001_v12, %v1429_v34 }
  0xe6   : > { %v558_v44 = vpack.c.bf16 %v557_v40, %v556_v39  ;;  %v836_v50 = vmul.f32 %v834_v48, %v1422_v29  ;;  %v837_v51 = vmul.f32 %v835_v49, %v1429_v34  ;;  %v656_v52 = vld [vmem:[#allocation2 + $0x9] sm:$0xff] }
  0xe7   : > { %v726_v46 = vpack.c.bf16 %v725_v43, %v724_v42  ;;  %v657_v56 = vpack.c.bf16 %v656_v52, %v655_v55  ;;  %v779_v58 = vld [vmem:[#allocation2 + $0xc] sm:$0xff]  ;;  %v948_v6 = vpack.c.bf16 %v947_v2, %v656_v52  ;;  %v1004_v15 = vpack.c.bf16 %v1003_v14, %v1002_v13 }
  0xe8   : > { %1214 = vmatmul.mubr.msk.bf16.vlgmr.msra.gmra.mxu0 %vm536_vm4, %v558_v44  ;;  %v838_v59 = vpack.c.bf16 %v837_v51, %v836_v50  ;;  %v781_v62 = vmul.f32 %v779_v58, %v554_v37  ;;  %v891_v5 = vld [vmem:[#allocation2 + $0x10] sm:$0xff] }
  0xe9   : > { %1224 = vmatpush3.bf16.msra.mxu0 %v664_v45  ;;  %1232 = vmatmul.mubr.msk.bf16.vlgmr.msra.gmra.mxu1 %vm536_vm4, %v726_v46  ;;  %v893_v8 = vmul.f32 %v891_v5, %v554_v37  ;;  %v1171_v5 = vld [vmem:[%s1516_s5] ss:$0 sm:$0xff] }
  0xea   : > { %1242 = vmatpush3.bf16.msra.mxu1 %v845_v47  ;;  %1225 = vmatprep.mubr.msk.bf16.mxu0 %vm1289_vm0, %v1288_v1  ;;  %v782_v3 = vpack.c.bf16 %v781_v62, %v780_v0 }
  0xeb   : > { %1235 = vmatprep.subr.bf16.mxu0 %v1288_v1  ;;  %1243 = vmatprep.mubr.msk.bf16.mxu1 %vm1289_vm0, %v1288_v1  ;;  %v894_v10 = vpack.c.bf16 %v893_v8, %v892_v7  ;;  %v1172_v7 = vld [vmem:[%s1517_s6] ss:$0 sm:$0xff] }
  0xec   : > { %1253 = vmatprep.subr.bf16.mxu1 %v1288_v1 }
  0xf0   : > { %1226 = vmatmul.mubr.msk.bf16.vlgmr.msra.gmra.mxu0 %vm536_vm4, %v657_v56 }
  0xf1   : > { %1236 = vmatpush3.bf16.msra.mxu0 %v789_v57  ;;  %1244 = vmatmul.mubr.msk.bf16.vlgmr.msra.gmra.mxu1 %vm536_vm4, %v838_v59  ;;  %v1150_v59 = vld [vmem:[%s1520_s9] ss:$0 sm:$0xff] }
  0xf2   : > { %1254 = vmatpush3.bf16.msra.mxu1 %v955_v60  ;;  %1237 = vmatprep.mubr.msk.bf16.mxu0 %vm1289_vm0, %v1288_v1  ;;  %v520_v63 = vmul.f32 %v1150_v59, %v506_v16 }
  0xf3   : > { %1247 = vmatprep.subr.bf16.mxu0 %v1288_v1  ;;  %1255 = vmatprep.mubr.msk.bf16.mxu1 %vm1289_vm0, %v1288_v1 }
  0xf8   : > { %1238 = vmatmul.mubr.msk.bf16.vlgmr.msra.gmra.mxu0 %vm536_vm4, %v782_v3  ;;  %v1151_v3 = vld [vmem:[%s1521_s10] ss:$0 sm:$0xff] }
  0xf9   : > { %1248 = vmatpush3.bf16.msra.mxu0 %v901_v4  ;;  %1256 = vmatmul.mubr.msk.bf16.vlgmr.msra.gmra.mxu1 %vm536_vm4, %v948_v6  ;;  %v529_v9 = vadd.f32 %v1151_v3, %v520_v63 }
  0xfa   : > { %1249 = vmatprep.mubr.msk.bf16.mxu0 %vm1289_vm0, %v1288_v1  ;;  %1259 = vmatprep.subr.bf16.mxu0 %v1288_v1 }
  0xfb   : > { %v531_v17 = vmax.f32 %v529_v9, 0.0 }
 0x100   : > { %1250 = vmatmul.mubr.msk.bf16.vlgmr.msra.gmra.mxu0 %vm536_vm4, %v894_v10  ;;  %v521_v10 = vmul.f32 %v1150_v59, %v509_v18 }
 0x101   : > { %1260 = vmatpush3.bf16.msra.mxu0 %v1011_v11  ;;  %1261 = vmatprep.mubr.msk.bf16.mxu0 %vm1289_vm0, %v1288_v1 }
 0x102   : > { %v530_v19 = vadd.f32 %v1151_v3, %v521_v10 }
 0x108   : > { %1262 = vmatmul.mubr.msk.bf16.vlgmr.msra.gmra.mxu0 %vm536_vm4, %v1004_v15 }
 0x19e   : > { %v648_v20 = vpop.f32.mrf.mxu1 }
 0x1a0   : > { %v1221_v21 = vpop.f32.mrf.mxu1 }
 0x1a2   : > { %v651_v22 = vpop.f32.mrf.mxu1 }
 0x1a4   : > { %v1222_v23 = vpop.f32.mrf.mxu1 }
 0x1a8   : > { %v601_v24 = vpop.f32.mrf.mxu0 }
 0x1a9   : > { %v769_v25 = vpop.f32.mrf.mxu1  ;;  %v649_v36 = vadd.f32 %v648_v20, %v601_v24  ;;  %v532_v24 = vmax.f32 %v530_v19, 0.0 }
 0x1aa   : > { %v1215_v26 = vpop.f32.mrf.mxu0 }
 0x1ab   : > { %v1233_v1 = vpop.f32.mrf.mxu1 }
 0x1ac   : > { %v604_v27 = vpop.f32.mrf.mxu0 }
 0x1ad   : > { %v772_v28 = vpop.f32.mrf.mxu1  ;;  %v652_v42 = vadd.f32 %v651_v22, %v604_v27 }
 0x1ae   : > { %v1216_v29 = vpop.f32.mrf.mxu0 }
 0x1af   : > { %v1234_v30 = vpop.f32.mrf.mxu1 }
 0x1b0   : > { %v700_v31 = vpop.f32.mrf.mxu0 }
 0x1b1   : > { %v881_v32 = vpop.f32.mrf.mxu1  ;;  %v707_v39 = vadd.f32 %v700_v31, %v649_v36 }
 0x1b2   : > { %v1227_v33 = vpop.f32.mrf.mxu0 }
 0x1b3   : > { %v1245_v34 = vpop.f32.mrf.mxu1  ;;  %v776_v46 = vadd.f32 %v769_v25, %v707_v39 }
 0x1b4   : > { %v703_v35 = vpop.f32.mrf.mxu0 }
 0x1b5   : > { %v884_v37 = vpop.f32.mrf.mxu1  ;;  %v708_v45 = vadd.f32 %v703_v35, %v652_v42 }
 0x1b6   : > { %v1228_v38 = vpop.f32.mrf.mxu0 }
 0x1b7   : > { %v1246_v40 = vpop.f32.mrf.mxu1  ;;  %v777_v52 = vadd.f32 %v772_v28, %v708_v45 }
 0x1b8   : > { %v825_v41 = vpop.f32.mrf.mxu0 }
 0x1b9   : > { %v991_v43 = vpop.f32.mrf.mxu1  ;;  %v832_v49 = vadd.f32 %v825_v41, %v776_v46 }
 0x1ba   : > { %v1239_v44 = vpop.f32.mrf.mxu0 }
 0x1bb   : > { %v1257_v47 = vpop.f32.mrf.mxu1  ;;  %v888_v56 = vadd.f32 %v881_v32, %v832_v49 }
 0x1bc   : > { %v828_v48 = vpop.f32.mrf.mxu0 }
 0x1bd   : > { %v994_v50 = vpop.f32.mrf.mxu1  ;;  %v833_v55 = vadd.f32 %v828_v48, %v777_v52 }
 0x1be   : > { %v1240_v51 = vpop.f32.mrf.mxu0 }
 0x1bf   : > { %v1258_v53 = vpop.f32.mrf.mxu1  ;;  %v889_v61 = vadd.f32 %v884_v37, %v833_v55 }
 0x1c0   : > { %v937_v54 = vpop.f32.mrf.mxu0 }
 0x1c1   : > { %v944_v58 = vadd.f32 %v937_v54, %v888_v56 }
 0x1c2   : > { %v1251_v57 = vpop.f32.mrf.mxu0 }
 0x1c3   : > { %v998_v2 = vadd.f32 %v991_v43, %v944_v58 }
 0x1c4   : > { %v940_v60 = vpop.f32.mrf.mxu0 }
 0x1c5   : > { %v945_v0 = vadd.f32 %v940_v60, %v889_v61 }
 0x1c6   : > { %v1252_v62 = vpop.f32.mrf.mxu0 }
 0x1c7   : > { %v999_v12 = vadd.f32 %v994_v50, %v945_v0 }
 0x1c8   : > { %v1047_v4 = vpop.f32.mrf.mxu0 }
 0x1c9   : > { %v1054_v6 = vadd.f32 %v1047_v4, %v998_v2 }
 0x1ca   : > { %v1263_v8 = vpop.f32.mrf.mxu0 }
 0x1cb   : > { %v1063_v11 = vmul.f32 %v1171_v5, %v1054_v6 }
 0x1cc   : > { %v1050_v13 = vpop.f32.mrf.mxu0 }
 0x1cd   : > { %v1072_v14 = vadd.f32 %v1172_v7, %v1063_v11  ;;  %v1055_v15 = vadd.f32 %v1050_v13, %v999_v12 }
 0x1ce   : > { %v1264_v16 = vpop.f32.mrf.mxu0 }
 0x1cf   : > { %v1074_v20 = vmax.f32 %v1072_v14, 0.0  ;;  %v1064_v21 = vmul.f32 %v1171_v5, %v1055_v15 }
 0x1d1   : > { %v1076_v22 = vadd.f32 %v1074_v20, %v531_v17  ;;  %v1073_v23 = vadd.f32 %v1172_v7, %v1064_v21 }
 0x1d3   : > { %1078 = vst.msk [vmem:[%s386_s16] sm:$0xff] %vm399_vm1, %v1076_v22  ;;  %v1075_v18 = vmax.f32 %v1073_v23, 0.0 }
 0x1d5   : > { %v1077_v25 = vadd.f32 %v1075_v18, %v532_v24 }
 0x1d7   : > { %1079 = vst.msk [vmem:[%s386_s16 + $0x8] sm:$0xff] %vm399_vm1, %v1077_v25 }
 0x1d8 PF: > { %s21_s17 = sadd.s32 1, %s1286_s17  }
 0x1d9   : > { %p18_p4 = scmp.ge.s32.totalorder %s21_s17, 4  }
 0x1db   :  { %20 = sbr.rel (!%p18_p4) target bundleno = 1 (0x1), region = 103 }

// kernel: squeezenet_forward.20
= control target key start
LH: loop header
LB: loop body
LE: loop exit
PB: predicated region body
PF: predicated region fallthrough
CT: control target
= control target key end

     0   :  { %s293_s6 = smov 0   ;;  %s314_s0 = inlined_call_operand.vmem [shape: f32[2,4,4,32], index: 0, kind: input, shape index: {}]   ;;  %s315_s1 = inlined_call_operand.vmem [shape: f32[2,2,2,32], index: 1, kind: output, shape index: {}]  }
   0x1 LB: > { %s252_s7 = sadd.s32 4294967295, %s280_s6   ;;  %p256_p0 = scmp.ge.s32.totalorder %s280_s6, 1  ;;  %s280_s6 = sphi %s293_s6, %s11_s6  }
   0x2   : > { %p87_p1 = scmp.lt.s32.totalorder %s280_s6, 3 }
   0x4   : > { %p88_p2 = pnand %p256_p0, %p87_p1 }
   0x5   : > { %p107_p3 = scmp.lt.s32.totalorder (!%p88_p2), %s252_s7, 1 }
   0x6   : > { %91 = sbr.rel (%p88_p2) target bundleno = 42 (0x2a), region = 24 }
   0xb   : > { %vm117_vm0 = vcmask 259072   ;;  %v282_v0 = vmov -inf   ;;  %s317_s7 = smov (!%p107_p3, %s252_s7), 1  ;;  %vm129_vm1 = vcmask 257024   ;;  %vm184_vm2 = vcmask 254976  }
   0xc   : > { %118 = vst.msk [vmem:[#allocation2] sm:$0x3f] %vm117_vm0, %v282_v0  ;;  %119 = vst.msk [vmem:[#allocation2 + $0x8] sm:$0x3f] %vm117_vm0, %v282_v0  ;;  %s263_s8 = sshll.u32 %s317_s7, 4  ;;  %s264_s12 = sshll.u32 %s317_s7, 2 }
   0xd   : > { %120 = vst.msk [vmem:[#allocation2 + $0x10] sm:$0x3f] %vm117_vm0, %v282_v0  ;;  %121 = vst.msk [vmem:[#allocation2 + $0x18] sm:$0x3f] %vm117_vm0, %v282_v0  ;;  %s111_s11 = scalar_lea.vmem %s314_s0, %s263_s8  ;;  %s116_s15 = scalar_lea.vmem %s315_s1, %s264_s12 }
   0xe   : > { %122 = vst.msk [vmem:[#allocation2 + $0x20] sm:$0x3f] %vm117_vm0, %v282_v0  ;;  %v124_v1 = vld [vmem:[%s111_s11] sm:$0xf]  ;;  %v125_v2 = vld [vmem:[%s111_s11 + $0x4] sm:$0xf] }
   0xf   : > { %v126_v3 = vld [vmem:[%s111_s11 + $0x8] sm:$0xf]  ;;  %130 = vst.msk [vmem:[#allocation2 + $0x9] sm:$0xf] %vm129_vm1, %v124_v1  ;;  %131 = vst.msk [vmem:[#allocation2 + $0x11] sm:$0xf] %vm129_vm1, %v125_v2 }
  0x10   : > { %132 = vst.msk [vmem:[#allocation2 + $0x19] sm:$0xf] %vm129_vm1, %v126_v3  ;;  %v127_v4 = vld [vmem:[%s111_s11 + $0xc] sm:$0xf] }
  0x11   : > { %133 = vst.msk [vmem:[#allocation2 + $0x21] sm:$0xf] %vm129_vm1, %v127_v4 }
  0x13   : > { %v134_v5 = vld [vmem:[#allocation2] ss:$2 sm:$0x3]  ;;  %v138_v6 = vld [vmem:[#allocation2 + $0x1] ss:$2 sm:$0x3] }
  0x14   : > { %v141_v7 = vmax.f32 %v134_v5, %v138_v6  ;;  %v144_v8 = vld [vmem:[#allocation2 + $0x2] ss:$2 sm:$0x3] }
  0x16   : > { %v147_v9 = vmax.f32 %v141_v7, %v144_v8  ;;  %v149_v10 = vld [vmem:[#allocation2 + $0x8] ss:$2 sm:$0x3]  ;;  %v155_v11 = vld [vmem:[#allocation2 + $0x9] ss:$2 sm:$0x3] }
  0x17   : > { %v161_v13 = vld [vmem:[#allocation2 + $0xa] ss:$2 sm:$0x3]  ;;  %v136_v15 = vld [vmem:[#allocation2 + $0x10] ss:$2 sm:$0x3] }
  0x18   : > { %v152_v12 = vmax.f32 %v147_v9, %v149_v10  ;;  %v140_v16 = vld [vmem:[#allocation2 + $0x11] ss:$2 sm:$0x3]  ;;  %v146_v19 = vld [vmem:[#allocation2 + $0x12] ss:$2 sm:$0x3] }
  0x19   : > { %v142_v17 = vmax.f32 %v136_v15, %v140_v16  ;;  %v151_v20 = vld [vmem:[#allocation2 + $0x18] ss:$2 sm:$0x3]  ;;  %v167_v21 = vld [vmem:[#allocation2 + $0x10] ss:$2 sm:$0x3] }
  0x1a   : > { %v158_v14 = vmax.f32 %v152_v12, %v155_v11  ;;  %v173_v24 = vld [vmem:[#allocation2 + $0x11] ss:$2 sm:$0x3]  ;;  %v157_v27 = vld [vmem:[#allocation2 + $0x19] ss:$2 sm:$0x3] }
  0x1b   : > { %v148_v22 = vmax.f32 %v142_v17, %v146_v19  ;;  %v179_v28 = vld [vmem:[#allocation2 + $0x12] ss:$2 sm:$0x3]  ;;  %v163_v31 = vld [vmem:[#allocation2 + $0x1a] ss:$2 sm:$0x3] }
  0x1c   : > { %v164_v18 = vmax.f32 %v158_v14, %v161_v13  ;;  %v169_v32 = vld [vmem:[#allocation2 + $0x20] ss:$2 sm:$0x3]  ;;  %v175_v35 = vld [vmem:[#allocation2 + $0x21] ss:$2 sm:$0x3] }
  0x1d   : > { %v153_v25 = vmax.f32 %v148_v22, %v151_v20  ;;  %v181_v37 = vld [vmem:[#allocation2 + $0x22] ss:$2 sm:$0x3] }
  0x1e   : > { %v170_v23 = vmax.f32 %v164_v18, %v167_v21 }
  0x1f   : > { %v159_v29 = vmax.f32 %v153_v25, %v157_v27 }
  0x20   : > { %v176_v26 = vmax.f32 %v170_v23, %v173_v24 }
  0x21   : > { %v165_v33 = vmax.f32 %v159_v29, %v163_v31 }
  0x22   : > { %v182_v30 = vmax.f32 %v176_v26, %v179_v28 }
  0x23   : > { %v171_v34 = vmax.f32 %v165_v33, %v169_v32 }
  0x24   : > { %185 = vst.msk [vmem:[%s116_s15] sm:$0x3] %vm184_vm2, %v182_v30 }
  0x25   : > { %v177_v36 = vmax.f32 %v171_v34, %v175_v35 }
  0x27   : > { %v183_v38 = vmax.f32 %v177_v36, %v181_v37 }
  0x29   : > { %186 = vst.msk [vmem:[%s116_s15 + $0x2] sm:$0x3] %vm184_vm2, %v183_v38 }
  0x2a PF: > { %s11_s6 = sadd.s32 1, %s280_s6  }
  0x2b   : > { %p8_p4 = scmp.ge.s32.totalorder %s11_s6, 4  }
  0x2d   :  { %10 = sbr.rel (!%p8_p4) target bundleno = 1 (0x1), region = 71 }

// kernel: squeezenet_forward.18
= control target key start
LH: loop header
LB: loop body
LE: loop exit
PB: predicated region body
PF: predicated region fallthrough
CT: control target
= control target key end

     0   :  { %s1352_s17 = smov 0   ;;  %s1508_s0 = inlined_call_operand.vmem [shape: f32[2,16,16], index: 0, kind: input, shape index: {}]   ;;  %s1509_s1 = inlined_call_operand.vmem [shape: bf16[16,8], index: 1, kind: input, shape index: {}]   ;;  %s1510_s2 = inlined_call_operand.vmem [shape: f32[1,8], index: 2, kind: input, shape index: {}]   ;;  %s1511_s3 = inlined_call_operand.vmem [shape: f32[1,8], index: 3, kind: input, shape index: {}]   ;;  %s1512_s4 = inlined_call_operand.vmem [shape: bf16[9,8,32], index: 4, kind: input, shape index: {}]   ;;  %s1513_s5 = inlined_call_operand.vmem [shape: f32[1,32], index: 5, kind: input, shape index: {}]   ;;  %s1514_s6 = inlined_call_operand.vmem [shape: f32[1,32], index: 6, kind: input, shape index: {}]   ;;  %s1515_s7 = inlined_call_operand.vmem [shape: f32[2,16,1], index: 7, kind: input, shape index: {}]   ;;  %s1516_s8 = inlined_call_operand.vmem [shape: bf16[16,32], index: 8, kind: input, shape index: {}]   ;;  %s1517_s9 = inlined_call_operand.vmem [shape: f32[1,32], index: 9, kind: input, shape index: {}]   ;;  %s1518_s10 = inlined_call_operand.vmem [shape: f32[1,32], index: 10, kind: input, shape index: {}]   ;;  %s1519_s11 = inlined_call_operand.vmem [shape: f32[2,16,32], index: 11, kind: output, shape index: {}]  }
   0x1 LB: > { %s1136_s18 = sadd.s32 4294967295, %s1287_s17   ;;  %p1140_p0 = scmp.ge.s32.totalorder %s1287_s17, 1  ;;  %s1287_s17 = sphi %s1352_s17, %s21_s17  }
   0x2   : > { %p337_p1 = scmp.lt.s32.totalorder %s1287_s17, 3 }
   0x4   : > { %p338_p2 = pnand %p1140_p0, %p337_p1 }
   0x5   : > { %p377_p3 = scmp.lt.s32.totalorder (!%p338_p2), %s1136_s18, 1 }
   0x6   : > { %341 = sbr.rel (%p338_p2) target bundleno = 472 (0x1d8), region = 64 }
   0xb   : > { %v1279_v0 = vld [vmem:[%s1509_s1] sm:$0xff]   ;;  %v1289_v1 = vmov 0.0   ;;  %v1158_v3 = vld [vmem:[%s1515_s7 + $0x10] sm:$0xff]  ;;  %vm1290_vm0 = vmmov 0   ;;  %s1521_s18 = smov (!%p377_p3, %s1136_s18), 1  ;;  %v1291_v4 = vmov 0  }
   0xc   : > { %1200 = vmatprep.subr.bf16.mxu0 %v1289_v1  ;;  %v544_v2 = vld [vmem:[%s1515_s7] sm:$0xff]  ;;  %1206 = vmatprep.subr.bf16.mxu1 %v1289_v1  ;;  %s1176_s25 = sshll.u32 %s1521_s18, 4  ;;  %v545_v5 = vld [vmem:[%s1515_s7 + $0x8] sm:$0xff]  ;;  %v1159_v6 = vld [vmem:[%s1515_s7 + $0x18] sm:$0xff]  ;;  %vm399_vm1 = vcmask 130048   ;;  %vm533_vm2 = vcmask 61440  }
   0xd   : > { %1201 = vmatpush3.bf16.msra.mxu0 %v1279_v0  ;;  %1202 = vmatprep.mubr.msk.bf16.mxu0 %vm1290_vm0, %v1289_v1  ;;  %s381_s13 = scalar_lea.vmem %s1508_s0, %s1176_s25  ;;  %v1280_v10 = vld [vmem:[%s1516_s8] sm:$0xff]   ;;  %534 = vst.msk [vmem:[#allocation2] sm:$0x1f] %vm533_vm2, %v1289_v1  ;;  %535 = vst.msk [vmem:[#allocation2 + $0x15] sm:$0x1f] %vm533_vm2, %v1289_v1  ;;  %vm563_vm3 = vcmask 1043456   ;;  %s386_s16 = scalar_lea.vmem %s1519_s11, %s1176_s25 }
   0xe   : > { %1277 = vset.pattern.permute.xlu0 %v1291_v4  ;;  %1278 = vset.pattern.permute.xlu1 %v1291_v4  ;;  %v388_v7 = vld [vmem:[%s381_s13] sm:$0xff]  ;;  %v389_v8 = vld [vmem:[%s381_s13 + $0x8] sm:$0xff]  ;;  %v1153_v11 = vld [vmem:[%s1512_s4 + $0x10] sm:$0xf]  ;;  %vm536_vm4 = vcmask 64512   ;;  %vm1078_vm5 = vcmask 261120  }
   0xf   : > { %548 = vperm.xlu0 %1277, %v544_v2   ;;  %716 = vperm.xlu1 %1278, %v1158_v3   ;;  %v390_v9 = vpack.c.bf16 %v389_v8, %v388_v7  ;;  %v612_v12 = vsel %vm563_vm3, %v1153_v11, 0  ;;  %v559_v13 = vld [vmem:[%s1512_s4] sm:$0xf]  ;;  %v1160_v26 = vld [vmem:[%s1512_s4 + $0x8] sm:$0xf] }
  0x10   : > { %1208 = vmatprep.mubr.msk.bf16.mxu1 %vm1290_vm0, %v1289_v1  ;;  %1212 = vmatprep.subr.bf16.mxu0 %v1289_v1  ;;  %v565_v14 = vsel %vm563_vm3, %v559_v13, 0  ;;  %v1147_v15 = vld [vmem:[%s1510_s2] ss:$0 sm:$0xff]  ;;  %v733_v30 = vsel %vm563_vm3, %v1160_v26, 0  ;;  %v1156_v38 = vld [vmem:[%s1512_s4 + $0x4] sm:$0xf] }
  0x11   : > { %1203 = vmatmul.mubr.msk.bf16.vlgmr.msra.gmra.mxu0 %vm399_vm1, %v390_v9  ;;  %1207 = vmatpush3.bf16.msra.mxu1 %v1280_v10  ;;  %v1148_v17 = vld [vmem:[%s1511_s3] ss:$0 sm:$0xff]  ;;  %v1164_v41 = vld [vmem:[%s1512_s4 + $0x14] sm:$0xf]  ;;  %v664_v45 = vsel %vm563_vm3, %v1156_v38, 0 }
  0x12   : > { %1214 = vmatprep.mubr.msk.bf16.mxu0 %vm1290_vm0, %v1289_v1  ;;  %1218 = vmatprep.subr.bf16.mxu1 %v1289_v1  ;;  %v845_v47 = vsel %vm563_vm3, %v1164_v41, 0  ;;  %v1162_v53 = vld [vmem:[%s1512_s4 + $0xc] sm:$0xf]  ;;  %v1168_v54 = vld [vmem:[%s1512_s4 + $0x1c] sm:$0xf] }
  0x13   : > { %553 = vperm.xlu0 %1277, %v545_v5   ;;  %721 = vperm.xlu1 %1278, %v1159_v6   ;;  %v789_v57 = vsel %vm563_vm3, %v1162_v53, 0  ;;  %v955_v60 = vsel %vm563_vm3, %v1168_v54, 0  ;;  %v1166_v63 = vld [vmem:[%s1512_s4 + $0x18] sm:$0xf] }
  0x14   : > { %1209 = vmatmul.mubr.msk.bf16.vlgmr.msra.gmra.mxu1 %vm399_vm1, %v390_v9  ;;  %1213 = vmatpush3.bf16.msra.mxu0 %v565_v14  ;;  %v901_v4 = vsel %vm563_vm3, %v1166_v63, 0  ;;  %v1170_v9 = vld [vmem:[%s1512_s4 + $0x20] sm:$0xf] }
  0x15   : > { %1220 = vmatprep.mubr.msk.bf16.mxu1 %vm1290_vm0, %v1289_v1  ;;  %1219 = vmatpush3.bf16.msra.mxu1 %v612_v12  ;;  %v1011_v11 = vsel %vm563_vm3, %v1170_v9, 0 }
  0x16   : > { %1230 = vmatprep.subr.bf16.mxu1 %v1289_v1  ;;  %1224 = vmatprep.subr.bf16.mxu0 %v1289_v1 }
  0x8a   : > { %v1421_v29 = vpop.permute.xlu1 %716  ;;  %v549_v31 = vpop.permute.xlu0 %548 }
  0x8e   : > { %v1428_v34 = vpop.permute.xlu1 %721  ;;  %v554_v37 = vpop.permute.xlu0 %553 }
  0xd1   : > { %v437_v16 = vpop.f32.mrf.mxu0 }
  0xd2   : > { %v451_v18 = vmul.f32 %v1147_v15, %v437_v16 }
  0xd3   : > { %v1204_v19 = vpop.f32.mrf.mxu0 }
  0xd4   : > { %v460_v20 = vadd.f32 %v1148_v17, %v451_v18  ;;  %v506_v16 = vpop.f32.mrf.mxu1 }
  0xd5   : > { %v440_v21 = vpop.f32.mrf.mxu0 }
  0xd6   : > { %v462_v22 = vmax.f32 %v460_v20, 0.0  ;;  %v452_v23 = vmul.f32 %v1147_v15, %v440_v21 }
  0xd7   : > { %v1205_v24 = vpop.f32.mrf.mxu0 }
  0xd8   : > { %537 = vst.msk [vmem:[#allocation2 + $0x5] sm:$0xff] %vm536_vm4, %v462_v22  ;;  %v461_v25 = vadd.f32 %v1148_v17, %v452_v23  ;;  %v1210_v17 = vpop.f32.mrf.mxu1 }
  0xda   : > { %v463_v27 = vmax.f32 %v461_v25, 0.0  ;;  %v509_v18 = vpop.f32.mrf.mxu1 }
  0xdc   : > { %538 = vst.msk [vmem:[#allocation2 + $0xd] sm:$0xff] %vm536_vm4, %v463_v27  ;;  %v539_v28 = vpack.c.bf16 %v463_v27, %v462_v22  ;;  %v1211_v19 = vpop.f32.mrf.mxu1 }
  0xde   : > { %1221 = vmatmul.mubr.msk.bf16.vlgmr.msra.gmra.mxu1 %vm536_vm4, %v539_v28 }
  0xdf   : > { %1231 = vmatpush3.bf16.msra.mxu1 %v733_v30  ;;  %1232 = vmatprep.mubr.msk.bf16.mxu1 %vm1290_vm0, %v1289_v1  ;;  %v542_v32 = vld [vmem:[#allocation2] sm:$0xff] }
  0xe0   : > { %1242 = vmatprep.subr.bf16.mxu1 %v1289_v1  ;;  %v709_v33 = vld [vmem:[#allocation2 + $0x2] sm:$0xff]  ;;  %v556_v39 = vmul.f32 %v549_v31, %v542_v32 }
  0xe1   : > { %v724_v42 = vmul.f32 %v1421_v29, %v709_v33  ;;  %v655_v55 = vld [vmem:[#allocation2 + $0x1] sm:$0xff] }
  0xe2   : > { %v778_v61 = vld [vmem:[#allocation2 + $0x4] sm:$0xff] }
  0xe3   : > { %v890_v35 = vld [vmem:[#allocation2 + $0x8] sm:$0xff]  ;;  %v780_v0 = vmul.f32 %v778_v61, %v549_v31  ;;  %v947_v2 = vld [vmem:[#allocation2 + $0x11] sm:$0xff] }
  0xe4   : > { %v1430_v36 = vld [vmem:[#allocation2 + $0xa] sm:$0xff]  ;;  %v557_v40 = vmul.f32 %v890_v35, %v554_v37  ;;  %v892_v7 = vmul.f32 %v890_v35, %v549_v31  ;;  %v1001_v12 = vld [vmem:[#allocation2 + $0x12] sm:$0xff] }
  0xe5   : > { %v725_v43 = vmul.f32 %v1430_v36, %v1428_v34  ;;  %v834_v48 = vld [vmem:[#allocation2 + $0x6] sm:$0xff]  ;;  %v835_v49 = vld [vmem:[#allocation2 + $0xe] sm:$0xff]  ;;  %v1002_v13 = vmul.f32 %v1430_v36, %v1421_v29  ;;  %v1003_v14 = vmul.f32 %v1001_v12, %v1428_v34 }
  0xe6   : > { %v558_v44 = vpack.c.bf16 %v557_v40, %v556_v39  ;;  %v836_v50 = vmul.f32 %v834_v48, %v1421_v29  ;;  %v837_v51 = vmul.f32 %v835_v49, %v1428_v34  ;;  %v656_v52 = vld [vmem:[#allocation2 + $0x9] sm:$0xff] }
  0xe7   : > { %v726_v46 = vpack.c.bf16 %v725_v43, %v724_v42  ;;  %v657_v56 = vpack.c.bf16 %v656_v52, %v655_v55  ;;  %v779_v58 = vld [vmem:[#allocation2 + $0xc] sm:$0xff]  ;;  %v948_v6 = vpack.c.bf16 %v947_v2, %v656_v52  ;;  %v1004_v15 = vpack.c.bf16 %v1003_v14, %v1002_v13 }
  0xe8   : > { %1215 = vmatmul.mubr.msk.bf16.vlgmr.msra.gmra.mxu0 %vm536_vm4, %v558_v44  ;;  %v838_v59 = vpack.c.bf16 %v837_v51, %v836_v50  ;;  %v781_v62 = vmul.f32 %v779_v58, %v554_v37  ;;  %v891_v5 = vld [vmem:[#allocation2 + $0x10] sm:$0xff] }
  0xe9   : > { %1225 = vmatpush3.bf16.msra.mxu0 %v664_v45  ;;  %1233 = vmatmul.mubr.msk.bf16.vlgmr.msra.gmra.mxu1 %vm536_vm4, %v726_v46  ;;  %v893_v8 = vmul.f32 %v891_v5, %v554_v37  ;;  %v1172_v5 = vld [vmem:[%s1513_s5] ss:$0 sm:$0xff] }
  0xea   : > { %1243 = vmatpush3.bf16.msra.mxu1 %v845_v47  ;;  %1226 = vmatprep.mubr.msk.bf16.mxu0 %vm1290_vm0, %v1289_v1  ;;  %v782_v3 = vpack.c.bf16 %v781_v62, %v780_v0 }
  0xeb   : > { %1236 = vmatprep.subr.bf16.mxu0 %v1289_v1  ;;  %1244 = vmatprep.mubr.msk.bf16.mxu1 %vm1290_vm0, %v1289_v1  ;;  %v894_v10 = vpack.c.bf16 %v893_v8, %v892_v7  ;;  %v1173_v7 = vld [vmem:[%s1514_s6] ss:$0 sm:$0xff] }
  0xec   : > { %1254 = vmatprep.subr.bf16.mxu1 %v1289_v1 }
  0xf0   : > { %1227 = vmatmul.mubr.msk.bf16.vlgmr.msra.gmra.mxu0 %vm536_vm4, %v657_v56 }
  0xf1   : > { %1237 = vmatpush3.bf16.msra.mxu0 %v789_v57  ;;  %1245 = vmatmul.mubr.msk.bf16.vlgmr.msra.gmra.mxu1 %vm536_vm4, %v838_v59  ;;  %v1151_v59 = vld [vmem:[%s1517_s9] ss:$0 sm:$0xff] }
  0xf2   : > { %1255 = vmatpush3.bf16.msra.mxu1 %v955_v60  ;;  %1238 = vmatprep.mubr.msk.bf16.mxu0 %vm1290_vm0, %v1289_v1  ;;  %v520_v63 = vmul.f32 %v1151_v59, %v506_v16 }
  0xf3   : > { %1248 = vmatprep.subr.bf16.mxu0 %v1289_v1  ;;  %1256 = vmatprep.mubr.msk.bf16.mxu1 %vm1290_vm0, %v1289_v1 }
  0xf8   : > { %1239 = vmatmul.mubr.msk.bf16.vlgmr.msra.gmra.mxu0 %vm536_vm4, %v782_v3  ;;  %v1152_v3 = vld [vmem:[%s1518_s10] ss:$0 sm:$0xff] }
  0xf9   : > { %1249 = vmatpush3.bf16.msra.mxu0 %v901_v4  ;;  %1257 = vmatmul.mubr.msk.bf16.vlgmr.msra.gmra.mxu1 %vm536_vm4, %v948_v6  ;;  %v529_v9 = vadd.f32 %v1152_v3, %v520_v63 }
  0xfa   : > { %1250 = vmatprep.mubr.msk.bf16.mxu0 %vm1290_vm0, %v1289_v1  ;;  %1260 = vmatprep.subr.bf16.mxu0 %v1289_v1 }
  0xfb   : > { %v531_v17 = vmax.f32 %v529_v9, 0.0 }
 0x100   : > { %1251 = vmatmul.mubr.msk.bf16.vlgmr.msra.gmra.mxu0 %vm536_vm4, %v894_v10  ;;  %v521_v10 = vmul.f32 %v1151_v59, %v509_v18 }
 0x101   : > { %1261 = vmatpush3.bf16.msra.mxu0 %v1011_v11  ;;  %1262 = vmatprep.mubr.msk.bf16.mxu0 %vm1290_vm0, %v1289_v1 }
 0x102   : > { %v530_v19 = vadd.f32 %v1152_v3, %v521_v10 }
 0x108   : > { %1263 = vmatmul.mubr.msk.bf16.vlgmr.msra.gmra.mxu0 %vm536_vm4, %v1004_v15 }
 0x19e   : > { %v648_v20 = vpop.f32.mrf.mxu1 }
 0x1a0   : > { %v1222_v21 = vpop.f32.mrf.mxu1 }
 0x1a2   : > { %v651_v22 = vpop.f32.mrf.mxu1 }
 0x1a4   : > { %v1223_v23 = vpop.f32.mrf.mxu1 }
 0x1a8   : > { %v601_v24 = vpop.f32.mrf.mxu0 }
 0x1a9   : > { %v769_v25 = vpop.f32.mrf.mxu1  ;;  %v649_v36 = vadd.f32 %v648_v20, %v601_v24  ;;  %v532_v24 = vmax.f32 %v530_v19, 0.0 }
 0x1aa   : > { %v1216_v26 = vpop.f32.mrf.mxu0 }
 0x1ab   : > { %v1234_v1 = vpop.f32.mrf.mxu1 }
 0x1ac   : > { %v604_v27 = vpop.f32.mrf.mxu0 }
 0x1ad   : > { %v772_v28 = vpop.f32.mrf.mxu1  ;;  %v652_v42 = vadd.f32 %v651_v22, %v604_v27 }
 0x1ae   : > { %v1217_v29 = vpop.f32.mrf.mxu0 }
 0x1af   : > { %v1235_v30 = vpop.f32.mrf.mxu1 }
 0x1b0   : > { %v700_v31 = vpop.f32.mrf.mxu0 }
 0x1b1   : > { %v881_v32 = vpop.f32.mrf.mxu1  ;;  %v707_v39 = vadd.f32 %v700_v31, %v649_v36 }
 0x1b2   : > { %v1228_v33 = vpop.f32.mrf.mxu0 }
 0x1b3   : > { %v1246_v34 = vpop.f32.mrf.mxu1  ;;  %v776_v46 = vadd.f32 %v769_v25, %v707_v39 }
 0x1b4   : > { %v703_v35 = vpop.f32.mrf.mxu0 }
 0x1b5   : > { %v884_v37 = vpop.f32.mrf.mxu1  ;;  %v708_v45 = vadd.f32 %v703_v35, %v652_v42 }
 0x1b6   : > { %v1229_v38 = vpop.f32.mrf.mxu0 }
 0x1b7   : > { %v1247_v40 = vpop.f32.mrf.mxu1  ;;  %v777_v52 = vadd.f32 %v772_v28, %v708_v45 }
 0x1b8   : > { %v825_v41 = vpop.f32.mrf.mxu0 }
 0x1b9   : > { %v991_v43 = vpop.f32.mrf.mxu1  ;;  %v832_v49 = vadd.f32 %v825_v41, %v776_v46 }
 0x1ba   : > { %v1240_v44 = vpop.f32.mrf.mxu0 }
 0x1bb   : > { %v1258_v47 = vpop.f32.mrf.mxu1  ;;  %v888_v56 = vadd.f32 %v881_v32, %v832_v49 }
 0x1bc   : > { %v828_v48 = vpop.f32.mrf.mxu0 }
 0x1bd   : > { %v994_v50 = vpop.f32.mrf.mxu1  ;;  %v833_v55 = vadd.f32 %v828_v48, %v777_v52 }
 0x1be   : > { %v1241_v51 = vpop.f32.mrf.mxu0 }
 0x1bf   : > { %v1259_v53 = vpop.f32.mrf.mxu1  ;;  %v889_v61 = vadd.f32 %v884_v37, %v833_v55 }
 0x1c0   : > { %v937_v54 = vpop.f32.mrf.mxu0 }
 0x1c1   : > { %v944_v58 = vadd.f32 %v937_v54, %v888_v56 }
 0x1c2   : > { %v1252_v57 = vpop.f32.mrf.mxu0 }
 0x1c3   : > { %v998_v2 = vadd.f32 %v991_v43, %v944_v58 }
 0x1c4   : > { %v940_v60 = vpop.f32.mrf.mxu0 }
 0x1c5   : > { %v945_v0 = vadd.f32 %v940_v60, %v889_v61 }
 0x1c6   : > { %v1253_v62 = vpop.f32.mrf.mxu0 }
 0x1c7   : > { %v999_v12 = vadd.f32 %v994_v50, %v945_v0 }
 0x1c8   : > { %v1047_v4 = vpop.f32.mrf.mxu0 }
 0x1c9   : > { %v1054_v6 = vadd.f32 %v1047_v4, %v998_v2 }
 0x1ca   : > { %v1264_v8 = vpop.f32.mrf.mxu0 }
 0x1cb   : > { %v1063_v11 = vmul.f32 %v1172_v5, %v1054_v6 }
 0x1cc   : > { %v1050_v13 = vpop.f32.mrf.mxu0 }
 0x1cd   : > { %v1072_v14 = vadd.f32 %v1173_v7, %v1063_v11  ;;  %v1055_v15 = vadd.f32 %v1050_v13, %v999_v12 }
 0x1ce   : > { %v1265_v16 = vpop.f32.mrf.mxu0 }
 0x1cf   : > { %v1074_v20 = vmax.f32 %v1072_v14, 0.0  ;;  %v1064_v21 = vmul.f32 %v1172_v5, %v1055_v15 }
 0x1d1   : > { %v1076_v22 = vadd.f32 %v1074_v20, %v531_v17  ;;  %v1073_v23 = vadd.f32 %v1173_v7, %v1064_v21 }
 0x1d3   : > { %1079 = vst.msk [vmem:[%s386_s16] sm:$0xff] %vm1078_vm5, %v1076_v22  ;;  %v1075_v18 = vmax.f32 %v1073_v23, 0.0 }
 0x1d5   : > { %v1077_v25 = vadd.f32 %v1075_v18, %v532_v24 }
 0x1d7   : > { %1080 = vst.msk [vmem:[%s386_s16 + $0x8] sm:$0xff] %vm1078_vm5, %v1077_v25 }
 0x1d8 PF: > { %s21_s17 = sadd.s32 1, %s1287_s17  }
 0x1d9   : > { %p18_p4 = scmp.ge.s32.totalorder %s21_s17, 4  }
 0x1db   :  { %20 = sbr.rel (!%p18_p4) target bundleno = 1 (0x1), region = 103 }

// kernel: squeezenet_forward.19
= control target key start
LH: loop header
LB: loop body
LE: loop exit
PB: predicated region body
PF: predicated region fallthrough
CT: control target
= control target key end

     0   :  { %s1377_s17 = smov 0   ;;  %s1545_s0 = inlined_call_operand.vmem [shape: f32[2,16,32], index: 0, kind: input, shape index: {}]   ;;  %s1546_s1 = inlined_call_operand.vmem [shape: bf16[32,8], index: 1, kind: input, shape index: {}]   ;;  %s1547_s2 = inlined_call_operand.vmem [shape: f32[1,8], index: 2, kind: input, shape index: {}]   ;;  %s1548_s3 = inlined_call_operand.vmem [shape: f32[1,8], index: 3, kind: input, shape index: {}]   ;;  %s1549_s4 = inlined_call_operand.vmem [shape: bf16[9,8,32], index: 4, kind: input, shape index: {}]   ;;  %s1550_s5 = inlined_call_operand.vmem [shape: f32[1,32], index: 5, kind: input, shape index: {}]   ;;  %s1551_s6 = inlined_call_operand.vmem [shape: f32[1,32], index: 6, kind: input, shape index: {}]   ;;  %s1552_s7 = inlined_call_operand.vmem [shape: f32[2,16,1], index: 7, kind: input, shape index: {}]   ;;  %s1553_s8 = inlined_call_operand.vmem [shape: bf16[32,32], index: 8, kind: input, shape index: {}]   ;;  %s1554_s9 = inlined_call_operand.vmem [shape: f32[1,32], index: 9, kind: input, shape index: {}]   ;;  %s1555_s10 = inlined_call_operand.vmem [shape: f32[1,32], index: 10, kind: input, shape index: {}]   ;;  %s1556_s11 = inlined_call_operand.vmem [shape: f32[2,16,32], index: 11, kind: output, shape index: {}]  }
   0x1 LB: > { %s1151_s18 = sadd.s32 4294967295, %s1312_s17   ;;  %p1155_p0 = scmp.ge.s32.totalorder %s1312_s17, 1  ;;  %s1312_s17 = sphi %s1377_s17, %s21_s17  }
   0x2   : > { %p337_p1 = scmp.lt.s32.totalorder %s1312_s17, 3 }
   0x4   : > { %p338_p2 = pnand %p1155_p0, %p337_p1 }
   0x5   : > { %p377_p3 = scmp.lt.s32.totalorder (!%p338_p2), %s1151_s18, 1 }
   0x6   : > { %341 = sbr.rel (%p338_p2) target bundleno = 475 (0x1db), region = 64 }
   0xb   : > { %v1302_v0 = vld [vmem:[%s1546_s1 + $0x8] sm:$0xff]   ;;  %v1314_v1 = vmov 0.0   ;;  %v1303_v2 = vld [vmem:[%s1546_s1] sm:$0xff]   ;;  %vm1315_vm0 = vmmov 0   ;;  %v1175_v4 = vld [vmem:[%s1552_s7 + $0x10] sm:$0xff]  ;;  %v1316_v5 = vmov 0  }
   0xc   : > { %1219 = vmatprep.subr.bf16.mxu0 %v1314_v1  ;;  %1227 = vmatprep.subr.bf16.mxu1 %v1314_v1  ;;  %v560_v3 = vld [vmem:[%s1552_s7] sm:$0xff]  ;;  %s1558_s18 = smov (!%p377_p3, %s1151_s18), 1  ;;  %v1304_v6 = vld [vmem:[%s1553_s8 + $0x8] sm:$0xff]   ;;  %v1176_v8 = vld [vmem:[%s1552_s7 + $0x18] sm:$0xff]  ;;  %vm407_vm1 = vcmask 261120   ;;  %vm549_vm2 = vcmask 61440  }
   0xd   : > { %1220 = vmatpush3.bf16.msra.mxu0 %v1302_v0  ;;  %1223 = vmatprep.mubr.msk.bf16.mxu0 %vm1315_vm0, %v1314_v1  ;;  %v561_v7 = vld [vmem:[%s1552_s7 + $0x8] sm:$0xff]  ;;  %s1193_s12 = sshll.u32 %s1558_s18, 4  ;;  %v1305_v12 = vld [vmem:[%s1553_s8] sm:$0xff]   ;;  %550 = vst.msk [vmem:[#allocation2] sm:$0x1f] %vm549_vm2, %v1314_v1  ;;  %vm579_vm3 = vcmask 1043456  }
   0xe   : > { %1221 = vmatprep.subr.bf16.mxu0 %v1314_v1  ;;  %1300 = vset.pattern.permute.xlu0 %v1316_v5  ;;  %s381_s19 = scalar_lea.vmem %s1545_s0, %s1193_s12  ;;  %551 = vst.msk [vmem:[#allocation2 + $0x15] sm:$0x1f] %vm549_vm2, %v1314_v1  ;;  %v1170_v13 = vld [vmem:[%s1549_s4 + $0x10] sm:$0xf]  ;;  %v575_v15 = vld [vmem:[%s1549_s4] sm:$0xf]  ;;  %s386_s22 = scalar_lea.vmem %s1556_s11, %s1193_s12 }
   0xf   : > { %564 = vperm.xlu0 %1300, %v560_v3   ;;  %1301 = vset.pattern.permute.xlu1 %v1316_v5  ;;  %v388_v9 = vld [vmem:[%s381_s19] sm:$0xff]  ;;  %v389_v10 = vld [vmem:[%s381_s19 + $0x8] sm:$0xff]  ;;  %v628_v14 = vsel %vm579_vm3, %v1170_v13, 0  ;;  %v581_v16 = vsel %vm579_vm3, %v575_v15, 0  ;;  %vm552_vm4 = vcmask 64512  }
  0x10   : > { %732 = vperm.xlu1 %1301, %v1175_v4   ;;  %1231 = vmatprep.mubr.msk.bf16.mxu1 %vm1315_vm0, %v1314_v1  ;;  %v390_v11 = vpack.c.bf16 %v389_v10, %v388_v9  ;;  %v1163_v17 = vld [vmem:[%s1547_s2] ss:$0 sm:$0xff]  ;;  %v1177_v28 = vld [vmem:[%s1549_s4 + $0x8] sm:$0xf]  ;;  %v1173_v40 = vld [vmem:[%s1549_s4 + $0x4] sm:$0xf] }
  0x11   : > { %1222 = vmatpush3.bf16.msra.mxu0 %v1303_v2  ;;  %1228 = vmatpush3.bf16.msra.mxu1 %v1304_v6  ;;  %v1164_v19 = vld [vmem:[%s1548_s3] ss:$0 sm:$0xff]  ;;  %v749_v32 = vsel %vm579_vm3, %v1177_v28, 0  ;;  %v1181_v43 = vld [vmem:[%s1549_s4 + $0x14] sm:$0xf]  ;;  %v680_v47 = vsel %vm579_vm3, %v1173_v40, 0 }
  0x12   : > { %1229 = vmatprep.subr.bf16.mxu1 %v1314_v1  ;;  %1235 = vmatprep.subr.bf16.mxu0 %v1314_v1  ;;  %v861_v49 = vsel %vm579_vm3, %v1181_v43, 0  ;;  %v1179_v55 = vld [vmem:[%s1549_s4 + $0xc] sm:$0xf]  ;;  %v1185_v56 = vld [vmem:[%s1549_s4 + $0x1c] sm:$0xf] }
  0x13   : > { %569 = vperm.xlu0 %1300, %v561_v7   ;;  %v805_v59 = vsel %vm579_vm3, %v1179_v55, 0  ;;  %v971_v62 = vsel %vm579_vm3, %v1185_v56, 0  ;;  %v1183_v2 = vld [vmem:[%s1549_s4 + $0x18] sm:$0xf] }
  0x14   : > { %737 = vperm.xlu1 %1301, %v1176_v8   ;;  %1224 = vmatmul.mubr.msk.bf16.vlgmr.msra.gmra.mxu0 %vm407_vm1, %v390_v11  ;;  %v917_v6 = vsel %vm579_vm3, %v1183_v2, 0 }
  0x15   : > { %1237 = vmatprep.mubr.msk.bf16.mxu0 %vm1315_vm0, %v1314_v1  ;;  %1230 = vmatpush3.bf16.msra.mxu1 %v1305_v12 }
  0x16   : > { %1241 = vmatprep.subr.bf16.mxu1 %v1314_v1  ;;  %1236 = vmatpush3.bf16.msra.mxu0 %v581_v16 }
  0x17   : > { %1247 = vmatprep.subr.bf16.mxu0 %v1314_v1 }
  0x18   : > { %1232 = vmatmul.mubr.msk.bf16.vlgmr.msra.gmra.mxu1 %vm407_vm1, %v390_v11  ;;  %v1187_v11 = vld [vmem:[%s1549_s4 + $0x20] sm:$0xf] }
  0x19   : > { %1243 = vmatprep.mubr.msk.bf16.mxu1 %vm1315_vm0, %v1314_v1  ;;  %1242 = vmatpush3.bf16.msra.mxu1 %v628_v14  ;;  %v1027_v13 = vsel %vm579_vm3, %v1187_v11, 0 }
  0x1a   : > { %1253 = vmatprep.subr.bf16.mxu1 %v1314_v1 }
  0x8a   : > { %v565_v33 = vpop.permute.xlu0 %564 }
  0x8b   : > { %v1456_v31 = vpop.permute.xlu1 %732 }
  0x8e   : > { %v570_v39 = vpop.permute.xlu0 %569 }
  0x8f   : > { %v1463_v36 = vpop.permute.xlu1 %737 }
  0xd4   : > { %v445_v18 = vpop.f32.mrf.mxu0 }
  0xd5   : > { %v459_v20 = vmul.f32 %v1163_v17, %v445_v18 }
  0xd6   : > { %v1225_v21 = vpop.f32.mrf.mxu0 }
  0xd7   : > { %v468_v22 = vadd.f32 %v1164_v19, %v459_v20 }
  0xd8   : > { %v448_v23 = vpop.f32.mrf.mxu0  ;;  %v522_v18 = vpop.f32.mrf.mxu1 }
  0xd9   : > { %v470_v24 = vmax.f32 %v468_v22, 0.0  ;;  %v460_v25 = vmul.f32 %v1163_v17, %v448_v23 }
  0xda   : > { %v1226_v26 = vpop.f32.mrf.mxu0 }
  0xdb   : > { %553 = vst.msk [vmem:[#allocation2 + $0x5] sm:$0xff] %vm552_vm4, %v470_v24  ;;  %v469_v27 = vadd.f32 %v1164_v19, %v460_v25  ;;  %v1233_v19 = vpop.f32.mrf.mxu1 }
  0xdd   : > { %v471_v29 = vmax.f32 %v469_v27, 0.0  ;;  %v525_v20 = vpop.f32.mrf.mxu1 }
  0xdf   : > { %554 = vst.msk [vmem:[#allocation2 + $0xd] sm:$0xff] %vm552_vm4, %v471_v29  ;;  %v555_v30 = vpack.c.bf16 %v471_v29, %v470_v24  ;;  %v1234_v21 = vpop.f32.mrf.mxu1 }
  0xe1   : > { %1244 = vmatmul.mubr.msk.bf16.vlgmr.msra.gmra.mxu1 %vm552_vm4, %v555_v30 }
  0xe2   : > { %1254 = vmatpush3.bf16.msra.mxu1 %v749_v32  ;;  %1255 = vmatprep.mubr.msk.bf16.mxu1 %vm1315_vm0, %v1314_v1  ;;  %v558_v34 = vld [vmem:[#allocation2] sm:$0xff] }
  0xe3   : > { %1265 = vmatprep.subr.bf16.mxu1 %v1314_v1  ;;  %v725_v35 = vld [vmem:[#allocation2 + $0x2] sm:$0xff]  ;;  %v572_v41 = vmul.f32 %v565_v33, %v558_v34 }
  0xe4   : > { %v740_v44 = vmul.f32 %v1456_v31, %v725_v35  ;;  %v671_v57 = vld [vmem:[#allocation2 + $0x1] sm:$0xff] }
  0xe5   : > { %v794_v63 = vld [vmem:[#allocation2 + $0x4] sm:$0xff] }
  0xe6   : > { %v906_v37 = vld [vmem:[#allocation2 + $0x8] sm:$0xff]  ;;  %v796_v3 = vmul.f32 %v794_v63, %v565_v33  ;;  %v963_v4 = vld [vmem:[#allocation2 + $0x11] sm:$0xff] }
  0xe7   : > { %v1465_v38 = vld [vmem:[#allocation2 + $0xa] sm:$0xff]  ;;  %v573_v42 = vmul.f32 %v906_v37, %v570_v39  ;;  %v908_v9 = vmul.f32 %v906_v37, %v565_v33  ;;  %v1017_v14 = vld [vmem:[#allocation2 + $0x12] sm:$0xff] }
  0xe8   : > { %v741_v45 = vmul.f32 %v1465_v38, %v1463_v36  ;;  %v850_v50 = vld [vmem:[#allocation2 + $0x6] sm:$0xff]  ;;  %v851_v51 = vld [vmem:[#allocation2 + $0xe] sm:$0xff]  ;;  %v1018_v15 = vmul.f32 %v1465_v38, %v1456_v31  ;;  %v1019_v16 = vmul.f32 %v1017_v14, %v1463_v36 }
  0xe9   : > { %v574_v46 = vpack.c.bf16 %v573_v42, %v572_v41  ;;  %v852_v52 = vmul.f32 %v850_v50, %v1456_v31  ;;  %v853_v53 = vmul.f32 %v851_v51, %v1463_v36  ;;  %v672_v54 = vld [vmem:[#allocation2 + $0x9] sm:$0xff] }
  0xea   : > { %v742_v48 = vpack.c.bf16 %v741_v45, %v740_v44  ;;  %v673_v58 = vpack.c.bf16 %v672_v54, %v671_v57  ;;  %v795_v60 = vld [vmem:[#allocation2 + $0xc] sm:$0xff]  ;;  %v964_v8 = vpack.c.bf16 %v963_v4, %v672_v54  ;;  %v1020_v17 = vpack.c.bf16 %v1019_v16, %v1018_v15 }
  0xeb   : > { %1238 = vmatmul.mubr.msk.bf16.vlgmr.msra.gmra.mxu0 %vm552_vm4, %v574_v46  ;;  %v854_v61 = vpack.c.bf16 %v853_v53, %v852_v52  ;;  %v797_v0 = vmul.f32 %v795_v60, %v570_v39  ;;  %v907_v7 = vld [vmem:[#allocation2 + $0x10] sm:$0xff] }
  0xec   : > { %1248 = vmatpush3.bf16.msra.mxu0 %v680_v47  ;;  %1256 = vmatmul.mubr.msk.bf16.vlgmr.msra.gmra.mxu1 %vm552_vm4, %v742_v48  ;;  %v909_v10 = vmul.f32 %v907_v7, %v570_v39  ;;  %v1189_v7 = vld [vmem:[%s1550_s5] ss:$0 sm:$0xff] }
  0xed   : > { %1266 = vmatpush3.bf16.msra.mxu1 %v861_v49  ;;  %1249 = vmatprep.mubr.msk.bf16.mxu0 %vm1315_vm0, %v1314_v1  ;;  %v798_v5 = vpack.c.bf16 %v797_v0, %v796_v3 }
  0xee   : > { %1259 = vmatprep.subr.bf16.mxu0 %v1314_v1  ;;  %1267 = vmatprep.mubr.msk.bf16.mxu1 %vm1315_vm0, %v1314_v1  ;;  %v910_v12 = vpack.c.bf16 %v909_v10, %v908_v9  ;;  %v1190_v9 = vld [vmem:[%s1551_s6] ss:$0 sm:$0xff] }
  0xef   : > { %1277 = vmatprep.subr.bf16.mxu1 %v1314_v1 }
  0xf3   : > { %1250 = vmatmul.mubr.msk.bf16.vlgmr.msra.gmra.mxu0 %vm552_vm4, %v673_v58 }
  0xf4   : > { %1260 = vmatpush3.bf16.msra.mxu0 %v805_v59  ;;  %1268 = vmatmul.mubr.msk.bf16.vlgmr.msra.gmra.mxu1 %vm552_vm4, %v854_v61  ;;  %v1168_v61 = vld [vmem:[%s1554_s9] ss:$0 sm:$0xff] }
  0xf5   : > { %1278 = vmatpush3.bf16.msra.mxu1 %v971_v62  ;;  %1261 = vmatprep.mubr.msk.bf16.mxu0 %vm1315_vm0, %v1314_v1  ;;  %v536_v2 = vmul.f32 %v1168_v61, %v522_v18 }
  0xf6   : > { %1271 = vmatprep.subr.bf16.mxu0 %v1314_v1  ;;  %1279 = vmatprep.mubr.msk.bf16.mxu1 %vm1315_vm0, %v1314_v1 }
  0xfb   : > { %1262 = vmatmul.mubr.msk.bf16.vlgmr.msra.gmra.mxu0 %vm552_vm4, %v798_v5  ;;  %v1169_v5 = vld [vmem:[%s1555_s10] ss:$0 sm:$0xff] }
  0xfc   : > { %1272 = vmatpush3.bf16.msra.mxu0 %v917_v6  ;;  %1280 = vmatmul.mubr.msk.bf16.vlgmr.msra.gmra.mxu1 %vm552_vm4, %v964_v8  ;;  %v545_v11 = vadd.f32 %v1169_v5, %v536_v2 }
  0xfd   : > { %1273 = vmatprep.mubr.msk.bf16.mxu0 %vm1315_vm0, %v1314_v1  ;;  %1283 = vmatprep.subr.bf16.mxu0 %v1314_v1 }
  0xfe   : > { %v547_v19 = vmax.f32 %v545_v11, 0.0 }
 0x103   : > { %1274 = vmatmul.mubr.msk.bf16.vlgmr.msra.gmra.mxu0 %vm552_vm4, %v910_v12  ;;  %v537_v12 = vmul.f32 %v1168_v61, %v525_v20 }
 0x104   : > { %1284 = vmatpush3.bf16.msra.mxu0 %v1027_v13  ;;  %1285 = vmatprep.mubr.msk.bf16.mxu0 %vm1315_vm0, %v1314_v1 }
 0x105   : > { %v546_v21 = vadd.f32 %v1169_v5, %v537_v12 }
 0x10b   : > { %1286 = vmatmul.mubr.msk.bf16.vlgmr.msra.gmra.mxu0 %vm552_vm4, %v1020_v17 }
 0x1a1   : > { %v664_v22 = vpop.f32.mrf.mxu1 }
 0x1a3   : > { %v1245_v23 = vpop.f32.mrf.mxu1 }
 0x1a5   : > { %v667_v24 = vpop.f32.mrf.mxu1 }
 0x1a7   : > { %v1246_v25 = vpop.f32.mrf.mxu1 }
 0x1ab   : > { %v617_v26 = vpop.f32.mrf.mxu0 }
 0x1ac   : > { %v785_v27 = vpop.f32.mrf.mxu1  ;;  %v665_v38 = vadd.f32 %v664_v22, %v617_v26  ;;  %v548_v26 = vmax.f32 %v546_v21, 0.0 }
 0x1ad   : > { %v1239_v28 = vpop.f32.mrf.mxu0 }
 0x1ae   : > { %v1257_v1 = vpop.f32.mrf.mxu1 }
 0x1af   : > { %v620_v29 = vpop.f32.mrf.mxu0 }
 0x1b0   : > { %v788_v30 = vpop.f32.mrf.mxu1  ;;  %v668_v44 = vadd.f32 %v667_v24, %v620_v29 }
 0x1b1   : > { %v1240_v31 = vpop.f32.mrf.mxu0 }
 0x1b2   : > { %v1258_v32 = vpop.f32.mrf.mxu1 }
 0x1b3   : > { %v716_v33 = vpop.f32.mrf.mxu0 }
 0x1b4   : > { %v897_v34 = vpop.f32.mrf.mxu1  ;;  %v723_v41 = vadd.f32 %v716_v33, %v665_v38 }
 0x1b5   : > { %v1251_v35 = vpop.f32.mrf.mxu0 }
 0x1b6   : > { %v1269_v36 = vpop.f32.mrf.mxu1  ;;  %v792_v48 = vadd.f32 %v785_v27, %v723_v41 }
 0x1b7   : > { %v719_v37 = vpop.f32.mrf.mxu0 }
 0x1b8   : > { %v900_v39 = vpop.f32.mrf.mxu1  ;;  %v724_v47 = vadd.f32 %v719_v37, %v668_v44 }
 0x1b9   : > { %v1252_v40 = vpop.f32.mrf.mxu0 }
 0x1ba   : > { %v1270_v42 = vpop.f32.mrf.mxu1  ;;  %v793_v54 = vadd.f32 %v788_v30, %v724_v47 }
 0x1bb   : > { %v841_v43 = vpop.f32.mrf.mxu0 }
 0x1bc   : > { %v1007_v45 = vpop.f32.mrf.mxu1  ;;  %v848_v51 = vadd.f32 %v841_v43, %v792_v48 }
 0x1bd   : > { %v1263_v46 = vpop.f32.mrf.mxu0 }
 0x1be   : > { %v1281_v49 = vpop.f32.mrf.mxu1  ;;  %v904_v58 = vadd.f32 %v897_v34, %v848_v51 }
 0x1bf   : > { %v844_v50 = vpop.f32.mrf.mxu0 }
 0x1c0   : > { %v1010_v52 = vpop.f32.mrf.mxu1  ;;  %v849_v57 = vadd.f32 %v844_v50, %v793_v54 }
 0x1c1   : > { %v1264_v53 = vpop.f32.mrf.mxu0 }
 0x1c2   : > { %v1282_v55 = vpop.f32.mrf.mxu1  ;;  %v905_v63 = vadd.f32 %v900_v39, %v849_v57 }
 0x1c3   : > { %v953_v56 = vpop.f32.mrf.mxu0 }
 0x1c4   : > { %v960_v60 = vadd.f32 %v953_v56, %v904_v58 }
 0x1c5   : > { %v1275_v59 = vpop.f32.mrf.mxu0 }
 0x1c6   : > { %v1014_v4 = vadd.f32 %v1007_v45, %v960_v60 }
 0x1c7   : > { %v956_v62 = vpop.f32.mrf.mxu0 }
 0x1c8   : > { %v961_v3 = vadd.f32 %v956_v62, %v905_v63 }
 0x1c9   : > { %v1276_v0 = vpop.f32.mrf.mxu0 }
 0x1ca   : > { %v1015_v14 = vadd.f32 %v1010_v52, %v961_v3 }
 0x1cb   : > { %v1063_v6 = vpop.f32.mrf.mxu0 }
 0x1cc   : > { %v1070_v8 = vadd.f32 %v1063_v6, %v1014_v4 }
 0x1cd   : > { %v1287_v10 = vpop.f32.mrf.mxu0 }
 0x1ce   : > { %v1079_v13 = vmul.f32 %v1189_v7, %v1070_v8 }
 0x1cf   : > { %v1066_v15 = vpop.f32.mrf.mxu0 }
 0x1d0   : > { %v1088_v16 = vadd.f32 %v1190_v9, %v1079_v13  ;;  %v1071_v17 = vadd.f32 %v1066_v15, %v1015_v14 }
 0x1d1   : > { %v1288_v18 = vpop.f32.mrf.mxu0 }
 0x1d2   : > { %v1090_v22 = vmax.f32 %v1088_v16, 0.0  ;;  %v1080_v23 = vmul.f32 %v1189_v7, %v1071_v17 }
 0x1d4   : > { %v1092_v24 = vadd.f32 %v1090_v22, %v547_v19  ;;  %v1089_v25 = vadd.f32 %v1190_v9, %v1080_v23 }
 0x1d6   : > { %1094 = vst.msk [vmem:[%s386_s22] sm:$0xff] %vm407_vm1, %v1092_v24  ;;  %v1091_v20 = vmax.f32 %v1089_v25, 0.0 }
 0x1d8   : > { %v1093_v27 = vadd.f32 %v1091_v20, %v548_v26 }
 0x1da   : > { %1095 = vst.msk [vmem:[%s386_s22 + $0x8] sm:$0xff] %vm407_vm1, %v1093_v27 }
 0x1db PF: > { %s21_s17 = sadd.s32 1, %s1312_s17  }
 0x1dc   : > { %p18_p4 = scmp.ge.s32.totalorder %s21_s17, 4  }
 0x1de   :  { %20 = sbr.rel (!%p18_p4) target bundleno = 1 (0x1), region = 103 }

// kernel: squeezenet_forward.23
= control target key start
LH: loop header
LB: loop body
LE: loop exit
PB: predicated region body
PF: predicated region fallthrough
CT: control target
= control target key end

     0   :  { %8 = vsyncpa [#allocation3], 0  ;;  %s567_s0 = inlined_call_operand.vmem [shape: f32[2,4,32], index: 0, kind: input, shape index: {}]   ;;  %s568_s1 = inlined_call_operand.vmem [shape: bf16[32,16], index: 1, kind: input, shape index: {}]   ;;  %s569_s2 = inlined_call_operand.vmem [shape: f32[1,16], index: 2, kind: input, shape index: {}]   ;;  %s570_s3 = inlined_call_operand.hbm [shape: f32[2,1,16], index: 3, kind: output, shape index: {}]  }
   0x1   :  { %10 = vsyncpa [#allocation3 + $0x1], 0  ;;  %s459_s12 = smov 0   ;;  %s461_s13 = smov 0  }
   0x2   :  { %s463_s14 = smov 0   ;;  %s465_s15 = smov 0  }
   0x3 LB: > { %s480_s16 = sadd.s32 4294967295, %s434_s15   ;;  %s309_s17 = sadd.s32 4294967294, %s434_s15   ;;  %s434_s15 = sphi %s465_s15, %s576_s15   ;;  %s430_s14 = sphi %s463_s14, %s575_s14   ;;  %s426_s13 = sphi %s461_s13, %s574_s13   ;;  %s422_s12 = sphi %s459_s12, %s573_s12  }
   0x4   : > { %s484_s18 = sadd.s32 1, %s434_s15   ;;  %s91_s19 = sadd.s32 1, %s430_s14 }
   0x5   : > { %s88_s20 = ssub.s32 %s434_s15, %s484_s18  ;;  %p101_p0 = scmp.ne.s32.totalorder %s430_s14, %s426_s13 }
   0x6   : > { %p89_p1 = scmp.eq.s32.totalorder %s88_s20, 0  ;;  %p102_p2 = scmp.eq.s32.totalorder %s480_s16, 1 }
   0x7   : > { %p107_p3 = scmp.ne.s32.totalorder %s426_s13, %s422_s12  ;;  %p108_p4 = scmp.eq.s32.totalorder %s309_s17, 1 }
   0x8   : > { %s495_s21 = scalar_select %p89_p1, %s430_s14, %s91_s19  }
   0x9   : > { %p497_p5 = por %p102_p2, %p101_p0  ;;  %p501_p6 = por %p108_p4, %p107_p3 }
   0xa   : > { %p312_p7 = scmp.ge.s32.totalorder %s434_s15, 1  ;;  %p139_p8 = scmp.lt.s32.totalorder %s434_s15, 3 }
   0xc   : > { %p140_p9 = pnand %p312_p7, %p139_p8 }
   0xd   : > { %p161_p10 = scmp.lt.s32.totalorder (!%p140_p9), %s480_s16, 1  ;;  %s159_s6 = sand.u32 (!%p140_p9), 1, %s426_s13  }
   0xe   : > { %143 = sbr.rel (%p140_p9) target bundleno = 250 (0xfa), region = 32  ;;  %s317_s9 = sshll.u32 (!%p140_p9), %s480_s16, 4 }
   0xf   : > { %s160_s10 = scalar_lea.vmem (!%p140_p9), [#allocation2], %s159_s6  ;;  %s526_s20 = scalar_lea.hbm (!%p140_p9), %s570_s3, %s317_s9 }
  0x10   : > { %s254_s11 = sshll.u32 (!%p140_p9), %s160_s10, 4  ;;  %s242_s24 = scalar_lea.sflag (!%p140_p9), [#allocation3], %s159_s6  ;;  %s528_s11 = int_to_ptr.vmem [resolvable:$true] %s254_s11 }
  0x11   : > { %s438_s25 = smov (!%p140_p9), [#allocation2]  }
  0x12   : > { %s378_s26 = sshll.u32 (!%p140_p9), %s438_s25, 4  ;;  %s379_s26 = int_to_ptr.vmem [resolvable:$false] %s378_s26 }
  0x13   : > { %v372_v0 = vld [vmem:[%s568_s1 + $0x8] sm:$0xff]   ;;  %v436_v1 = vmov 0.0   ;;  %v373_v2 = vld [vmem:[%s568_s1] sm:$0xff]   ;;  %vm437_vm0 = vmmov 0   ;;  %s162_s28 = scalar_select %p161_p10, %s480_s16, 1  ;;  %vm167_vm1 = vcmask 257024  }
  0x14   : > { %323 = vmatprep.subr.bf16.mxu0 %v436_v1  ;;  %327 = vmatprep.mubr.msk.bf16.mxu0 %vm437_vm0, %v436_v1  ;;  %vm195_vm2 = vcmask 261120   ;;  %v182_v13 = vld [vmem:[%s569_s2] sm:$0x1]  ;;  %vm239_vm3 = vcmask 122880   ;;  %s374_s16 = scalar_lea.vmem %s528_s11, 16  ;;  %s380_s27 = scalar_lea.vmem %s379_s26, 32 }
  0x15   : > { %324 = vmatpush3.bf16.msra.mxu0 %v372_v0  ;;  %s313_s29 = sshll.u32 %s162_s28, 2  ;;  %p375_p11 = scmp.ne.s32.totalorder %s528_s11, %s374_s16 }
  0x16   : > { %325 = vmatprep.subr.bf16.mxu0 %v436_v1  ;;  %s164_s5 = scalar_lea.vmem %s567_s0, %s313_s29  ;;  %p381_p0 = scmp.lt.s32.totalorder %s528_s11, %s379_s26 }
  0x17   : > { %v166_v3 = vld [vmem:[%s164_s5] sm:$0xf]  ;;  %p376_p12 = pnand %p375_p11, %p497_p5  ;;  %p382_p1 = scmp.lt.s32.totalorder %s380_s27, %s374_s16 }
  0x18   : > { %v168_v4 = vsel %vm167_vm1, %v166_v3, 0.0 }
  0x19   : > { %326 = vmatpush3.bf16.msra.mxu0 %v373_v2  ;;  %v169_v5 = vrot.slane %v168_v4, 4  ;;  %p377_p13 = pneg %p376_p12  ;;  %p383_p2 = por %p382_p1, %p381_p0 }
  0x1b   : > { %v170_v6 = vadd.f32 %v169_v5, %v168_v4  ;;  %p384_p3 = pnand %p383_p2, %p377_p13 }
  0x1d   : > { %v171_v7 = vrot.slane %v170_v6, 2 }
  0x1f   : > { %v172_v8 = vadd.f32 %v171_v7, %v170_v6 }
  0x21   : > { %v173_v9 = vrot.slane %v172_v8, 1 }
  0x23   : > { %v174_v10 = vadd.f32 %v173_v9, %v172_v8 }
  0x25   : > { %v176_v11 = vmul.f32 0.25, %v174_v10 }
  0x27   : > { %v177_v12 = vpack.c.bf16 %v176_v11, %v176_v11 }
  0x29   : > { %328 = vmatmul.mubr.msk.bf16.vlgmr.msra.gmra.mxu0 %vm195_vm2, %v177_v12 }
  0xe9   : > { %v233_v14 = vpop.f32.mrf.mxu0 }
  0xea   : > { %v234_v15 = vadd.f32 %v233_v14, %v182_v13 }
  0xeb   : > { %v329_v16 = vpop.f32.mrf.mxu0 }
  0xec   : > { %240 = vst.msk [vmem:[%s160_s10] sm:$0x1] %vm239_vm3, %v234_v15 }
  0xed   : > { %v236_v17 = vpop.f32.mrf.mxu0 }
  0xee   : > { %387 = shalt.err (!%p384_p3)
}
  0xef   : > { %s388_s28 = scalar_lea.hbm %s526_s20, 16  ;;  %s392_s4 = scalar_lea.hbm %s570_s3, 32 }
  0xf0   : > { %p389_p4 = scmp.ne.s32.totalorder %s526_s20, %s388_s28  ;;  %p393_p9 = scmp.lt.s32.totalorder %s526_s20, %s570_s3 }
  0xf1   : > { %p394_p10 = scmp.lt.s32.totalorder %s392_s4, %s388_s28 }
  0xf2   : > { %p390_p7 = pnand %p389_p4, %p497_p5 }
  0xf3   : > { %p395_p11 = por %p394_p10, %p393_p9 }
  0xf4   : > { %p391_p8 = pneg %p390_p7 }
  0xf6   : > { %p396_p12 = pnand %p395_p11, %p391_p8 }
  0xf8   : > { %399 = shalt.err (!%p396_p12)
}
  0xf9   : > { %331 = dma.vmem_to_hbm [thread:$0]  (%p497_p5), %s528_s11, 16, %s526_s20, %s242_s24   ;;  %v330_v18 = vpop.f32.mrf.mxu0 }
  0xfa PF: > { %p337_p13 = scmp.ge.s32.totalorder %s434_s15, 2  ;;  %s266_s7 = sand.u32 1, %s422_s12  }
  0xfb   : > { %s267_s8 = scalar_lea.sflag [#allocation3], %s266_s7 }
  0xfc   : > { %p334_p0 = pnand %p337_p13, %p501_p6 }
  0xfe   : > { %p335_p1 = pneg %p334_p0 }
 0x100   : > { %417 = dma.done.wait (%p335_p1), %s267_s8, 16  }
 0x101   : > { %419 = vsyncadd (%p335_p1), %s267_s8, 4294967280  ;;  %p13_p2 = scmp.ge.s32.totalorder %s484_s18, 4   ;;  %s573_s12 = smov %s426_s13 }
 0x102   : > { %s574_s13 = smov %s430_s14  ;;  %s575_s14 = smov %s495_s21 }
 0x103   : > { %s576_s15 = smov %s484_s18  ;;  %15 = sbr.rel (!%p13_p2) target bundleno = 3 (0x3), region = 67 }
 0x108   :  { %271 = vsyncpa [#allocation3], 1 }
 0x109   :  { %273 = vsyncpa [#allocation3 + $0x1], 1 }

// kernel: squeezenet_forward.21
= control target key start
LH: loop header
LB: loop body
LE: loop exit
PB: predicated region body
PF: predicated region fallthrough
CT: control target
= control target key end

     0   :  { %s1120_s27 = smov 0   ;;  %s1251_s0 = inlined_call_operand.vmem [shape: f32[2,4,32], index: 0, kind: input, shape index: {}]   ;;  %s1252_s1 = inlined_call_operand.vmem [shape: bf16[32,8], index: 1, kind: input, shape index: {}]   ;;  %s1253_s2 = inlined_call_operand.vmem [shape: f32[1,8], index: 2, kind: input, shape index: {}]   ;;  %s1254_s3 = inlined_call_operand.vmem [shape: f32[1,8], index: 3, kind: input, shape index: {}]   ;;  %s1255_s4 = inlined_call_operand.vmem [shape: bf16[9,8,32], index: 4, kind: input, shape index: {}]   ;;  %s1256_s5 = inlined_call_operand.vmem [shape: f32[1,32], index: 5, kind: input, shape index: {}]   ;;  %s1257_s6 = inlined_call_operand.vmem [shape: f32[1,32], index: 6, kind: input, shape index: {}]   ;;  %s1258_s7 = inlined_call_operand.vmem [shape: f32[2,4,1], index: 7, kind: input, shape index: {}]   ;;  %s1259_s8 = inlined_call_operand.vmem [shape: f32[2,4,32], index: 8, kind: output, shape index: {}]  }
   0x1 LB: > { %s933_s28 = sadd.s32 4294967295, %s1070_s27   ;;  %p937_p0 = scmp.ge.s32.totalorder %s1070_s27, 1  ;;  %s1070_s27 = sphi %s1120_s27, %s18_s27  }
   0x2   : > { %p261_p1 = scmp.lt.s32.totalorder %s1070_s27, 3 }
   0x4   : > { %p262_p2 = pnand %p937_p0, %p261_p1 }
   0x5   : > { %p293_p3 = scmp.lt.s32.totalorder (!%p262_p2), %s933_s28, 1 }
   0x6   : > { %265 = sbr.rel (%p262_p2) target bundleno = 469 (0x1d5), region = 52 }
   0xb   : > { %v1062_v0 = vld [vmem:[%s1252_s1 + $0x8] sm:$0xff]   ;;  %v1072_v1 = vmov 0.0   ;;  %v1063_v2 = vld [vmem:[%s1252_s1] sm:$0xff]   ;;  %vm1073_vm0 = vmmov 0   ;;  %v1074_v4 = vmov 0   ;;  %s1261_s28 = smov (!%p293_p3, %s933_s28), 1 }
   0xc   : > { %988 = vmatprep.subr.bf16.mxu0 %v1072_v1  ;;  %996 = vmatprep.subr.bf16.mxu1 %v1072_v1  ;;  %v390_v3 = vld [vmem:[%s1258_s7] sm:$0xf]  ;;  %v950_v5 = vld [vmem:[%s1258_s7 + $0x4] sm:$0xf]  ;;  %s938_s15 = sshll.u32 %s1261_s28, 2  ;;  %vm320_vm1 = vcmask 261120  }
   0xd   : > { %989 = vmatpush3.bf16.msra.mxu0 %v1062_v0  ;;  %992 = vmatprep.mubr.msk.bf16.mxu0 %vm1073_vm0, %v1072_v1  ;;  %s296_s18 = scalar_lea.vmem %s1251_s0, %s938_s15  ;;  %vm381_vm2 = vcmask 59392   ;;  %vm403_vm3 = vcmask 1043456   ;;  %v948_v8 = vld [vmem:[%s1255_s4 + $0x4] sm:$0xf]  ;;  %v398_v10 = vld [vmem:[%s1255_s4] sm:$0xf]  ;;  %s300_s30 = scalar_lea.vmem %s1259_s8, %s938_s15 }
   0xe   : > { %990 = vmatprep.subr.bf16.mxu0 %v1072_v1  ;;  %1061 = vset.pattern.permute.xlu0 %v1074_v4  ;;  %v1156_v6 = vld [vmem:[%s296_s18] sm:$0xf]  ;;  %382 = vst.msk [vmem:[#allocation2] sm:$0x7] %vm381_vm2, %v1072_v1  ;;  %383 = vst.msk [vmem:[#allocation2 + $0x7] sm:$0x7] %vm381_vm2, %v1072_v1 }
   0xf   : > { %393 = vperm.xlu0 %1061, %v390_v3   ;;  %998 = vmatprep.mubr.msk.bf16.mxu1 %vm1073_vm0, %v1072_v1  ;;  %v303_v7 = vpack.c.bf16 %v1156_v6, %v1156_v6  ;;  %v501_v9 = vsel %vm403_vm3, %v948_v8, 0  ;;  %v405_v11 = vsel %vm403_vm3, %v398_v10, 0  ;;  %v943_v12 = vld [vmem:[%s1253_s2] ss:$0 sm:$0xff]  ;;  %vm384_vm4 = vcmask 60416  }
  0x10   : > { %997 = vmatpush3.bf16.msra.mxu1 %v405_v11  ;;  %v944_v14 = vld [vmem:[%s1254_s3] ss:$0 sm:$0xff]  ;;  %v953_v21 = vld [vmem:[%s1255_s4 + $0xc] sm:$0xf]  ;;  %v945_v24 = vld [vmem:[%s1255_s4 + $0x10] sm:$0xf] }
  0x11   : > { %991 = vmatpush3.bf16.msra.mxu0 %v1063_v2  ;;  %1002 = vmatprep.subr.bf16.mxu1 %v1072_v1  ;;  %vm399_vm5 = vcmask 64512   ;;  %v611_v28 = vsel %vm403_vm3, %v953_v21, 0  ;;  %v451_v31 = vsel %vm403_vm3, %v945_v24, 0  ;;  %v957_v33 = vld [vmem:[%s1255_s4 + $0x18] sm:$0xf]  ;;  %vm878_vm6 = vcmask 257024  }
  0x12   : > { %1008 = vmatprep.subr.bf16.mxu0 %v1072_v1  ;;  %v951_v34 = vld [vmem:[%s1255_s4 + $0x8] sm:$0xf]  ;;  %v714_v36 = vsel %vm403_vm3, %v957_v33, 0  ;;  %v961_v43 = vld [vmem:[%s1255_s4 + $0x20] sm:$0xf] }
  0x13   : > { %549 = vperm.xlu0 %1061, %v950_v5   ;;  %v560_v39 = vsel %vm403_vm3, %v951_v34, 0  ;;  %v955_v44 = vld [vmem:[%s1255_s4 + $0x14] sm:$0xf]  ;;  %v817_v46 = vsel %vm403_vm3, %v961_v43, 0  ;;  %v959_v52 = vld [vmem:[%s1255_s4 + $0x1c] sm:$0xf] }
  0x14   : > { %993 = vmatmul.mubr.msk.bf16.vlgmr.msra.gmra.mxu0 %vm320_vm1, %v303_v7  ;;  %v663_v49 = vsel %vm403_vm3, %v955_v44, 0  ;;  %v765_v55 = vsel %vm403_vm3, %v959_v52, 0 }
  0x15   : > { %1010 = vmatprep.mubr.msk.bf16.mxu0 %vm1073_vm0, %v1072_v1  ;;  %1009 = vmatpush3.bf16.msra.mxu0 %v501_v9 }
  0x16   : > { %1020 = vmatprep.subr.bf16.mxu0 %v1072_v1 }
  0x8a   : > { %v394_v22 = vpop.permute.xlu0 %393 }
  0x8e   : > { %v550_v40 = vpop.permute.xlu0 %549 }
  0xd4   : > { %v358_v13 = vpop.f32.mrf.mxu0 }
  0xd5   : > { %v371_v15 = vmul.f32 %v943_v12, %v358_v13 }
  0xd6   : > { %v994_v16 = vpop.f32.mrf.mxu0 }
  0xd7   : > { %v379_v17 = vadd.f32 %v944_v14, %v371_v15 }
  0xd8   : > { %v361_v18 = vpop.f32.mrf.mxu0 }
  0xd9   : > { %v380_v19 = vmax.f32 %v379_v17, 0.0 }
  0xda   : > { %v995_v20 = vpop.f32.mrf.mxu0 }
  0xdb   : > { %385 = vst.msk [vmem:[#allocation2 + $0x3] sm:$0xf] %vm384_vm4, %v380_v19  ;;  %v386_v37 = vpack.c.bf16 %v380_v19, %v380_v19 }
  0xe2   : > { %v389_v23 = vld [vmem:[#allocation2] sm:$0xf]  ;;  %v654_v38 = vld [vmem:[#allocation2 + $0x4] sm:$0xf] }
  0xe3   : > { %v396_v25 = vmul.f32 %v394_v22, %v389_v23  ;;  %v493_v26 = vld [vmem:[#allocation2 + $0x1] sm:$0xf]  ;;  %v706_v41 = vmul.f32 %v654_v38, %v394_v22  ;;  %v808_v48 = vld [vmem:[#allocation2 + $0x6] sm:$0xf]  ;;  %v655_v51 = vmul.f32 %v654_v38, %v550_v40  ;;  %v964_v38 = vld [vmem:[%s1257_s6] ss:$0 sm:$0xff] }
  0xe4   : > { %v494_v27 = vpack.c.bf16 %v493_v26, %v493_v26  ;;  %v544_v30 = vld [vmem:[#allocation2 + $0x2] sm:$0xf]  ;;  %v809_v50 = vmul.f32 %v808_v48, %v550_v40 }
  0xe5   : > { %v397_v29 = vpack.c.bf16 %v396_v25, %v396_v25  ;;  %v603_v32 = vmul.f32 %v544_v30, %v394_v22  ;;  %v552_v42 = vmul.f32 %v550_v40, %v544_v30  ;;  %v707_v45 = vpack.c.bf16 %v706_v41, %v706_v41  ;;  %v757_v56 = vld [vmem:[#allocation2 + $0x5] sm:$0xf] }
  0xe6   : > { %1011 = vmatmul.mubr.msk.bf16.vlgmr.msra.gmra.mxu0 %vm399_vm5, %v494_v27  ;;  %v810_v53 = vpack.c.bf16 %v809_v50, %v809_v50  ;;  %v656_v54 = vpack.c.bf16 %v655_v51, %v655_v51  ;;  %v758_v57 = vpack.c.bf16 %v757_v56, %v757_v56 }
  0xe7   : > { %999 = vmatmul.mubr.msk.bf16.vlgmr.msra.gmra.mxu1 %vm399_vm5, %v397_v29  ;;  %1021 = vmatpush3.bf16.msra.mxu0 %v611_v28  ;;  %v604_v35 = vpack.c.bf16 %v603_v32, %v603_v32  ;;  %v553_v47 = vpack.c.bf16 %v552_v42, %v552_v42 }
  0xe8   : > { %1003 = vmatpush3.bf16.msra.mxu1 %v451_v31  ;;  %1022 = vmatprep.mubr.msk.bf16.mxu0 %vm1073_vm0, %v1072_v1 }
  0xe9   : > { %1004 = vmatprep.mubr.msk.bf16.mxu1 %vm1073_vm0, %v1072_v1  ;;  %1014 = vmatprep.subr.bf16.mxu1 %v1072_v1 }
  0xea   : > { %1032 = vmatprep.subr.bf16.mxu0 %v1072_v1 }
  0xee   : > { %1023 = vmatmul.mubr.msk.bf16.vlgmr.msra.gmra.mxu0 %vm399_vm5, %v604_v35  ;;  %v963_v35 = vld [vmem:[%s1256_s5] ss:$0 sm:$0xff] }
  0xef   : > { %1005 = vmatmul.mubr.msk.bf16.vlgmr.msra.gmra.mxu1 %vm399_vm5, %v386_v37  ;;  %1033 = vmatpush3.bf16.msra.mxu0 %v714_v36 }
  0xf0   : > { %1015 = vmatpush3.bf16.msra.mxu1 %v560_v39  ;;  %1034 = vmatprep.mubr.msk.bf16.mxu0 %vm1073_vm0, %v1072_v1 }
  0xf1   : > { %1016 = vmatprep.mubr.msk.bf16.mxu1 %vm1073_vm0, %v1072_v1  ;;  %1026 = vmatprep.subr.bf16.mxu1 %v1072_v1 }
  0xf2   : > { %1044 = vmatprep.subr.bf16.mxu0 %v1072_v1 }
  0xf6   : > { %1035 = vmatmul.mubr.msk.bf16.vlgmr.msra.gmra.mxu0 %vm399_vm5, %v707_v45 }
  0xf7   : > { %1017 = vmatmul.mubr.msk.bf16.vlgmr.msra.gmra.mxu1 %vm399_vm5, %v553_v47  ;;  %1045 = vmatpush3.bf16.msra.mxu0 %v817_v46 }
  0xf8   : > { %1027 = vmatpush3.bf16.msra.mxu1 %v663_v49  ;;  %1046 = vmatprep.mubr.msk.bf16.mxu0 %vm1073_vm0, %v1072_v1 }
  0xf9   : > { %1028 = vmatprep.mubr.msk.bf16.mxu1 %vm1073_vm0, %v1072_v1  ;;  %1038 = vmatprep.subr.bf16.mxu1 %v1072_v1 }
  0xfe   : > { %1047 = vmatmul.mubr.msk.bf16.vlgmr.msra.gmra.mxu0 %vm399_vm5, %v810_v53 }
  0xff   : > { %1029 = vmatmul.mubr.msk.bf16.vlgmr.msra.gmra.mxu1 %vm399_vm5, %v656_v54 }
 0x100   : > { %1039 = vmatpush3.bf16.msra.mxu1 %v765_v55  ;;  %1040 = vmatprep.mubr.msk.bf16.mxu1 %vm1073_vm0, %v1072_v1 }
 0x107   : > { %1041 = vmatmul.mubr.msk.bf16.vlgmr.msra.gmra.mxu1 %vm399_vm5, %v758_v57 }
 0x1a6   : > { %v537_v58 = vpop.f32.mrf.mxu0 }
 0x1a7   : > { %v441_v59 = vpop.f32.mrf.mxu1 }
 0x1a8   : > { %v1012_v60 = vpop.f32.mrf.mxu0 }
 0x1a9   : > { %v1000_v61 = vpop.f32.mrf.mxu1 }
 0x1aa   : > { %v540_v62 = vpop.f32.mrf.mxu0 }
 0x1ab   : > { %v444_v63 = vpop.f32.mrf.mxu1 }
 0x1ac   : > { %v1013_v0 = vpop.f32.mrf.mxu0 }
 0x1ad   : > { %v1001_v2 = vpop.f32.mrf.mxu1 }
 0x1ae   : > { %v647_v3 = vpop.f32.mrf.mxu0 }
 0x1af   : > { %v487_v4 = vpop.f32.mrf.mxu1 }
 0x1b0   : > { %v1024_v5 = vpop.f32.mrf.mxu0  ;;  %v488_v11 = vadd.f32 %v487_v4, %v441_v59 }
 0x1b1   : > { %v1006_v7 = vpop.f32.mrf.mxu1 }
 0x1b2   : > { %v650_v8 = vpop.f32.mrf.mxu0  ;;  %v543_v16 = vadd.f32 %v537_v58, %v488_v11 }
 0x1b3   : > { %v490_v9 = vpop.f32.mrf.mxu1 }
 0x1b4   : > { %v1025_v10 = vpop.f32.mrf.mxu0 }
 0x1b5   : > { %v1007_v1 = vpop.f32.mrf.mxu1 }
 0x1b6   : > { %v750_v12 = vpop.f32.mrf.mxu0 }
 0x1b7   : > { %v596_v13 = vpop.f32.mrf.mxu1 }
 0x1b8   : > { %v1036_v14 = vpop.f32.mrf.mxu0  ;;  %v602_v19 = vadd.f32 %v596_v13, %v543_v16 }
 0x1b9   : > { %v1018_v15 = vpop.f32.mrf.mxu1 }
 0x1ba   : > { %v753_v17 = vpop.f32.mrf.mxu0  ;;  %v653_v24 = vadd.f32 %v647_v3, %v602_v19 }
 0x1bb   : > { %v599_v18 = vpop.f32.mrf.mxu1 }
 0x1bc   : > { %v1037_v20 = vpop.f32.mrf.mxu0 }
 0x1bd   : > { %v1019_v21 = vpop.f32.mrf.mxu1 }
 0x1be   : > { %v853_v22 = vpop.f32.mrf.mxu0 }
 0x1bf   : > { %v699_v23 = vpop.f32.mrf.mxu1 }
 0x1c0   : > { %v1048_v25 = vpop.f32.mrf.mxu0  ;;  %v705_v27 = vadd.f32 %v699_v23, %v653_v24 }
 0x1c1   : > { %v1030_v26 = vpop.f32.mrf.mxu1 }
 0x1c2   : > { %v856_v28 = vpop.f32.mrf.mxu0  ;;  %v756_v32 = vadd.f32 %v750_v12, %v705_v27 }
 0x1c3   : > { %v702_v29 = vpop.f32.mrf.mxu1 }
 0x1c4   : > { %v1049_v30 = vpop.f32.mrf.mxu0 }
 0x1c5   : > { %v1031_v31 = vpop.f32.mrf.mxu1 }
 0x1c7   : > { %v801_v33 = vpop.f32.mrf.mxu1 }
 0x1c8   : > { %v807_v34 = vadd.f32 %v801_v33, %v756_v32 }
 0x1c9   : > { %v1042_v36 = vpop.f32.mrf.mxu1 }
 0x1ca   : > { %v859_v37 = vadd.f32 %v853_v22, %v807_v34 }
 0x1cb   : > { %v804_v39 = vpop.f32.mrf.mxu1 }
 0x1cc   : > { %v867_v40 = vmul.f32 %v963_v35, %v859_v37 }
 0x1cd   : > { %v1043_v41 = vpop.f32.mrf.mxu1 }
 0x1ce   : > { %v875_v42 = vadd.f32 %v964_v38, %v867_v40 }
 0x1d0   : > { %v876_v43 = vmax.f32 %v875_v42, 0.0 }
 0x1d2   : > { %v877_v44 = vadd.f32 %v876_v43, %v1156_v6 }
 0x1d4   : > { %879 = vst.msk [vmem:[%s300_s30] sm:$0xf] %vm878_vm6, %v877_v44 }
 0x1d5 PF: > { %s18_s27 = sadd.s32 1, %s1070_s27  }
 0x1d6   : > { %p15_p4 = scmp.ge.s32.totalorder %s18_s27, 4  }
 0x1d8   :  { %17 = sbr.rel (!%p15_p4) target bundleno = 1 (0x1), region = 91 }

</bundles_post_ra>
